<compile_context>
chip_gen: v7x
topology: tpu7x:2x2x1
jax: 0.10.0
libtpu: 0.0.40
codegen_flags: <defaults>
</compile_context>

<pallas_src>
import functools

import jax
import jax.numpy as jnp
from jax.experimental import pallas as pl
from jax.experimental.pallas import tpu as pltpu


# ----------------------------- Pallas kernels ------------------------------

def _mm_bias_relu_kernel(x_ref, w_ref, b_ref, o_ref):
    # 1x1 conv + folded BN + ReLU:  relu(x @ w_scaled + bias)
    x = x_ref[...].astype(jnp.bfloat16)
    y = jnp.dot(x, w_ref[...], preferred_element_type=jnp.float32) + b_ref[...]
    o_ref[...] = jnp.maximum(y, 0.0).astype(o_ref.dtype)


def _mm_bias_add_relu_kernel(y_ref, w_ref, b_ref, r_ref, o_ref):
    # conv3 + folded BN + identity residual + ReLU (residual added in f32)
    acc = jnp.dot(y_ref[...], w_ref[...], preferred_element_type=jnp.float32)
    y = acc + b_ref[...] + r_ref[...].astype(jnp.float32)
    o_ref[...] = jnp.maximum(y, 0.0).astype(o_ref.dtype)


def _mm_bias_down_add_relu_kernel(y_ref, w_ref, b_ref, x_ref, wd_ref, bd_ref,
                                  o_ref):
    # conv3 + BN + (downsample 1x1 conv + BN) residual + ReLU, fully fused:
    # the downsample matmul runs inside the same kernel so its (M, out_c)
    # result never touches HBM.
    acc = jnp.dot(y_ref[...], w_ref[...], preferred_element_type=jnp.float32)
    res = jnp.dot(x_ref[...].astype(jnp.bfloat16), wd_ref[...],
                  preferred_element_type=jnp.float32)
    y = acc + b_ref[...] + res + bd_ref[...]
    o_ref[...] = jnp.maximum(y, 0.0).astype(o_ref.dtype)


def _conv3x3_kernel(x_ref, w_ref, b_ref, o_ref, *, stride, th, wo, cout):
    # Direct 3x3 conv + folded BN + ReLU.
    #   x_ref: (1, Hp, stride, Wq, C) bf16 -- whole padded (phase-split) image,
    #          resident in VMEM across all output-row tiles of this image.
    #   w_ref: (9, C, Cout) bf16, tap-major, BN scale folded in.
    #   b_ref: (1, Cout) f32.
    #   o_ref: (1, th, Wo, Cout) bf16.
    t = pl.program_id(1)
    bias = b_ref[...]
    for r in range(th):                          # static unroll over rows
        ho = t * th + r
        acc = jnp.zeros((wo, cout), jnp.float32)
        for kh in range(3):
            h = ho * stride + kh                 # dynamic index, leading dims
            rows = [x_ref[0, h, p] for p in range(stride)]   # each (Wq, C)
            for kw in range(3):
                off = kw // stride
                xs = rows[kw % stride][off:off + wo]          # (wo, C) bf16
                acc = acc + jnp.dot(xs, w_ref[kh * 3 + kw],
                                    preferred_element_type=jnp.float32)
        o_ref[0, r] = jnp.maximum(acc + bias, 0.0).astype(o_ref.dtype)


# ------------------------------ call helpers --------------------------------

def _vmem_cap_bytes():
    try:
        return int(pltpu.get_tpu_info().vmem_capacity_bytes)
    except Exception:
        return 128 * (1 << 20)


def _pick_tm(m):
    """Largest row tile that divides m (prefer >=2 grid steps for megacore);
    cap shrinks on small-VMEM parts (v7x)."""
    cap = 512 if _vmem_cap_bytes() >= 100 * (1 << 20) else 256
    best = None
    for t in (512, 256, 128, 64, 32, 16, 8):
        if t > cap or m % t:
            continue
        if best is None:
            best = t
        if m // t >= 2:
            return t, False
    if best is not None:
        return best, False
    return 256, True                     # rare fallback: pad rows


def _pick_divisor(n, cap):
    for t in range(min(cap, n), 0, -1):
        if n % t == 0:
            return t
    return 1


def _row_matmul(kernel, args, row_tiled, n_out, out_dtype, *, flops):
    """Row-tiled fused matmul pallas_call.

    args:      kernel inputs, in kernel-argument order.
    row_tiled: per-arg flag; True -> (tm, K) row tiles, False -> fully
               VMEM-resident (weights / biases).
    """
    m = args[row_tiled.index(True)].shape[0]
    tm, need_pad = _pick_tm(m)
    if need_pad:
        pad = (-m) % tm
        args = [jnp.pad(a, ((0, pad), (0, 0))) if t else a
                for a, t in zip(args, row_tiled)]
    mp = args[row_tiled.index(True)].shape[0]

    in_specs = []
    for a, t in zip(args, row_tiled):
        if t:
            in_specs.append(pl.BlockSpec((tm, a.shape[1]), lambda i: (i, 0)))
        else:
            in_specs.append(
                pl.BlockSpec(a.shape, lambda i, nd=a.ndim: (0,) * nd))

    bytes_accessed = sum(int(a.size) * a.dtype.itemsize for a in args)
    bytes_accessed += mp * n_out * jnp.dtype(out_dtype).itemsize

    out = pl.pallas_call(
        kernel,
        out_shape=jax.ShapeDtypeStruct((mp, n_out), out_dtype),
        grid=(mp // tm,),
        in_specs=in_specs,
        out_specs=pl.BlockSpec((tm, n_out), lambda i: (i, 0)),
        compiler_params=pltpu.CompilerParams(
            dimension_semantics=("parallel",)),
        cost_estimate=pl.CostEstimate(flops=int(flops), transcendentals=0,
                                      bytes_accessed=int(bytes_accessed)),
    )(*args)
    return out[:m] if need_pad else out


def _conv3x3_bn_relu(y1, w2, b2, *, stride):
    """Direct 3x3 conv (pad=1, given stride) + folded BN + ReLU, bf16 out."""
    n, h, w, c = y1.shape
    cout = w2.shape[-1]
    ho = (h - 1) // stride + 1
    wo = (w - 1) // stride + 1
    hp = h + 2
    wp = w + 2 + ((-(w + 2)) % stride)       # make W axis splittable by stride
    xp = jnp.pad(y1, ((0, 0), (1, 1), (1, wp - w - 1), (0, 0)))
    # Phase-split W so strided column access becomes contiguous slices.
    xp = xp.reshape(n, hp, wp // stride, stride, c).transpose(0, 1, 3, 2, 4)
    wq = wp // stride

    # Row tile: x block is resident across the row-tile axis, so a wider tile
    # only costs a slightly larger output block while cutting grid steps.
    th = _pick_divisor(ho, 8)
    kernel = functools.partial(_conv3x3_kernel, stride=stride, th=th,
                               wo=wo, cout=cout)
    return pl.pallas_call(
        kernel,
        out_shape=jax.ShapeDtypeStruct((n, ho, wo, cout), jnp.bfloat16),
        grid=(n, ho // th),
        in_specs=[
            pl.BlockSpec((1, hp, stride, wq, c), lambda i, j: (i, 0, 0, 0, 0)),
            pl.BlockSpec((9, c, cout), lambda i, j: (0, 0, 0)),
            pl.BlockSpec((1, cout), lambda i, j: (0, 0)),
        ],
        out_specs=pl.BlockSpec((1, th, wo, cout), lambda i, j: (i, j, 0, 0)),
        compiler_params=pltpu.CompilerParams(
            dimension_semantics=("parallel", "parallel")),
        cost_estimate=pl.CostEstimate(
            flops=int(2 * n * ho * wo * 9 * c * cout),
            transcendentals=0,
            bytes_accessed=int(xp.size * 2 + w2.size * 2 + b2.size * 4
                               + n * ho * wo * cout * 2)),
    )(xp, w2, b2)


# ------------------------------- glue (JAX) ---------------------------------

_EPS = 1e-5


def _fold_bn(bn):
    gamma, beta, mean, var = bn
    scale = gamma / jnp.sqrt(var + _EPS)
    bias = beta - mean * scale
    return scale, bias


def _fold_conv1x1(w_oihw, bn):
    # torch (O, I, 1, 1) -> (I, O) with the BN scale folded in; bf16 W, f32 b.
    scale, bias = _fold_bn(bn)
    w = jnp.transpose(w_oihw[:, :, 0, 0], (1, 0)) * scale[None, :]
    return w.astype(jnp.bfloat16), bias.reshape(1, -1).astype(jnp.float32)


def _fold_conv3x3(w_oihw, bn):
    # torch (O, I, 3, 3) -> (9, I, O) tap-major with the BN scale folded in.
    scale, bias = _fold_bn(bn)
    o, i = w_oihw.shape[0], w_oihw.shape[1]
    w = jnp.transpose(w_oihw, (2, 3, 1, 0)).reshape(9, i, o) * scale[None, None, :]
    return w.astype(jnp.bfloat16), bias.reshape(1, -1).astype(jnp.float32)


def bottleneck_forward(x_nchw, params, *, stride, has_downsample):
    """ResNet Bottleneck forward (eval-mode BN). Input/output are NCHW."""
    x = jnp.transpose(x_nchw, (0, 2, 3, 1)).astype(jnp.float32)   # NHWC
    n, h, w, cin = x.shape
    planes = params["conv1_w"].shape[0]
    out_c = planes * 4

    w1, b1 = _fold_conv1x1(params["conv1_w"], params["bn1"])      # (Cin, planes)
    w2, b2 = _fold_conv3x3(params["conv2_w"], params["bn2"])      # (9, planes, planes)
    w3, b3 = _fold_conv1x1(params["conv3_w"], params["bn3"])      # (planes, out_c)

    # conv1 (1x1) + bn1 + relu  -> bf16 activation
    x2d = x.reshape(-1, cin)
    y1 = _row_matmul(_mm_bias_relu_kernel, [x2d, w1, b1],
                     [True, False, False], planes, jnp.bfloat16,
                     flops=2 * x2d.shape[0] * cin * planes)
    y1 = y1.reshape(n, h, w, planes)

    # conv2 (3x3, stride, pad=1) + bn2 + relu  -- direct conv, no im2col
    y2 = _conv3x3_bn_relu(y1, w2, b2, stride=stride)
    _, ho, wo, _ = y2.shape
    y2_2d = y2.reshape(-1, planes)
    m2 = y2_2d.shape[0]

    # conv3 (1x1) + bn3 + residual add + relu, fused in one kernel
    if has_downsample:
        wd, bd = _fold_conv1x1(params["down_w"], params["bn_d"])  # (Cin, out_c)
        xs = x[:, ::stride, ::stride, :].reshape(-1, cin)
        out = _row_matmul(_mm_bias_down_add_relu_kernel,
                          [y2_2d, w3, b3, xs, wd, bd],
                          [True, False, False, True, False, False],
                          out_c, jnp.float32,
                          flops=2 * m2 * out_c * (planes + cin))
    else:
        assert stride == 1 and cin == out_c, \
            "identity residual requires stride==1 and inplanes == planes*4"
        out = _row_matmul(_mm_bias_add_relu_kernel,
                          [y2_2d, w3, b3, x2d],
                          [True, False, False, True],
                          out_c, jnp.float32,
                          flops=2 * m2 * planes * out_c)
    out = out.reshape(n, ho, wo, out_c)
    return jnp.transpose(out, (0, 3, 1, 2))                       # back to NCHW


# --------------------------- pure-JAX reference -----------------------------

def _ref_conv(x_nchw, w, stride=1, padding=0):
    return jax.lax.conv_general_dilated(
        x_nchw, w, (stride, stride), [(padding, padding)] * 2,
        dimension_numbers=("NCHW", "OIHW", "NCHW"))


def _ref_bn(x_nchw, bn):
    gamma, beta, mean, var = bn
    scale = gamma / jnp.sqrt(var + _EPS)
    bias = beta - mean * scale
    return x_nchw * scale[None, :, None, None] + bias[None, :, None, None]


def bottleneck_reference(x, p, *, stride, has_downsample):
    residual = x
    out = jnp.maximum(_ref_bn(_ref_conv(x, p["conv1_w"]), p["bn1"]), 0.0)
    out = jnp.maximum(_ref_bn(_ref_conv(out, p["conv2_w"], stride, 1), p["bn2"]), 0.0)
    out = _ref_bn(_ref_conv(out, p["conv3_w"]), p["bn3"])
    if has_downsample:
        residual = _ref_bn(_ref_conv(x, p["down_w"], stride, 0), p["bn_d"])
    return jnp.maximum(out + residual, 0.0)


# ------------------------------ params / main -------------------------------

def _winit(key, shape):
    return 0.1 * jax.random.normal(key, shape, jnp.float32)


def _bn_init(key, c):
    k1, k2, k3, k4 = jax.random.split(key, 4)
    gamma = 1.0 + 0.1 * jax.random.normal(k1, (c,), jnp.float32)
    beta = 0.1 * jax.random.normal(k2, (c,), jnp.float32)
    mean = 0.1 * jax.random.normal(k3, (c,), jnp.float32)
    var = jnp.abs(jax.random.normal(k4, (c,), jnp.float32)) + 0.5
    return (gamma, beta, mean, var)


def make_params(key, inplanes, planes, has_downsample):
    ks = jax.random.split(key, 8)
    out_c = planes * 4
    p = {
        "conv1_w": _winit(ks[0], (planes, inplanes, 1, 1)),
        "bn1": _bn_init(ks[1], planes),
        "conv2_w": _winit(ks[2], (planes, planes, 3, 3)),
        "bn2": _bn_init(ks[3], planes),
        "conv3_w": _winit(ks[4], (out_c, planes, 1, 1)),
        "bn3": _bn_init(ks[5], out_c),
    }
    if has_downsample:
        p["down_w"] = _winit(ks[6], (out_c, inplanes, 1, 1))
        p["bn_d"] = _bn_init(ks[7], out_c)
    return p


if __name__ == "__main__":
    key = jax.random.PRNGKey(0)
    k_x1, k_p1, k_x2, k_p2 = jax.random.split(key, 4)

    # bf16 MXU operands with f32 accumulation -> slightly looser tolerance.
    TOL = 3e-2

    # Config A: downsample branch (inplanes=8, planes=4, stride=2)
    x1 = jax.random.normal(k_x1, (2, 8, 16, 16), jnp.float32)
    p1 = make_params(k_p1, inplanes=8, planes=4, has_downsample=True)
    fwd1 = jax.jit(functools.partial(bottleneck_forward, stride=2,
                                     has_downsample=True))
    out1 = fwd1(x1, p1)
    jax.block_until_ready(out1)
    ref1 = bottleneck_reference(x1, p1, stride=2, has_downsample=True)
    assert out1.shape == (2, 16, 8, 8), out1.shape
    assert float(jnp.max(jnp.abs(out1 - ref1))) < TOL

    # Config B: identity residual (inplanes=16 == planes*4, stride=1)
    x2 = jax.random.normal(k_x2, (2, 16, 16, 16), jnp.float32)
    p2 = make_params(k_p2, inplanes=16, planes=4, has_downsample=False)
    fwd2 = jax.jit(functools.partial(bottleneck_forward, stride=1,
                                     has_downsample=False))
    out2 = fwd2(x2, p2)
    jax.block_until_ready(out2)
    ref2 = bottleneck_reference(x2, p2, stride=1, has_downsample=False)
    assert out2.shape == (2, 16, 16, 16), out2.shape
    assert float(jnp.max(jnp.abs(out2 - ref2))) < TOL

    print("KERNEL_OK")
</pallas_src>

<mosaic_0001>
module attributes {stable_mosaic.version = 11 : i64} {
  func.func @_mm_bias_relu_kernel(%arg0: i32, %arg1: memref<256x8xf32, #tpu.memory_space<vmem>>, %arg2: memref<8x4xbf16, #tpu.memory_space<vmem>>, %arg3: memref<1x4xf32, #tpu.memory_space<vmem>>, %arg4: memref<256x4xbf16, #tpu.memory_space<vmem>>) attributes {dimension_semantics = [#tpu.dimension_semantics<parallel>], iteration_bounds = array<i64: 2>, scalar_prefetch = 0 : i64, scratch_operands = 0 : i64, tpu.core_type = #tpu.core_type<tc>, window_params = [{transform_indices = @transform_0, window_bounds = array<i64: 256, 8>}, {pipeline_mode = #tpu.pipeline_mode<synchronous>, transform_indices = @transform_1, window_bounds = array<i64: 8, 4>}, {pipeline_mode = #tpu.pipeline_mode<synchronous>, transform_indices = @transform_2, window_bounds = array<i64: 1, 4>}, {transform_indices = @transform_3, window_bounds = array<i64: 256, 4>}]} {
    %c0 = arith.constant 0 : index
    %c0_0 = arith.constant 0 : index
    %0 = vector.load %arg1[%c0, %c0_0] : memref<256x8xf32, #tpu.memory_space<vmem>>, vector<256x8xf32>
    %1 = arith.truncf %0 : vector<256x8xf32> to vector<256x8xbf16>
    %c0_1 = arith.constant 0 : index
    %c0_2 = arith.constant 0 : index
    %2 = vector.load %arg2[%c0_1, %c0_2] : memref<8x4xbf16, #tpu.memory_space<vmem>>, vector<8x4xbf16>
    %cst = arith.constant dense<0.000000e+00> : vector<256x4xf32>
    %3 = tpu.matmul %1, %2, %cst {dimension_numbers = #tpu.dot_dimension_numbers<[1], [0], [0], [1], [0, 0, 1, 1], [], []>} : vector<256x8xbf16>, vector<8x4xbf16>, vector<256x4xf32> -> vector<256x4xf32>
    %c0_3 = arith.constant 0 : index
    %c0_4 = arith.constant 0 : index
    %4 = vector.load %arg3[%c0_3, %c0_4] : memref<1x4xf32, #tpu.memory_space<vmem>>, vector<1x4xf32>
    %5 = vector.broadcast %4 : vector<1x4xf32> to vector<256x4xf32>
    %6 = arith.addf %3, %5 : vector<256x4xf32>
    %cst_5 = arith.constant 0.000000e+00 : f32
    %7 = vector.broadcast %cst_5 : f32 to vector<256x4xf32>
    %8 = arith.maximumf %6, %7 : vector<256x4xf32>
    %9 = arith.truncf %8 : vector<256x4xf32> to vector<256x4xbf16>
    %c0_6 = arith.constant 0 : index
    %c0_7 = arith.constant 0 : index
    %10 = vector.load %arg4[%c0_6, %c0_7] : memref<256x4xbf16, #tpu.memory_space<vmem>>, vector<256x4xbf16>
    tpu.vector_store %arg4[%c0_6, %c0_7], %9 {strides = array<i32>} : memref<256x4xbf16, #tpu.memory_space<vmem>>, vector<256x4xbf16>,
    return
  }
  func.func @transform_0(%arg0: i32) -> (i32, i32) {
    %c0_i32 = arith.constant 0 : i32
    %c0_i32_0 = arith.constant 0 : i32
    return %arg0, %c0_i32 : i32, i32
  }
  func.func @transform_1(%arg0: i32) -> (i32, i32) {
    %c0_i32 = arith.constant 0 : i32
    %c0_i32_0 = arith.constant 0 : i32
    %c0_i32_1 = arith.constant 0 : i32
    return %c0_i32, %c0_i32_0 : i32, i32
  }
  func.func @transform_2(%arg0: i32) -> (i32, i32) {
    %c0_i32 = arith.constant 0 : i32
    %c0_i32_0 = arith.constant 0 : i32
    %c0_i32_1 = arith.constant 0 : i32
    return %c0_i32, %c0_i32_0 : i32, i32
  }
  func.func @transform_3(%arg0: i32) -> (i32, i32) {
    %c0_i32 = arith.constant 0 : i32
    %c0_i32_0 = arith.constant 0 : i32
    return %arg0, %c0_i32 : i32, i32
  }
}

module attributes {stable_mosaic.version = 11 : i64} {
  func.func @_conv3x3_kernel(%arg0: i32, %arg1: i32, %arg2: memref<1x18x2x9x4xbf16, #tpu.memory_space<vmem>>, %arg3: memref<9x4x4xbf16, #tpu.memory_space<vmem>>, %arg4: memref<1x4xf32, #tpu.memory_space<vmem>>, %arg5: memref<1x8x8x4xbf16, #tpu.memory_space<vmem>>) attributes {dimension_semantics = [#tpu.dimension_semantics<parallel>, #tpu.dimension_semantics<parallel>], iteration_bounds = array<i64: 2, 1>, scalar_prefetch = 0 : i64, scratch_operands = 0 : i64, tpu.core_type = #tpu.core_type<tc>, window_params = [{transform_indices = @transform_0, window_bounds = array<i64: 1, 18, 2, 9, 4>}, {pipeline_mode = #tpu.pipeline_mode<synchronous>, transform_indices = @transform_1, window_bounds = array<i64: 9, 4, 4>}, {pipeline_mode = #tpu.pipeline_mode<synchronous>, transform_indices = @transform_2, window_bounds = array<i64: 1, 4>}, {transform_indices = @transform_3, window_bounds = array<i64: 1, 8, 8, 4>}]} {
    %c0 = arith.constant 0 : index
    %c0_0 = arith.constant 0 : index
    %0 = vector.load %arg4[%c0, %c0_0] : memref<1x4xf32, #tpu.memory_space<vmem>>, vector<1x4xf32>
    %c8_i32 = arith.constant 8 : i32
    %1 = arith.muli %arg1, %c8_i32 : i32
    %c0_i32 = arith.constant 0 : i32
    %2 = arith.addi %1, %c0_i32 : i32
    %cst = arith.constant 0.000000e+00 : f32
    %3 = vector.broadcast %cst : f32 to vector<8x4xf32>
    %c2_i32 = arith.constant 2 : i32
    %4 = arith.muli %2, %c2_i32 : i32
    %c0_i32_1 = arith.constant 0 : i32
    %5 = arith.addi %4, %c0_i32_1 : i32
    %c0_2 = arith.constant 0 : index
    %6 = arith.index_cast %5 : i32 to index
    %c0_3 = arith.constant 0 : index
    %c0_4 = arith.constant 0 : index
    %c0_5 = arith.constant 0 : index
    %7 = vector.load %arg2[%c0_2, %6, %c0_3, %c0_4, %c0_5] : memref<1x18x2x9x4xbf16, #tpu.memory_space<vmem>>, vector<1x1x1x9x4xbf16>
    %8 = vector.shape_cast %7 : vector<1x1x1x9x4xbf16> to vector<9x4xbf16>
    %c0_6 = arith.constant 0 : index
    %9 = arith.index_cast %5 : i32 to index
    %c1 = arith.constant 1 : index
    %c0_7 = arith.constant 0 : index
    %c0_8 = arith.constant 0 : index
    %10 = vector.load %arg2[%c0_6, %9, %c1, %c0_7, %c0_8] : memref<1x18x2x9x4xbf16, #tpu.memory_space<vmem>>, vector<1x1x1x9x4xbf16>
    %11 = vector.shape_cast %10 : vector<1x1x1x9x4xbf16> to vector<9x4xbf16>
    %12 = vector.extract_strided_slice %8 {offsets = [0, 0], sizes = [8, 4], strides = [1, 1]} : vector<9x4xbf16> to vector<8x4xbf16>
    %c0_9 = arith.constant 0 : index
    %c0_10 = arith.constant 0 : index
    %c0_11 = arith.constant 0 : index
    %13 = vector.load %arg3[%c0_9, %c0_10, %c0_11] : memref<9x4x4xbf16, #tpu.memory_space<vmem>>, vector<1x4x4xbf16>
    %14 = vector.shape_cast %13 : vector<1x4x4xbf16> to vector<4x4xbf16>
    %cst_12 = arith.constant dense<0.000000e+00> : vector<8x4xf32>
    %15 = tpu.matmul %12, %14, %cst_12 {dimension_numbers = #tpu.dot_dimension_numbers<[1], [0], [0], [1], [0, 0, 1, 1], [], []>} : vector<8x4xbf16>, vector<4x4xbf16>, vector<8x4xf32> -> vector<8x4xf32>
    %16 = arith.addf %3, %15 : vector<8x4xf32>
    %17 = vector.extract_strided_slice %11 {offsets = [0, 0], sizes = [8, 4], strides = [1, 1]} : vector<9x4xbf16> to vector<8x4xbf16>
    %c1_13 = arith.constant 1 : index
    %c0_14 = arith.constant 0 : index
    %c0_15 = arith.constant 0 : index
    %18 = vector.load %arg3[%c1_13, %c0_14, %c0_15] : memref<9x4x4xbf16, #tpu.memory_space<vmem>>, vector<1x4x4xbf16>
    %19 = vector.shape_cast %18 : vector<1x4x4xbf16> to vector<4x4xbf16>
    %cst_16 = arith.constant dense<0.000000e+00> : vector<8x4xf32>
    %20 = tpu.matmul %17, %19, %cst_16 {dimension_numbers = #tpu.dot_dimension_numbers<[1], [0], [0], [1], [0, 0, 1, 1], [], []>} : vector<8x4xbf16>, vector<4x4xbf16>, vector<8x4xf32> -> vector<8x4xf32>
    %21 = arith.addf %16, %20 : vector<8x4xf32>
    %22 = vector.extract_strided_slice %8 {offsets = [1, 0], sizes = [8, 4], strides = [1, 1]} : vector<9x4xbf16> to vector<8x4xbf16>
    %c2 = arith.constant 2 : index
    %c0_17 = arith.constant 0 : index
    %c0_18 = arith.constant 0 : index
    %23 = vector.load %arg3[%c2, %c0_17, %c0_18] : memref<9x4x4xbf16, #tpu.memory_space<vmem>>, vector<1x4x4xbf16>
    %24 = vector.shape_cast %23 : vector<1x4x4xbf16> to vector<4x4xbf16>
    %cst_19 = arith.constant dense<0.000000e+00> : vector<8x4xf32>
    %25 = tpu.matmul %22, %24, %cst_19 {dimension_numbers = #tpu.dot_dimension_numbers<[1], [0], [0], [1], [0, 0, 1, 1], [], []>} : vector<8x4xbf16>, vector<4x4xbf16>, vector<8x4xf32> -> vector<8x4xf32>
    %26 = arith.addf %21, %25 : vector<8x4xf32>
    %c2_i32_20 = arith.constant 2 : i32
    %27 = arith.muli %2, %c2_i32_20 : i32
    %c1_i32 = arith.constant 1 : i32
    %28 = arith.addi %27, %c1_i32 : i32
    %c0_21 = arith.constant 0 : index
    %29 = arith.index_cast %28 : i32 to index
    %c0_22 = arith.constant 0 : index
    %c0_23 = arith.constant 0 : index
    %c0_24 = arith.constant 0 : index
    %30 = vector.load %arg2[%c0_21, %29, %c0_22, %c0_23, %c0_24] : memref<1x18x2x9x4xbf16, #tpu.memory_space<vmem>>, vector<1x1x1x9x4xbf16>
    %31 = vector.shape_cast %30 : vector<1x1x1x9x4xbf16> to vector<9x4xbf16>
    %c0_25 = arith.constant 0 : index
    %32 = arith.index_cast %28 : i32 to index
    %c1_26 = arith.constant 1 : index
    %c0_27 = arith.constant 0 : index
    %c0_28 = arith.constant 0 : index
    %33 = vector.load %arg2[%c0_25, %32, %c1_26, %c0_27, %c0_28] : memref<1x18x2x9x4xbf16, #tpu.memory_space<vmem>>, vector<1x1x1x9x4xbf16>
    %34 = vector.shape_cast %33 : vector<1x1x1x9x4xbf16> to vector<9x4xbf16>
    %35 = vector.extract_strided_slice %31 {offsets = [0, 0], sizes = [8, 4], strides = [1, 1]} : vector<9x4xbf16> to vector<8x4xbf16>
    %c3 = arith.constant 3 : index
    %c0_29 = arith.constant 0 : index
    %c0_30 = arith.constant 0 : index
    %36 = vector.load %arg3[%c3, %c0_29, %c0_30] : memref<9x4x4xbf16, #tpu.memory_space<vmem>>, vector<1x4x4xbf16>
    %37 = vector.shape_cast %36 : vector<1x4x4xbf16> to vector<4x4xbf16>
    %cst_31 = arith.constant dense<0.000000e+00> : vector<8x4xf32>
    %38 = tpu.matmul %35, %37, %cst_31 {dimension_numbers = #tpu.dot_dimension_numbers<[1], [0], [0], [1], [0, 0, 1, 1], [], []>} : vector<8x4xbf16>, vector<4x4xbf16>, vector<8x4xf32> -> vector<8x4xf32>
    %39 = arith.addf %26, %38 : vector<8x4xf32>
    %40 = vector.extract_strided_slice %34 {offsets = [0, 0], sizes = [8, 4], strides = [1, 1]} : vector<9x4xbf16> to vector<8x4xbf16>
    %c4 = arith.constant 4 : index
    %c0_32 = arith.constant 0 : index
    %c0_33 = arith.constant 0 : index
    %41 = vector.load %arg3[%c4, %c0_32, %c0_33] : memref<9x4x4xbf16, #tpu.memory_space<vmem>>, vector<1x4x4xbf16>
    %42 = vector.shape_cast %41 : vector<1x4x4xbf16> to vector<4x4xbf16>
    %cst_34 = arith.constant dense<0.000000e+00> : vector<8x4xf32>
    %43 = tpu.matmul %40, %42, %cst_34 {dimension_numbers = #tpu.dot_dimension_numbers<[1], [0], [0], [1], [0, 0, 1, 1], [], []>} : vector<8x4xbf16>, vector<4x4xbf16>, vector<8x4xf32> -> vector<8x4xf32>
    %44 = arith.addf %39, %43 : vector<8x4xf32>
    %45 = vector.extract_strided_slice %31 {offsets = [1, 0], sizes = [8, 4], strides = [1, 1]} : vector<9x4xbf16> to vector<8x4xbf16>
    %c5 = arith.constant 5 : index
    %c0_35 = arith.constant 0 : index
    %c0_36 = arith.constant 0 : index
    %46 = vector.load %arg3[%c5, %c0_35, %c0_36] : memref<9x4x4xbf16, #tpu.memory_space<vmem>>, vector<1x4x4xbf16>
    %47 = vector.shape_cast %46 : vector<1x4x4xbf16> to vector<4x4xbf16>
    %cst_37 = arith.constant dense<0.000000e+00> : vector<8x4xf32>
    %48 = tpu.matmul %45, %47, %cst_37 {dimension_numbers = #tpu.dot_dimension_numbers<[1], [0], [0], [1], [0, 0, 1, 1], [], []>} : vector<8x4xbf16>, vector<4x4xbf16>, vector<8x4xf32> -> vector<8x4xf32>
    %49 = arith.addf %44, %48 : vector<8x4xf32>
    %c2_i32_38 = arith.constant 2 : i32
    %50 = arith.muli %2, %c2_i32_38 : i32
    %c2_i32_39 = arith.constant 2 : i32
    %51 = arith.addi %50, %c2_i32_39 : i32
    %c0_40 = arith.constant 0 : index
    %52 = arith.index_cast %51 : i32 to index
    %c0_41 = arith.constant 0 : index
    %c0_42 = arith.constant 0 : index
    %c0_43 = arith.constant 0 : index
    %53 = vector.load %arg2[%c0_40, %52, %c0_41, %c0_42, %c0_43] : memref<1x18x2x9x4xbf16, #tpu.memory_space<vmem>>, vector<1x1x1x9x4xbf16>
    %54 = vector.shape_cast %53 : vector<1x1x1x9x4xbf16> to vector<9x4xbf16>
    %c0_44 = arith.constant 0 : index
    %55 = arith.index_cast %51 : i32 to index
    %c1_45 = arith.constant 1 : index
    %c0_46 = arith.constant 0 : index
    %c0_47 = arith.constant 0 : index
    %56 = vector.load %arg2[%c0_44, %55, %c1_45, %c0_46, %c0_47] : memref<1x18x2x9x4xbf16, #tpu.memory_space<vmem>>, vector<1x1x1x9x4xbf16>
    %57 = vector.shape_cast %56 : vector<1x1x1x9x4xbf16> to vector<9x4xbf16>
    %58 = vector.extract_strided_slice %54 {offsets = [0, 0], sizes = [8, 4], strides = [1, 1]} : vector<9x4xbf16> to vector<8x4xbf16>
    %c6 = arith.constant 6 : index
    %c0_48 = arith.constant 0 : index
    %c0_49 = arith.constant 0 : index
    %59 = vector.load %arg3[%c6, %c0_48, %c0_49] : memref<9x4x4xbf16, #tpu.memory_space<vmem>>, vector<1x4x4xbf16>
    %60 = vector.shape_cast %59 : vector<1x4x4xbf16> to vector<4x4xbf16>
    %cst_50 = arith.constant dense<0.000000e+00> : vector<8x4xf32>
    %61 = tpu.matmul %58, %60, %cst_50 {dimension_numbers = #tpu.dot_dimension_numbers<[1], [0], [0], [1], [0, 0, 1, 1], [], []>} : vector<8x4xbf16>, vector<4x4xbf16>, vector<8x4xf32> -> vector<8x4xf32>
    %62 = arith.addf %49, %61 : vector<8x4xf32>
    %63 = vector.extract_strided_slice %57 {offsets = [0, 0], sizes = [8, 4], strides = [1, 1]} : vector<9x4xbf16> to vector<8x4xbf16>
    %c7 = arith.constant 7 : index
    %c0_51 = arith.constant 0 : index
    %c0_52 = arith.constant 0 : index
    %64 = vector.load %arg3[%c7, %c0_51, %c0_52] : memref<9x4x4xbf16, #tpu.memory_space<vmem>>, vector<1x4x4xbf16>
    %65 = vector.shape_cast %64 : vector<1x4x4xbf16> to vector<4x4xbf16>
    %cst_53 = arith.constant dense<0.000000e+00> : vector<8x4xf32>
    %66 = tpu.matmul %63, %65, %cst_53 {dimension_numbers = #tpu.dot_dimension_numbers<[1], [0], [0], [1], [0, 0, 1, 1], [], []>} : vector<8x4xbf16>, vector<4x4xbf16>, vector<8x4xf32> -> vector<8x4xf32>
    %67 = arith.addf %62, %66 : vector<8x4xf32>
    %68 = vector.extract_strided_slice %54 {offsets = [1, 0], sizes = [8, 4], strides = [1, 1]} : vector<9x4xbf16> to vector<8x4xbf16>
    %c8 = arith.constant 8 : index
    %c0_54 = arith.constant 0 : index
    %c0_55 = arith.constant 0 : index
    %69 = vector.load %arg3[%c8, %c0_54, %c0_55] : memref<9x4x4xbf16, #tpu.memory_space<vmem>>, vector<1x4x4xbf16>
    %70 = vector.shape_cast %69 : vector<1x4x4xbf16> to vector<4x4xbf16>
    %cst_56 = arith.constant dense<0.000000e+00> : vector<8x4xf32>
    %71 = tpu.matmul %68, %70, %cst_56 {dimension_numbers = #tpu.dot_dimension_numbers<[1], [0], [0], [1], [0, 0, 1, 1], [], []>} : vector<8x4xbf16>, vector<4x4xbf16>, vector<8x4xf32> -> vector<8x4xf32>
    %72 = arith.addf %67, %71 : vector<8x4xf32>
    %73 = vector.broadcast %0 : vector<1x4xf32> to vector<8x4xf32>
    %74 = arith.addf %72, %73 : vector<8x4xf32>
    %cst_57 = arith.constant 0.000000e+00 : f32
    %75 = vector.broadcast %cst_57 : f32 to vector<8x4xf32>
    %76 = arith.maximumf %74, %75 : vector<8x4xf32>
    %77 = arith.truncf %76 : vector<8x4xf32> to vector<8x4xbf16>
    %c0_58 = arith.constant 0 : index
    %c0_59 = arith.constant 0 : index
    %c0_60 = arith.constant 0 : index
    %c0_61 = arith.constant 0 : index
    %78 = vector.load %arg5[%c0_58, %c0_59, %c0_60, %c0_61] : memref<1x8x8x4xbf16, #tpu.memory_space<vmem>>, vector<1x1x8x4xbf16>
    %79 = vector.shape_cast %78 : vector<1x1x8x4xbf16> to vector<8x4xbf16>
    %80 = vector.shape_cast %77 : vector<8x4xbf16> to vector<1x1x8x4xbf16>
    tpu.vector_store %arg5[%c0_58, %c0_59, %c0_60, %c0_61], %80 {strides = array<i32>} : memref<1x8x8x4xbf16, #tpu.memory_space<vmem>>, vector<1x1x8x4xbf16>,
    %c8_i32_62 = arith.constant 8 : i32
    %81 = arith.muli %arg1, %c8_i32_62 : i32
    %c1_i32_63 = arith.constant 1 : i32
    %82 = arith.addi %81, %c1_i32_63 : i32
    %cst_64 = arith.constant 0.000000e+00 : f32
    %83 = vector.broadcast %cst_64 : f32 to vector<8x4xf32>
    %c2_i32_65 = arith.constant 2 : i32
    %84 = arith.muli %82, %c2_i32_65 : i32
    %c0_i32_66 = arith.constant 0 : i32
    %85 = arith.addi %84, %c0_i32_66 : i32
    %c0_67 = arith.constant 0 : index
    %86 = arith.index_cast %85 : i32 to index
    %c0_68 = arith.constant 0 : index
    %c0_69 = arith.constant 0 : index
    %c0_70 = arith.constant 0 : index
    %87 = vector.load %arg2[%c0_67, %86, %c0_68, %c0_69, %c0_70] : memref<1x18x2x9x4xbf16, #tpu.memory_space<vmem>>, vector<1x1x1x9x4xbf16>
    %88 = vector.shape_cast %87 : vector<1x1x1x9x4xbf16> to vector<9x4xbf16>
    %c0_71 = arith.constant 0 : index
    %89 = arith.index_cast %85 : i32 to index
    %c1_72 = arith.constant 1 : index
    %c0_73 = arith.constant 0 : index
    %c0_74 = arith.constant 0 : index
    %90 = vector.load %arg2[%c0_71, %89, %c1_72, %c0_73, %c0_74] : memref<1x18x2x9x4xbf16, #tpu.memory_space<vmem>>, vector<1x1x1x9x4xbf16>
    %91 = vector.shape_cast %90 : vector<1x1x1x9x4xbf16> to vector<9x4xbf16>
    %92 = vector.extract_strided_slice %88 {offsets = [0, 0], sizes = [8, 4], strides = [1, 1]} : vector<9x4xbf16> to vector<8x4xbf16>
    %c0_75 = arith.constant 0 : index
    %c0_76 = arith.constant 0 : index
    %c0_77 = arith.constant 0 : index
    %93 = vector.load %arg3[%c0_75, %c0_76, %c0_77] : memref<9x4x4xbf16, #tpu.memory_space<vmem>>, vector<1x4x4xbf16>
    %94 = vector.shape_cast %93 : vector<1x4x4xbf16> to vector<4x4xbf16>
    %cst_78 = arith.constant dense<0.000000e+00> : vector<8x4xf32>
    %95 = tpu.matmul %92, %94, %cst_78 {dimension_numbers = #tpu.dot_dimension_numbers<[1], [0], [0], [1], [0, 0, 1, 1], [], []>} : vector<8x4xbf16>, vector<4x4xbf16>, vector<8x4xf32> -> vector<8x4xf32>
    %96 = arith.addf %83, %95 : vector<8x4xf32>
    %97 = vector.extract_strided_slice %91 {offsets = [0, 0], sizes = [8, 4], strides = [1, 1]} : vector<9x4xbf16> to vector<8x4xbf16>
    %c1_79 = arith.constant 1 : index
    %c0_80 = arith.constant 0 : index
    %c0_81 = arith.constant 0 : index
    %98 = vector.load %arg3[%c1_79, %c0_80, %c0_81] : memref<9x4x4xbf16, #tpu.memory_space<vmem>>, vector<1x4x4xbf16>
    %99 = vector.shape_cast %98 : vector<1x4x4xbf16> to vector<4x4xbf16>
    %cst_82 = arith.constant dense<0.000000e+00> : vector<8x4xf32>
    %100 = tpu.matmul %97, %99, %cst_82 {dimension_numbers = #tpu.dot_dimension_numbers<[1], [0], [0], [1], [0, 0, 1, 1], [], []>} : vector<8x4xbf16>, vector<4x4xbf16>, vector<8x4xf32> -> vector<8x4xf32>
    %101 = arith.addf %96, %100 : vector<8x4xf32>
    %102 = vector.extract_strided_slice %88 {offsets = [1, 0], sizes = [8, 4], strides = [1, 1]} : vector<9x4xbf16> to vector<8x4xbf16>
    %c2_83 = arith.constant 2 : index
    %c0_84 = arith.constant 0 : index
    %c0_85 = arith.constant 0 : index
    %103 = vector.load %arg3[%c2_83, %c0_84, %c0_85] : memref<9x4x4xbf16, #tpu.memory_space<vmem>>, vector<1x4x4xbf16>
    %104 = vector.shape_cast %103 : vector<1x4x4xbf16> to vector<4x4xbf16>
    %cst_86 = arith.constant dense<0.000000e+00> : vector<8x4xf32>
    %105 = tpu.matmul %102, %104, %cst_86 {dimension_numbers = #tpu.dot_dimension_numbers<[1], [0], [0], [1], [0, 0, 1, 1], [], []>} : vector<8x4xbf16>, vector<4x4xbf16>, vector<8x4xf32> -> vector<8x4xf32>
    %106 = arith.addf %101, %105 : vector<8x4xf32>
    %c2_i32_87 = arith.constant 2 : i32
    %107 = arith.muli %82, %c2_i32_87 : i32
    %c1_i32_88 = arith.constant 1 : i32
    %108 = arith.addi %107, %c1_i32_88 : i32
    %c0_89 = arith.constant 0 : index
    %109 = arith.index_cast %108 : i32 to index
    %c0_90 = arith.constant 0 : index
    %c0_91 = arith.constant 0 : index
    %c0_92 = arith.constant 0 : index
    %110 = vector.load %arg2[%c0_89, %109, %c0_90, %c0_91, %c0_92] : memref<1x18x2x9x4xbf16, #tpu.memory_space<vmem>>, vector<1x1x1x9x4xbf16>
    %111 = vector.shape_cast %110 : vector<1x1x1x9x4xbf16> to vector<9x4xbf16>
    %c0_93 = arith.constant 0 : index
    %112 = arith.index_cast %108 : i32 to index
    %c1_94 = arith.constant 1 : index
    %c0_95 = arith.constant 0 : index
    %c0_96 = arith.constant 0 : index
    %113 = vector.load %arg2[%c0_93, %112, %c1_94, %c0_95, %c0_96] : memref<1x18x2x9x4xbf16, #tpu.memory_space<vmem>>, vector<1x1x1x9x4xbf16>
    %114 = vector.shape_cast %113 : vector<1x1x1x9x4xbf16> to vector<9x4xbf16>
    %115 = vector.extract_strided_slice %111 {offsets = [0, 0], sizes = [8, 4], strides = [1, 1]} : vector<9x4xbf16> to vector<8x4xbf16>
    %c3_97 = arith.constant 3 : index
    %c0_98 = arith.constant 0 : index
    %c0_99 = arith.constant 0 : index
    %116 = vector.load %arg3[%c3_97, %c0_98, %c0_99] : memref<9x4x4xbf16, #tpu.memory_space<vmem>>, vector<1x4x4xbf16>
    %117 = vector.shape_cast %116 : vector<1x4x4xbf16> to vector<4x4xbf16>
    %cst_100 = arith.constant dense<0.000000e+00> : vector<8x4xf32>
    %118 = tpu.matmul %115, %117, %cst_100 {dimension_numbers = #tpu.dot_dimension_numbers<[1], [0], [0], [1], [0, 0, 1, 1], [], []>} : vector<8x4xbf16>, vector<4x4xbf16>, vector<8x4xf32> -> vector<8x4xf32>
    %119 = arith.addf %106, %118 : vector<8x4xf32>
    %120 = vector.extract_strided_slice %114 {offsets = [0, 0], sizes = [8, 4], strides = [1, 1]} : vector<9x4xbf16> to vector<8x4xbf16>
    %c4_101 = arith.constant 4 : index
    %c0_102 = arith.constant 0 : index
    %c0_103 = arith.constant 0 : index
    %121 = vector.load %arg3[%c4_101, %c0_102, %c0_103] : memref<9x4x4xbf16, #tpu.memory_space<vmem>>, vector<1x4x4xbf16>
    %122 = vector.shape_cast %121 : vector<1x4x4xbf16> to vector<4x4xbf16>
    %cst_104 = arith.constant dense<0.000000e+00> : vector<8x4xf32>
    %123 = tpu.matmul %120, %122, %cst_104 {dimension_numbers = #tpu.dot_dimension_numbers<[1], [0], [0], [1], [0, 0, 1, 1], [], []>} : vector<8x4xbf16>, vector<4x4xbf16>, vector<8x4xf32> -> vector<8x4xf32>
    %124 = arith.addf %119, %123 : vector<8x4xf32>
    %125 = vector.extract_strided_slice %111 {offsets = [1, 0], sizes = [8, 4], strides = [1, 1]} : vector<9x4xbf16> to vector<8x4xbf16>
    %c5_105 = arith.constant 5 : index
    %c0_106 = arith.constant 0 : index
    %c0_107 = arith.constant 0 : index
    %126 = vector.load %arg3[%c5_105, %c0_106, %c0_107] : memref<9x4x4xbf16, #tpu.memory_space<vmem>>, vector<1x4x4xbf16>
    %127 = vector.shape_cast %126 : vector<1x4x4xbf16> to vector<4x4xbf16>
    %cst_108 = arith.constant dense<0.000000e+00> : vector<8x4xf32>
    %128 = tpu.matmul %125, %127, %cst_108 {dimension_numbers = #tpu.dot_dimension_numbers<[1], [0], [0], [1], [0, 0, 1, 1], [], []>} : vector<8x4xbf16>, vector<4x4xbf16>, vector<8x4xf32> -> vector<8x4xf32>
    %129 = arith.addf %124, %128 : vector<8x4xf32>
    %c2_i32_109 = arith.constant 2 : i32
    %130 = arith.muli %82, %c2_i32_109 : i32
    %c2_i32_110 = arith.constant 2 : i32
    %131 = arith.addi %130, %c2_i32_110 : i32
    %c0_111 = arith.constant 0 : index
    %132 = arith.index_cast %131 : i32 to index
    %c0_112 = arith.constant 0 : index
    %c0_113 = arith.constant 0 : index
    %c0_114 = arith.constant 0 : index
    %133 = vector.load %arg2[%c0_111, %132, %c0_112, %c0_113, %c0_114] : memref<1x18x2x9x4xbf16, #tpu.memory_space<vmem>>, vector<1x1x1x9x4xbf16>
    %134 = vector.shape_cast %133 : vector<1x1x1x9x4xbf16> to vector<9x4xbf16>
    %c0_115 = arith.constant 0 : index
    %135 = arith.index_cast %131 : i32 to index
    %c1_116 = arith.constant 1 : index
    %c0_117 = arith.constant 0 : index
    %c0_118 = arith.constant 0 : index
    %136 = vector.load %arg2[%c0_115, %135, %c1_116, %c0_117, %c0_118] : memref<1x18x2x9x4xbf16, #tpu.memory_space<vmem>>, vector<1x1x1x9x4xbf16>
    %137 = vector.shape_cast %136 : vector<1x1x1x9x4xbf16> to vector<9x4xbf16>
    %138 = vector.extract_strided_slice %134 {offsets = [0, 0], sizes = [8, 4], strides = [1, 1]} : vector<9x4xbf16> to vector<8x4xbf16>
    %c6_119 = arith.constant 6 : index
    %c0_120 = arith.constant 0 : index
    %c0_121 = arith.constant 0 : index
    %139 = vector.load %arg3[%c6_119, %c0_120, %c0_121] : memref<9x4x4xbf16, #tpu.memory_space<vmem>>, vector<1x4x4xbf16>
    %140 = vector.shape_cast %139 : vector<1x4x4xbf16> to vector<4x4xbf16>
    %cst_122 = arith.constant dense<0.000000e+00> : vector<8x4xf32>
    %141 = tpu.matmul %138, %140, %cst_122 {dimension_numbers = #tpu.dot_dimension_numbers<[1], [0], [0], [1], [0, 0, 1, 1], [], []>} : vector<8x4xbf16>, vector<4x4xbf16>, vector<8x4xf32> -> vector<8x4xf32>
    %142 = arith.addf %129, %141 : vector<8x4xf32>
    %143 = vector.extract_strided_slice %137 {offsets = [0, 0], sizes = [8, 4], strides = [1, 1]} : vector<9x4xbf16> to vector<8x4xbf16>
    %c7_123 = arith.constant 7 : index
    %c0_124 = arith.constant 0 : index
    %c0_125 = arith.constant 0 : index
    %144 = vector.load %arg3[%c7_123, %c0_124, %c0_125] : memref<9x4x4xbf16, #tpu.memory_space<vmem>>, vector<1x4x4xbf16>
    %145 = vector.shape_cast %144 : vector<1x4x4xbf16> to vector<4x4xbf16>
    %cst_126 = arith.constant dense<0.000000e+00> : vector<8x4xf32>
    %146 = tpu.matmul %143, %145, %cst_126 {dimension_numbers = #tpu.dot_dimension_numbers<[1], [0], [0], [1], [0, 0, 1, 1], [], []>} : vector<8x4xbf16>, vector<4x4xbf16>, vector<8x4xf32> -> vector<8x4xf32>
    %147 = arith.addf %142, %146 : vector<8x4xf32>
    %148 = vector.extract_strided_slice %134 {offsets = [1, 0], sizes = [8, 4], strides = [1, 1]} : vector<9x4xbf16> to vector<8x4xbf16>
    %c8_127 = arith.constant 8 : index
    %c0_128 = arith.constant 0 : index
    %c0_129 = arith.constant 0 : index
    %149 = vector.load %arg3[%c8_127, %c0_128, %c0_129] : memref<9x4x4xbf16, #tpu.memory_space<vmem>>, vector<1x4x4xbf16>
    %150 = vector.shape_cast %149 : vector<1x4x4xbf16> to vector<4x4xbf16>
    %cst_130 = arith.constant dense<0.000000e+00> : vector<8x4xf32>
    %151 = tpu.matmul %148, %150, %cst_130 {dimension_numbers = #tpu.dot_dimension_numbers<[1], [0], [0], [1], [0, 0, 1, 1], [], []>} : vector<8x4xbf16>, vector<4x4xbf16>, vector<8x4xf32> -> vector<8x4xf32>
    %152 = arith.addf %147, %151 : vector<8x4xf32>
    %153 = vector.broadcast %0 : vector<1x4xf32> to vector<8x4xf32>
    %154 = arith.addf %152, %153 : vector<8x4xf32>
    %cst_131 = arith.constant 0.000000e+00 : f32
    %155 = vector.broadcast %cst_131 : f32 to vector<8x4xf32>
    %156 = arith.maximumf %154, %155 : vector<8x4xf32>
    %157 = arith.truncf %156 : vector<8x4xf32> to vector<8x4xbf16>
    %c0_132 = arith.constant 0 : index
    %c1_133 = arith.constant 1 : index
    %c0_134 = arith.constant 0 : index
    %c0_135 = arith.constant 0 : index
    %158 = vector.load %arg5[%c0_132, %c1_133, %c0_134, %c0_135] : memref<1x8x8x4xbf16, #tpu.memory_space<vmem>>, vector<1x1x8x4xbf16>
    %159 = vector.shape_cast %158 : vector<1x1x8x4xbf16> to vector<8x4xbf16>
    %160 = vector.shape_cast %157 : vector<8x4xbf16> to vector<1x1x8x4xbf16>
    tpu.vector_store %arg5[%c0_132, %c1_133, %c0_134, %c0_135], %160 {strides = array<i32>} : memref<1x8x8x4xbf16, #tpu.memory_space<vmem>>, vector<1x1x8x4xbf16>,
    %c8_i32_136 = arith.constant 8 : i32
    %161 = arith.muli %arg1, %c8_i32_136 : i32
    %c2_i32_137 = arith.constant 2 : i32
    %162 = arith.addi %161, %c2_i32_137 : i32
    %cst_138 = arith.constant 0.000000e+00 : f32
    %163 = vector.broadcast %cst_138 : f32 to vector<8x4xf32>
    %c2_i32_139 = arith.constant 2 : i32
    %164 = arith.muli %162, %c2_i32_139 : i32
    %c0_i32_140 = arith.constant 0 : i32
    %165 = arith.addi %164, %c0_i32_140 : i32
    %c0_141 = arith.constant 0 : index
    %166 = arith.index_cast %165 : i32 to index
    %c0_142 = arith.constant 0 : index
    %c0_143 = arith.constant 0 : index
    %c0_144 = arith.constant 0 : index
    %167 = vector.load %arg2[%c0_141, %166, %c0_142, %c0_143, %c0_144] : memref<1x18x2x9x4xbf16, #tpu.memory_space<vmem>>, vector<1x1x1x9x4xbf16>
    %168 = vector.shape_cast %167 : vector<1x1x1x9x4xbf16> to vector<9x4xbf16>
    %c0_145 = arith.constant 0 : index
    %169 = arith.index_cast %165 : i32 to index
    %c1_146 = arith.constant 1 : index
    %c0_147 = arith.constant 0 : index
    %c0_148 = arith.constant 0 : index
    %170 = vector.load %arg2[%c0_145, %169, %c1_146, %c0_147, %c0_148] : memref<1x18x2x9x4xbf16, #tpu.memory_space<vmem>>, vector<1x1x1x9x4xbf16>
    %171 = vector.shape_cast %170 : vector<1x1x1x9x4xbf16> to vector<9x4xbf16>
    %172 = vector.extract_strided_slice %168 {offsets = [0, 0], sizes = [8, 4], strides = [1, 1]} : vector<9x4xbf16> to vector<8x4xbf16>
    %c0_149 = arith.constant 0 : index
    %c0_150 = arith.constant 0 : index
    %c0_151 = arith.constant 0 : index
    %173 = vector.load %arg3[%c0_149, %c0_150, %c0_151] : memref<9x4x4xbf16, #tpu.memory_space<vmem>>, vector<1x4x4xbf16>
    %174 = vector.shape_cast %173 : vector<1x4x4xbf16> to vector<4x4xbf16>
    %cst_152 = arith.constant dense<0.000000e+00> : vector<8x4xf32>
    %175 = tpu.matmul %172, %174, %cst_152 {dimension_numbers = #tpu.dot_dimension_numbers<[1], [0], [0], [1], [0, 0, 1, 1], [], []>} : vector<8x4xbf16>, vector<4x4xbf16>, vector<8x4xf32> -> vector<8x4xf32>
    %176 = arith.addf %163, %175 : vector<8x4xf32>
    %177 = vector.extract_strided_slice %171 {offsets = [0, 0], sizes = [8, 4], strides = [1, 1]} : vector<9x4xbf16> to vector<8x4xbf16>
    %c1_153 = arith.constant 1 : index
    %c0_154 = arith.constant 0 : index
    %c0_155 = arith.constant 0 : index
    %178 = vector.load %arg3[%c1_153, %c0_154, %c0_155] : memref<9x4x4xbf16, #tpu.memory_space<vmem>>, vector<1x4x4xbf16>
    %179 = vector.shape_cast %178 : vector<1x4x4xbf16> to vector<4x4xbf16>
    %cst_156 = arith.constant dense<0.000000e+00> : vector<8x4xf32>
    %180 = tpu.matmul %177, %179, %cst_156 {dimension_numbers = #tpu.dot_dimension_numbers<[1], [0], [0], [1], [0, 0, 1, 1], [], []>} : vector<8x4xbf16>, vector<4x4xbf16>, vector<8x4xf32> -> vector<8x4xf32>
    %181 = arith.addf %176, %180 : vector<8x4xf32>
    %182 = vector.extract_strided_slice %168 {offsets = [1, 0], sizes = [8, 4], strides = [1, 1]} : vector<9x4xbf16> to vector<8x4xbf16>
    %c2_157 = arith.constant 2 : index
    %c0_158 = arith.constant 0 : index
    %c0_159 = arith.constant 0 : index
    %183 = vector.load %arg3[%c2_157, %c0_158, %c0_159] : memref<9x4x4xbf16, #tpu.memory_space<vmem>>, vector<1x4x4xbf16>
    %184 = vector.shape_cast %183 : vector<1x4x4xbf16> to vector<4x4xbf16>
    %cst_160 = arith.constant dense<0.000000e+00> : vector<8x4xf32>
    %185 = tpu.matmul %182, %184, %cst_160 {dimension_numbers = #tpu.dot_dimension_numbers<[1], [0], [0], [1], [0, 0, 1, 1], [], []>} : vector<8x4xbf16>, vector<4x4xbf16>, vector<8x4xf32> -> vector<8x4xf32>
    %186 = arith.addf %181, %185 : vector<8x4xf32>
    %c2_i32_161 = arith.constant 2 : i32
    %187 = arith.muli %162, %c2_i32_161 : i32
    %c1_i32_162 = arith.constant 1 : i32
    %188 = arith.addi %187, %c1_i32_162 : i32
    %c0_163 = arith.constant 0 : index
    %189 = arith.index_cast %188 : i32 to index
    %c0_164 = arith.constant 0 : index
    %c0_165 = arith.constant 0 : index
    %c0_166 = arith.constant 0 : index
    %190 = vector.load %arg2[%c0_163, %189, %c0_164, %c0_165, %c0_166] : memref<1x18x2x9x4xbf16, #tpu.memory_space<vmem>>, vector<1x1x1x9x4xbf16>
    %191 = vector.shape_cast %190 : vector<1x1x1x9x4xbf16> to vector<9x4xbf16>
    %c0_167 = arith.constant 0 : index
    %192 = arith.index_cast %188 : i32 to index
    %c1_168 = arith.constant 1 : index
    %c0_169 = arith.constant 0 : index
    %c0_170 = arith.constant 0 : index
    %193 = vector.load %arg2[%c0_167, %192, %c1_168, %c0_169, %c0_170] : memref<1x18x2x9x4xbf16, #tpu.memory_space<vmem>>, vector<1x1x1x9x4xbf16>
    %194 = vector.shape_cast %193 : vector<1x1x1x9x4xbf16> to vector<9x4xbf16>
    %195 = vector.extract_strided_slice %191 {offsets = [0, 0], sizes = [8, 4], strides = [1, 1]} : vector<9x4xbf16> to vector<8x4xbf16>
    %c3_171 = arith.constant 3 : index
    %c0_172 = arith.constant 0 : index
    %c0_173 = arith.constant 0 : index
    %196 = vector.load %arg3[%c3_171, %c0_172, %c0_173] : memref<9x4x4xbf16, #tpu.memory_space<vmem>>, vector<1x4x4xbf16>
    %197 = vector.shape_cast %196 : vector<1x4x4xbf16> to vector<4x4xbf16>
    %cst_174 = arith.constant dense<0.000000e+00> : vector<8x4xf32>
    %198 = tpu.matmul %195, %197, %cst_174 {dimension_numbers = #tpu.dot_dimension_numbers<[1], [0], [0], [1], [0, 0, 1, 1], [], []>} : vector<8x4xbf16>, vector<4x4xbf16>, vector<8x4xf32> -> vector<8x4xf32>
    %199 = arith.addf %186, %198 : vector<8x4xf32>
    %200 = vector.extract_strided_slice %194 {offsets = [0, 0], sizes = [8, 4], strides = [1, 1]} : vector<9x4xbf16> to vector<8x4xbf16>
    %c4_175 = arith.constant 4 : index
    %c0_176 = arith.constant 0 : index
    %c0_177 = arith.constant 0 : index
    %201 = vector.load %arg3[%c4_175, %c0_176, %c0_177] : memref<9x4x4xbf16, #tpu.memory_space<vmem>>, vector<1x4x4xbf16>
    %202 = vector.shape_cast %201 : vector<1x4x4xbf16> to vector<4x4xbf16>
    %cst_178 = arith.constant dense<0.000000e+00> : vector<8x4xf32>
    %203 = tpu.matmul %200, %202, %cst_178 {dimension_numbers = #tpu.dot_dimension_numbers<[1], [0], [0], [1], [0, 0, 1, 1], [], []>} : vector<8x4xbf16>, vector<4x4xbf16>, vector<8x4xf32> -> vector<8x4xf32>
    %204 = arith.addf %199, %203 : vector<8x4xf32>
    %205 = vector.extract_strided_slice %191 {offsets = [1, 0], sizes = [8, 4], strides = [1, 1]} : vector<9x4xbf16> to vector<8x4xbf16>
    %c5_179 = arith.constant 5 : index
    %c0_180 = arith.constant 0 : index
    %c0_181 = arith.constant 0 : index
    %206 = vector.load %arg3[%c5_179, %c0_180, %c0_181] : memref<9x4x4xbf16, #tpu.memory_space<vmem>>, vector<1x4x4xbf16>
    %207 = vector.shape_cast %206 : vector<1x4x4xbf16> to vector<4x4xbf16>
    %cst_182 = arith.constant dense<0.000000e+00> : vector<8x4xf32>
    %208 = tpu.matmul %205, %207, %cst_182 {dimension_numbers = #tpu.dot_dimension_numbers<[1], [0], [0], [1], [0, 0, 1, 1], [], []>} : vector<8x4xbf16>, vector<4x4xbf16>, vector<8x4xf32> -> vector<8x4xf32>
    %209 = arith.addf %204, %208 : vector<8x4xf32>
    %c2_i32_183 = arith.constant 2 : i32
    %210 = arith.muli %162, %c2_i32_183 : i32
    %c2_i32_184 = arith.constant 2 : i32
    %211 = arith.addi %210, %c2_i32_184 : i32
    %c0_185 = arith.constant 0 : index
    %212 = arith.index_cast %211 : i32 to index
    %c0_186 = arith.constant 0 : index
    %c0_187 = arith.constant 0 : index
    %c0_188 = arith.constant 0 : index
    %213 = vector.load %arg2[%c0_185, %212, %c0_186, %c0_187, %c0_188] : memref<1x18x2x9x4xbf16, #tpu.memory_space<vmem>>, vector<1x1x1x9x4xbf16>
    %214 = vector.shape_cast %213 : vector<1x1x1x9x4xbf16> to vector<9x4xbf16>
    %c0_189 = arith.constant 0 : index
    %215 = arith.index_cast %211 : i32 to index
    %c1_190 = arith.constant 1 : index
    %c0_191 = arith.constant 0 : index
    %c0_192 = arith.constant 0 : index
    %216 = vector.load %arg2[%c0_189, %215, %c1_190, %c0_191, %c0_192] : memref<1x18x2x9x4xbf16, #tpu.memory_space<vmem>>, vector<1x1x1x9x4xbf16>
    %217 = vector.shape_cast %216 : vector<1x1x1x9x4xbf16> to vector<9x4xbf16>
    %218 = vector.extract_strided_slice %214 {offsets = [0, 0], sizes = [8, 4], strides = [1, 1]} : vector<9x4xbf16> to vector<8x4xbf16>
    %c6_193 = arith.constant 6 : index
    %c0_194 = arith.constant 0 : index
    %c0_195 = arith.constant 0 : index
    %219 = vector.load %arg3[%c6_193, %c0_194, %c0_195] : memref<9x4x4xbf16, #tpu.memory_space<vmem>>, vector<1x4x4xbf16>
    %220 = vector.shape_cast %219 : vector<1x4x4xbf16> to vector<4x4xbf16>
    %cst_196 = arith.constant dense<0.000000e+00> : vector<8x4xf32>
    %221 = tpu.matmul %218, %220, %cst_196 {dimension_numbers = #tpu.dot_dimension_numbers<[1], [0], [0], [1], [0, 0, 1, 1], [], []>} : vector<8x4xbf16>, vector<4x4xbf16>, vector<8x4xf32> -> vector<8x4xf32>
    %222 = arith.addf %209, %221 : vector<8x4xf32>
    %223 = vector.extract_strided_slice %217 {offsets = [0, 0], sizes = [8, 4], strides = [1, 1]} : vector<9x4xbf16> to vector<8x4xbf16>
    %c7_197 = arith.constant 7 : index
    %c0_198 = arith.constant 0 : index
    %c0_199 = arith.constant 0 : index
    %224 = vector.load %arg3[%c7_197, %c0_198, %c0_199] : memref<9x4x4xbf16, #tpu.memory_space<vmem>>, vector<1x4x4xbf16>
    %225 = vector.shape_cast %224 : vector<1x4x4xbf16> to vector<4x4xbf16>
    %cst_200 = arith.constant dense<0.000000e+00> : vector<8x4xf32>
    %226 = tpu.matmul %223, %225, %cst_200 {dimension_numbers = #tpu.dot_dimension_numbers<[1], [0], [0], [1], [0, 0, 1, 1], [], []>} : vector<8x4xbf16>, vector<4x4xbf16>, vector<8x4xf32> -> vector<8x4xf32>
    %227 = arith.addf %222, %226 : vector<8x4xf32>
    %228 = vector.extract_strided_slice %214 {offsets = [1, 0], sizes = [8, 4], strides = [1, 1]} : vector<9x4xbf16> to vector<8x4xbf16>
    %c8_201 = arith.constant 8 : index
    %c0_202 = arith.constant 0 : index
    %c0_203 = arith.constant 0 : index
    %229 = vector.load %arg3[%c8_201, %c0_202, %c0_203] : memref<9x4x4xbf16, #tpu.memory_space<vmem>>, vector<1x4x4xbf16>
    %230 = vector.shape_cast %229 : vector<1x4x4xbf16> to vector<4x4xbf16>
    %cst_204 = arith.constant dense<0.000000e+00> : vector<8x4xf32>
    %231 = tpu.matmul %228, %230, %cst_204 {dimension_numbers = #tpu.dot_dimension_numbers<[1], [0], [0], [1], [0, 0, 1, 1], [], []>} : vector<8x4xbf16>, vector<4x4xbf16>, vector<8x4xf32> -> vector<8x4xf32>
    %232 = arith.addf %227, %231 : vector<8x4xf32>
    %233 = vector.broadcast %0 : vector<1x4xf32> to vector<8x4xf32>
    %234 = arith.addf %232, %233 : vector<8x4xf32>
    %cst_205 = arith.constant 0.000000e+00 : f32
    %235 = vector.broadcast %cst_205 : f32 to vector<8x4xf32>
    %236 = arith.maximumf %234, %235 : vector<8x4xf32>
    %237 = arith.truncf %236 : vector<8x4xf32> to vector<8x4xbf16>
    %c0_206 = arith.constant 0 : index
    %c2_207 = arith.constant 2 : index
    %c0_208 = arith.constant 0 : index
    %c0_209 = arith.constant 0 : index
    %238 = vector.load %arg5[%c0_206, %c2_207, %c0_208, %c0_209] : memref<1x8x8x4xbf16, #tpu.memory_space<vmem>>, vector<1x1x8x4xbf16>
    %239 = vector.shape_cast %238 : vector<1x1x8x4xbf16> to vector<8x4xbf16>
    %240 = vector.shape_cast %237 : vector<8x4xbf16> to vector<1x1x8x4xbf16>
    tpu.vector_store %arg5[%c0_206, %c2_207, %c0_208, %c0_209], %240 {strides = array<i32>} : memref<1x8x8x4xbf16, #tpu.memory_space<vmem>>, vector<1x1x8x4xbf16>,
    %c8_i32_210 = arith.constant 8 : i32
    %241 = arith.muli %arg1, %c8_i32_210 : i32
    %c3_i32 = arith.constant 3 : i32
    %242 = arith.addi %241, %c3_i32 : i32
    %cst_211 = arith.constant 0.000000e+00 : f32
    %243 = vector.broadcast %cst_211 : f32 to vector<8x4xf32>
    %c2_i32_212 = arith.constant 2 : i32
    %244 = arith.muli %242, %c2_i32_212 : i32
    %c0_i32_213 = arith.constant 0 : i32
    %245 = arith.addi %244, %c0_i32_213 : i32
    %c0_214 = arith.constant 0 : index
    %246 = arith.index_cast %245 : i32 to index
    %c0_215 = arith.constant 0 : index
    %c0_216 = arith.constant 0 : index
    %c0_217 = arith.constant 0 : index
    %247 = vector.load %arg2[%c0_214, %246, %c0_215, %c0_216, %c0_217] : memref<1x18x2x9x4xbf16, #tpu.memory_space<vmem>>, vector<1x1x1x9x4xbf16>
    %248 = vector.shape_cast %247 : vector<1x1x1x9x4xbf16> to vector<9x4xbf16>
    %c0_218 = arith.constant 0 : index
    %249 = arith.index_cast %245 : i32 to index
    %c1_219 = arith.constant 1 : index
    %c0_220 = arith.constant 0 : index
    %c0_221 = arith.constant 0 : index
    %250 = vector.load %arg2[%c0_218, %249, %c1_219, %c0_220, %c0_221] : memref<1x18x2x9x4xbf16, #tpu.memory_space<vmem>>, vector<1x1x1x9x4xbf16>
    %251 = vector.shape_cast %250 : vector<1x1x1x9x4xbf16> to vector<9x4xbf16>
    %252 = vector.extract_strided_slice %248 {offsets = [0, 0], sizes = [8, 4], strides = [1, 1]} : vector<9x4xbf16> to vector<8x4xbf16>
    %c0_222 = arith.constant 0 : index
    %c0_223 = arith.constant 0 : index
    %c0_224 = arith.constant 0 : index
    %253 = vector.load %arg3[%c0_222, %c0_223, %c0_224] : memref<9x4x4xbf16, #tpu.memory_space<vmem>>, vector<1x4x4xbf16>
    %254 = vector.shape_cast %253 : vector<1x4x4xbf16> to vector<4x4xbf16>
    %cst_225 = arith.constant dense<0.000000e+00> : vector<8x4xf32>
    %255 = tpu.matmul %252, %254, %cst_225 {dimension_numbers = #tpu.dot_dimension_numbers<[1], [0], [0], [1], [0, 0, 1, 1], [], []>} : vector<8x4xbf16>, vector<4x4xbf16>, vector<8x4xf32> -> vector<8x4xf32>
    %256 = arith.addf %243, %255 : vector<8x4xf32>
    %257 = vector.extract_strided_slice %251 {offsets = [0, 0], sizes = [8, 4], strides = [1, 1]} : vector<9x4xbf16> to vector<8x4xbf16>
    %c1_226 = arith.constant 1 : index
    %c0_227 = arith.constant 0 : index
    %c0_228 = arith.constant 0 : index
    %258 = vector.load %arg3[%c1_226, %c0_227, %c0_228] : memref<9x4x4xbf16, #tpu.memory_space<vmem>>, vector<1x4x4xbf16>
    %259 = vector.shape_cast %258 : vector<1x4x4xbf16> to vector<4x4xbf16>
    %cst_229 = arith.constant dense<0.000000e+00> : vector<8x4xf32>
    %260 = tpu.matmul %257, %259, %cst_229 {dimension_numbers = #tpu.dot_dimension_numbers<[1], [0], [0], [1], [0, 0, 1, 1], [], []>} : vector<8x4xbf16>, vector<4x4xbf16>, vector<8x4xf32> -> vector<8x4xf32>
    %261 = arith.addf %256, %260 : vector<8x4xf32>
    %262 = vector.extract_strided_slice %248 {offsets = [1, 0], sizes = [8, 4], strides = [1, 1]} : vector<9x4xbf16> to vector<8x4xbf16>
    %c2_230 = arith.constant 2 : index
    %c0_231 = arith.constant 0 : index
    %c0_232 = arith.constant 0 : index
    %263 = vector.load %arg3[%c2_230, %c0_231, %c0_232] : memref<9x4x4xbf16, #tpu.memory_space<vmem>>, vector<1x4x4xbf16>
    %264 = vector.shape_cast %263 : vector<1x4x4xbf16> to vector<4x4xbf16>
    %cst_233 = arith.constant dense<0.000000e+00> : vector<8x4xf32>
    %265 = tpu.matmul %262, %264, %cst_233 {dimension_numbers = #tpu.dot_dimension_numbers<[1], [0], [0], [1], [0, 0, 1, 1], [], []>} : vector<8x4xbf16>, vector<4x4xbf16>, vector<8x4xf32> -> vector<8x4xf32>
    %266 = arith.addf %261, %265 : vector<8x4xf32>
    %c2_i32_234 = arith.constant 2 : i32
    %267 = arith.muli %242, %c2_i32_234 : i32
    %c1_i32_235 = arith.constant 1 : i32
    %268 = arith.addi %267, %c1_i32_235 : i32
    %c0_236 = arith.constant 0 : index
    %269 = arith.index_cast %268 : i32 to index
    %c0_237 = arith.constant 0 : index
    %c0_238 = arith.constant 0 : index
    %c0_239 = arith.constant 0 : index
    %270 = vector.load %arg2[%c0_236, %269, %c0_237, %c0_238, %c0_239] : memref<1x18x2x9x4xbf16, #tpu.memory_space<vmem>>, vector<1x1x1x9x4xbf16>
    %271 = vector.shape_cast %270 : vector<1x1x1x9x4xbf16> to vector<9x4xbf16>
    %c0_240 = arith.constant 0 : index
    %272 = arith.index_cast %268 : i32 to index
    %c1_241 = arith.constant 1 : index
    %c0_242 = arith.constant 0 : index
    %c0_243 = arith.constant 0 : index
    %273 = vector.load %arg2[%c0_240, %272, %c1_241, %c0_242, %c0_243] : memref<1x18x2x9x4xbf16, #tpu.memory_space<vmem>>, vector<1x1x1x9x4xbf16>
    %274 = vector.shape_cast %273 : vector<1x1x1x9x4xbf16> to vector<9x4xbf16>
    %275 = vector.extract_strided_slice %271 {offsets = [0, 0], sizes = [8, 4], strides = [1, 1]} : vector<9x4xbf16> to vector<8x4xbf16>
    %c3_244 = arith.constant 3 : index
    %c0_245 = arith.constant 0 : index
    %c0_246 = arith.constant 0 : index
    %276 = vector.load %arg3[%c3_244, %c0_245, %c0_246] : memref<9x4x4xbf16, #tpu.memory_space<vmem>>, vector<1x4x4xbf16>
    %277 = vector.shape_cast %276 : vector<1x4x4xbf16> to vector<4x4xbf16>
    %cst_247 = arith.constant dense<0.000000e+00> : vector<8x4xf32>
    %278 = tpu.matmul %275, %277, %cst_247 {dimension_numbers = #tpu.dot_dimension_numbers<[1], [0], [0], [1], [0, 0, 1, 1], [], []>} : vector<8x4xbf16>, vector<4x4xbf16>, vector<8x4xf32> -> vector<8x4xf32>
    %279 = arith.addf %266, %278 : vector<8x4xf32>
    %280 = vector.extract_strided_slice %274 {offsets = [0, 0], sizes = [8, 4], strides = [1, 1]} : vector<9x4xbf16> to vector<8x4xbf16>
    %c4_248 = arith.constant 4 : index
    %c0_249 = arith.constant 0 : index
    %c0_250 = arith.constant 0 : index
    %281 = vector.load %arg3[%c4_248, %c0_249, %c0_250] : memref<9x4x4xbf16, #tpu.memory_space<vmem>>, vector<1x4x4xbf16>
    %282 = vector.shape_cast %281 : vector<1x4x4xbf16> to vector<4x4xbf16>
    %cst_251 = arith.constant dense<0.000000e+00> : vector<8x4xf32>
    %283 = tpu.matmul %280, %282, %cst_251 {dimension_numbers = #tpu.dot_dimension_numbers<[1], [0], [0], [1], [0, 0, 1, 1], [], []>} : vector<8x4xbf16>, vector<4x4xbf16>, vector<8x4xf32> -> vector<8x4xf32>
    %284 = arith.addf %279, %283 : vector<8x4xf32>
    %285 = vector.extract_strided_slice %271 {offsets = [1, 0], sizes = [8, 4], strides = [1, 1]} : vector<9x4xbf16> to vector<8x4xbf16>
    %c5_252 = arith.constant 5 : index
    %c0_253 = arith.constant 0 : index
    %c0_254 = arith.constant 0 : index
    %286 = vector.load %arg3[%c5_252, %c0_253, %c0_254] : memref<9x4x4xbf16, #tpu.memory_space<vmem>>, vector<1x4x4xbf16>
    %287 = vector.shape_cast %286 : vector<1x4x4xbf16> to vector<4x4xbf16>
    %cst_255 = arith.constant dense<0.000000e+00> : vector<8x4xf32>
    %288 = tpu.matmul %285, %287, %cst_255 {dimension_numbers = #tpu.dot_dimension_numbers<[1], [0], [0], [1], [0, 0, 1, 1], [], []>} : vector<8x4xbf16>, vector<4x4xbf16>, vector<8x4xf32> -> vector<8x4xf32>
    %289 = arith.addf %284, %288 : vector<8x4xf32>
    %c2_i32_256 = arith.constant 2 : i32
    %290 = arith.muli %242, %c2_i32_256 : i32
    %c2_i32_257 = arith.constant 2 : i32
    %291 = arith.addi %290, %c2_i32_257 : i32
    %c0_258 = arith.constant 0 : index
    %292 = arith.index_cast %291 : i32 to index
    %c0_259 = arith.constant 0 : index
    %c0_260 = arith.constant 0 : index
    %c0_261 = arith.constant 0 : index
    %293 = vector.load %arg2[%c0_258, %292, %c0_259, %c0_260, %c0_261] : memref<1x18x2x9x4xbf16, #tpu.memory_space<vmem>>, vector<1x1x1x9x4xbf16>
    %294 = vector.shape_cast %293 : vector<1x1x1x9x4xbf16> to vector<9x4xbf16>
    %c0_262 = arith.constant 0 : index
    %295 = arith.index_cast %291 : i32 to index
    %c1_263 = arith.constant 1 : index
    %c0_264 = arith.constant 0 : index
    %c0_265 = arith.constant 0 : index
    %296 = vector.load %arg2[%c0_262, %295, %c1_263, %c0_264, %c0_265] : memref<1x18x2x9x4xbf16, #tpu.memory_space<vmem>>, vector<1x1x1x9x4xbf16>
    %297 = vector.shape_cast %296 : vector<1x1x1x9x4xbf16> to vector<9x4xbf16>
    %298 = vector.extract_strided_slice %294 {offsets = [0, 0], sizes = [8, 4], strides = [1, 1]} : vector<9x4xbf16> to vector<8x4xbf16>
    %c6_266 = arith.constant 6 : index
    %c0_267 = arith.constant 0 : index
    %c0_268 = arith.constant 0 : index
    %299 = vector.load %arg3[%c6_266, %c0_267, %c0_268] : memref<9x4x4xbf16, #tpu.memory_space<vmem>>, vector<1x4x4xbf16>
    %300 = vector.shape_cast %299 : vector<1x4x4xbf16> to vector<4x4xbf16>
    %cst_269 = arith.constant dense<0.000000e+00> : vector<8x4xf32>
    %301 = tpu.matmul %298, %300, %cst_269 {dimension_numbers = #tpu.dot_dimension_numbers<[1], [0], [0], [1], [0, 0, 1, 1], [], []>} : vector<8x4xbf16>, vector<4x4xbf16>, vector<8x4xf32> -> vector<8x4xf32>
    %302 = arith.addf %289, %301 : vector<8x4xf32>
    %303 = vector.extract_strided_slice %297 {offsets = [0, 0], sizes = [8, 4], strides = [1, 1]} : vector<9x4xbf16> to vector<8x4xbf16>
    %c7_270 = arith.constant 7 : index
    %c0_271 = arith.constant 0 : index
    %c0_272 = arith.constant 0 : index
    %304 = vector.load %arg3[%c7_270, %c0_271, %c0_272] : memref<9x4x4xbf16, #tpu.memory_space<vmem>>, vector<1x4x4xbf16>
    %305 = vector.shape_cast %304 : vector<1x4x4xbf16> to vector<4x4xbf16>
    %cst_273 = arith.constant dense<0.000000e+00> : vector<8x4xf32>
    %306 = tpu.matmul %303, %305, %cst_273 {dimension_numbers = #tpu.dot_dimension_numbers<[1], [0], [0], [1], [0, 0, 1, 1], [], []>} : vector<8x4xbf16>, vector<4x4xbf16>, vector<8x4xf32> -> vector<8x4xf32>
    %307 = arith.addf %302, %306 : vector<8x4xf32>
    %308 = vector.extract_strided_slice %294 {offsets = [1, 0], sizes = [8, 4], strides = [1, 1]} : vector<9x4xbf16> to vector<8x4xbf16>
    %c8_274 = arith.constant 8 : index
    %c0_275 = arith.constant 0 : index
    %c0_276 = arith.constant 0 : index
    %309 = vector.load %arg3[%c8_274, %c0_275, %c0_276] : memref<9x4x4xbf16, #tpu.memory_space<vmem>>, vector<1x4x4xbf16>
    %310 = vector.shape_cast %309 : vector<1x4x4xbf16> to vector<4x4xbf16>
    %cst_277 = arith.constant dense<0.000000e+00> : vector<8x4xf32>
    %311 = tpu.matmul %308, %310, %cst_277 {dimension_numbers = #tpu.dot_dimension_numbers<[1], [0], [0], [1], [0, 0, 1, 1], [], []>} : vector<8x4xbf16>, vector<4x4xbf16>, vector<8x4xf32> -> vector<8x4xf32>
    %312 = arith.addf %307, %311 : vector<8x4xf32>
    %313 = vector.broadcast %0 : vector<1x4xf32> to vector<8x4xf32>
    %314 = arith.addf %312, %313 : vector<8x4xf32>
    %cst_278 = arith.constant 0.000000e+00 : f32
    %315 = vector.broadcast %cst_278 : f32 to vector<8x4xf32>
    %316 = arith.maximumf %314, %315 : vector<8x4xf32>
    %317 = arith.truncf %316 : vector<8x4xf32> to vector<8x4xbf16>
    %c0_279 = arith.constant 0 : index
    %c3_280 = arith.constant 3 : index
    %c0_281 = arith.constant 0 : index
    %c0_282 = arith.constant 0 : index
    %318 = vector.load %arg5[%c0_279, %c3_280, %c0_281, %c0_282] : memref<1x8x8x4xbf16, #tpu.memory_space<vmem>>, vector<1x1x8x4xbf16>
    %319 = vector.shape_cast %318 : vector<1x1x8x4xbf16> to vector<8x4xbf16>
    %320 = vector.shape_cast %317 : vector<8x4xbf16> to vector<1x1x8x4xbf16>
    tpu.vector_store %arg5[%c0_279, %c3_280, %c0_281, %c0_282], %320 {strides = array<i32>} : memref<1x8x8x4xbf16, #tpu.memory_space<vmem>>, vector<1x1x8x4xbf16>,
    %c8_i32_283 = arith.constant 8 : i32
    %321 = arith.muli %arg1, %c8_i32_283 : i32
    %c4_i32 = arith.constant 4 : i32
    %322 = arith.addi %321, %c4_i32 : i32
    %cst_284 = arith.constant 0.000000e+00 : f32
    %323 = vector.broadcast %cst_284 : f32 to vector<8x4xf32>
    %c2_i32_285 = arith.constant 2 : i32
    %324 = arith.muli %322, %c2_i32_285 : i32
    %c0_i32_286 = arith.constant 0 : i32
    %325 = arith.addi %324, %c0_i32_286 : i32
    %c0_287 = arith.constant 0 : index
    %326 = arith.index_cast %325 : i32 to index
    %c0_288 = arith.constant 0 : index
    %c0_289 = arith.constant 0 : index
    %c0_290 = arith.constant 0 : index
    %327 = vector.load %arg2[%c0_287, %326, %c0_288, %c0_289, %c0_290] : memref<1x18x2x9x4xbf16, #tpu.memory_space<vmem>>, vector<1x1x1x9x4xbf16>
    %328 = vector.shape_cast %327 : vector<1x1x1x9x4xbf16> to vector<9x4xbf16>
    %c0_291 = arith.constant 0 : index
    %329 = arith.index_cast %325 : i32 to index
    %c1_292 = arith.constant 1 : index
    %c0_293 = arith.constant 0 : index
    %c0_294 = arith.constant 0 : index
    %330 = vector.load %arg2[%c0_291, %329, %c1_292, %c0_293, %c0_294] : memref<1x18x2x9x4xbf16, #tpu.memory_space<vmem>>, vector<1x1x1x9x4xbf16>
    %331 = vector.shape_cast %330 : vector<1x1x1x9x4xbf16> to vector<9x4xbf16>
    %332 = vector.extract_strided_slice %328 {offsets = [0, 0], sizes = [8, 4], strides = [1, 1]} : vector<9x4xbf16> to vector<8x4xbf16>
    %c0_295 = arith.constant 0 : index
    %c0_296 = arith.constant 0 : index
    %c0_297 = arith.constant 0 : index
    %333 = vector.load %arg3[%c0_295, %c0_296, %c0_297] : memref<9x4x4xbf16, #tpu.memory_space<vmem>>, vector<1x4x4xbf16>
    %334 = vector.shape_cast %333 : vector<1x4x4xbf16> to vector<4x4xbf16>
    %cst_298 = arith.constant dense<0.000000e+00> : vector<8x4xf32>
    %335 = tpu.matmul %332, %334, %cst_298 {dimension_numbers = #tpu.dot_dimension_numbers<[1], [0], [0], [1], [0, 0, 1, 1], [], []>} : vector<8x4xbf16>, vector<4x4xbf16>, vector<8x4xf32> -> vector<8x4xf32>
    %336 = arith.addf %323, %335 : vector<8x4xf32>
    %337 = vector.extract_strided_slice %331 {offsets = [0, 0], sizes = [8, 4], strides = [1, 1]} : vector<9x4xbf16> to vector<8x4xbf16>
    %c1_299 = arith.constant 1 : index
    %c0_300 = arith.constant 0 : index
    %c0_301 = arith.constant 0 : index
    %338 = vector.load %arg3[%c1_299, %c0_300, %c0_301] : memref<9x4x4xbf16, #tpu.memory_space<vmem>>, vector<1x4x4xbf16>
    %339 = vector.shape_cast %338 : vector<1x4x4xbf16> to vector<4x4xbf16>
    %cst_302 = arith.constant dense<0.000000e+00> : vector<8x4xf32>
    %340 = tpu.matmul %337, %339, %cst_302 {dimension_numbers = #tpu.dot_dimension_numbers<[1], [0], [0], [1], [0, 0, 1, 1], [], []>} : vector<8x4xbf16>, vector<4x4xbf16>, vector<8x4xf32> -> vector<8x4xf32>
    %341 = arith.addf %336, %340 : vector<8x4xf32>
    %342 = vector.extract_strided_slice %328 {offsets = [1, 0], sizes = [8, 4], strides = [1, 1]} : vector<9x4xbf16> to vector<8x4xbf16>
    %c2_303 = arith.constant 2 : index
    %c0_304 = arith.constant 0 : index
    %c0_305 = arith.constant 0 : index
    %343 = vector.load %arg3[%c2_303, %c0_304, %c0_305] : memref<9x4x4xbf16, #tpu.memory_space<vmem>>, vector<1x4x4xbf16>
    %344 = vector.shape_cast %343 : vector<1x4x4xbf16> to vector<4x4xbf16>
    %cst_306 = arith.constant dense<0.000000e+00> : vector<8x4xf32>
    %345 = tpu.matmul %342, %344, %cst_306 {dimension_numbers = #tpu.dot_dimension_numbers<[1], [0], [0], [1], [0, 0, 1, 1], [], []>} : vector<8x4xbf16>, vector<4x4xbf16>, vector<8x4xf32> -> vector<8x4xf32>
    %346 = arith.addf %341, %345 : vector<8x4xf32>
    %c2_i32_307 = arith.constant 2 : i32
    %347 = arith.muli %322, %c2_i32_307 : i32
    %c1_i32_308 = arith.constant 1 : i32
    %348 = arith.addi %347, %c1_i32_308 : i32
    %c0_309 = arith.constant 0 : index
    %349 = arith.index_cast %348 : i32 to index
    %c0_310 = arith.constant 0 : index
    %c0_311 = arith.constant 0 : index
    %c0_312 = arith.constant 0 : index
    %350 = vector.load %arg2[%c0_309, %349, %c0_310, %c0_311, %c0_312] : memref<1x18x2x9x4xbf16, #tpu.memory_space<vmem>>, vector<1x1x1x9x4xbf16>
    %351 = vector.shape_cast %350 : vector<1x1x1x9x4xbf16> to vector<9x4xbf16>
    %c0_313 = arith.constant 0 : index
    %352 = arith.index_cast %348 : i32 to index
    %c1_314 = arith.constant 1 : index
    %c0_315 = arith.constant 0 : index
    %c0_316 = arith.constant 0 : index
    %353 = vector.load %arg2[%c0_313, %352, %c1_314, %c0_315, %c0_316] : memref<1x18x2x9x4xbf16, #tpu.memory_space<vmem>>, vector<1x1x1x9x4xbf16>
    %354 = vector.shape_cast %353 : vector<1x1x1x9x4xbf16> to vector<9x4xbf16>
    %355 = vector.extract_strided_slice %351 {offsets = [0, 0], sizes = [8, 4], strides = [1, 1]} : vector<9x4xbf16> to vector<8x4xbf16>
    %c3_317 = arith.constant 3 : index
    %c0_318 = arith.constant 0 : index
    %c0_319 = arith.constant 0 : index
    %356 = vector.load %arg3[%c3_317, %c0_318, %c0_319] : memref<9x4x4xbf16, #tpu.memory_space<vmem>>, vector<1x4x4xbf16>
    %357 = vector.shape_cast %356 : vector<1x4x4xbf16> to vector<4x4xbf16>
    %cst_320 = arith.constant dense<0.000000e+00> : vector<8x4xf32>
    %358 = tpu.matmul %355, %357, %cst_320 {dimension_numbers = #tpu.dot_dimension_numbers<[1], [0], [0], [1], [0, 0, 1, 1], [], []>} : vector<8x4xbf16>, vector<4x4xbf16>, vector<8x4xf32> -> vector<8x4xf32>
    %359 = arith.addf %346, %358 : vector<8x4xf32>
    %360 = vector.extract_strided_slice %354 {offsets = [0, 0], sizes = [8, 4], strides = [1, 1]} : vector<9x4xbf16> to vector<8x4xbf16>
    %c4_321 = arith.constant 4 : index
    %c0_322 = arith.constant 0 : index
    %c0_323 = arith.constant 0 : index
    %361 = vector.load %arg3[%c4_321, %c0_322, %c0_323] : memref<9x4x4xbf16, #tpu.memory_space<vmem>>, vector<1x4x4xbf16>
    %362 = vector.shape_cast %361 : vector<1x4x4xbf16> to vector<4x4xbf16>
    %cst_324 = arith.constant dense<0.000000e+00> : vector<8x4xf32>
    %363 = tpu.matmul %360, %362, %cst_324 {dimension_numbers = #tpu.dot_dimension_numbers<[1], [0], [0], [1], [0, 0, 1, 1], [], []>} : vector<8x4xbf16>, vector<4x4xbf16>, vector<8x4xf32> -> vector<8x4xf32>
    %364 = arith.addf %359, %363 : vector<8x4xf32>
    %365 = vector.extract_strided_slice %351 {offsets = [1, 0], sizes = [8, 4], strides = [1, 1]} : vector<9x4xbf16> to vector<8x4xbf16>
    %c5_325 = arith.constant 5 : index
    %c0_326 = arith.constant 0 : index
    %c0_327 = arith.constant 0 : index
    %366 = vector.load %arg3[%c5_325, %c0_326, %c0_327] : memref<9x4x4xbf16, #tpu.memory_space<vmem>>, vector<1x4x4xbf16>
    %367 = vector.shape_cast %366 : vector<1x4x4xbf16> to vector<4x4xbf16>
    %cst_328 = arith.constant dense<0.000000e+00> : vector<8x4xf32>
    %368 = tpu.matmul %365, %367, %cst_328 {dimension_numbers = #tpu.dot_dimension_numbers<[1], [0], [0], [1], [0, 0, 1, 1], [], []>} : vector<8x4xbf16>, vector<4x4xbf16>, vector<8x4xf32> -> vector<8x4xf32>
    %369 = arith.addf %364, %368 : vector<8x4xf32>
    %c2_i32_329 = arith.constant 2 : i32
    %370 = arith.muli %322, %c2_i32_329 : i32
    %c2_i32_330 = arith.constant 2 : i32
    %371 = arith.addi %370, %c2_i32_330 : i32
    %c0_331 = arith.constant 0 : index
    %372 = arith.index_cast %371 : i32 to index
    %c0_332 = arith.constant 0 : index
    %c0_333 = arith.constant 0 : index
    %c0_334 = arith.constant 0 : index
    %373 = vector.load %arg2[%c0_331, %372, %c0_332, %c0_333, %c0_334] : memref<1x18x2x9x4xbf16, #tpu.memory_space<vmem>>, vector<1x1x1x9x4xbf16>
    %374 = vector.shape_cast %373 : vector<1x1x1x9x4xbf16> to vector<9x4xbf16>
    %c0_335 = arith.constant 0 : index
    %375 = arith.index_cast %371 : i32 to index
    %c1_336 = arith.constant 1 : index
    %c0_337 = arith.constant 0 : index
    %c0_338 = arith.constant 0 : index
    %376 = vector.load %arg2[%c0_335, %375, %c1_336, %c0_337, %c0_338] : memref<1x18x2x9x4xbf16, #tpu.memory_space<vmem>>, vector<1x1x1x9x4xbf16>
    %377 = vector.shape_cast %376 : vector<1x1x1x9x4xbf16> to vector<9x4xbf16>
    %378 = vector.extract_strided_slice %374 {offsets = [0, 0], sizes = [8, 4], strides = [1, 1]} : vector<9x4xbf16> to vector<8x4xbf16>
    %c6_339 = arith.constant 6 : index
    %c0_340 = arith.constant 0 : index
    %c0_341 = arith.constant 0 : index
    %379 = vector.load %arg3[%c6_339, %c0_340, %c0_341] : memref<9x4x4xbf16, #tpu.memory_space<vmem>>, vector<1x4x4xbf16>
    %380 = vector.shape_cast %379 : vector<1x4x4xbf16> to vector<4x4xbf16>
    %cst_342 = arith.constant dense<0.000000e+00> : vector<8x4xf32>
    %381 = tpu.matmul %378, %380, %cst_342 {dimension_numbers = #tpu.dot_dimension_numbers<[1], [0], [0], [1], [0, 0, 1, 1], [], []>} : vector<8x4xbf16>, vector<4x4xbf16>, vector<8x4xf32> -> vector<8x4xf32>
    %382 = arith.addf %369, %381 : vector<8x4xf32>
    %383 = vector.extract_strided_slice %377 {offsets = [0, 0], sizes = [8, 4], strides = [1, 1]} : vector<9x4xbf16> to vector<8x4xbf16>
    %c7_343 = arith.constant 7 : index
    %c0_344 = arith.constant 0 : index
    %c0_345 = arith.constant 0 : index
    %384 = vector.load %arg3[%c7_343, %c0_344, %c0_345] : memref<9x4x4xbf16, #tpu.memory_space<vmem>>, vector<1x4x4xbf16>
    %385 = vector.shape_cast %384 : vector<1x4x4xbf16> to vector<4x4xbf16>
    %cst_346 = arith.constant dense<0.000000e+00> : vector<8x4xf32>
    %386 = tpu.matmul %383, %385, %cst_346 {dimension_numbers = #tpu.dot_dimension_numbers<[1], [0], [0], [1], [0, 0, 1, 1], [], []>} : vector<8x4xbf16>, vector<4x4xbf16>, vector<8x4xf32> -> vector<8x4xf32>
    %387 = arith.addf %382, %386 : vector<8x4xf32>
    %388 = vector.extract_strided_slice %374 {offsets = [1, 0], sizes = [8, 4], strides = [1, 1]} : vector<9x4xbf16> to vector<8x4xbf16>
    %c8_347 = arith.constant 8 : index
    %c0_348 = arith.constant 0 : index
    %c0_349 = arith.constant 0 : index
    %389 = vector.load %arg3[%c8_347, %c0_348, %c0_349] : memref<9x4x4xbf16, #tpu.memory_space<vmem>>, vector<1x4x4xbf16>
    %390 = vector.shape_cast %389 : vector<1x4x4xbf16> to vector<4x4xbf16>
    %cst_350 = arith.constant dense<0.000000e+00> : vector<8x4xf32>
    %391 = tpu.matmul %388, %390, %cst_350 {dimension_numbers = #tpu.dot_dimension_numbers<[1], [0], [0], [1], [0, 0, 1, 1], [], []>} : vector<8x4xbf16>, vector<4x4xbf16>, vector<8x4xf32> -> vector<8x4xf32>
    %392 = arith.addf %387, %391 : vector<8x4xf32>
    %393 = vector.broadcast %0 : vector<1x4xf32> to vector<8x4xf32>
    %394 = arith.addf %392, %393 : vector<8x4xf32>
    %cst_351 = arith.constant 0.000000e+00 : f32
    %395 = vector.broadcast %cst_351 : f32 to vector<8x4xf32>
    %396 = arith.maximumf %394, %395 : vector<8x4xf32>
    %397 = arith.truncf %396 : vector<8x4xf32> to vector<8x4xbf16>
    %c0_352 = arith.constant 0 : index
    %c4_353 = arith.constant 4 : index
    %c0_354 = arith.constant 0 : index
    %c0_355 = arith.constant 0 : index
    %398 = vector.load %arg5[%c0_352, %c4_353, %c0_354, %c0_355] : memref<1x8x8x4xbf16, #tpu.memory_space<vmem>>, vector<1x1x8x4xbf16>
    %399 = vector.shape_cast %398 : vector<1x1x8x4xbf16> to vector<8x4xbf16>
    %400 = vector.shape_cast %397 : vector<8x4xbf16> to vector<1x1x8x4xbf16>
    tpu.vector_store %arg5[%c0_352, %c4_353, %c0_354, %c0_355], %400 {strides = array<i32>} : memref<1x8x8x4xbf16, #tpu.memory_space<vmem>>, vector<1x1x8x4xbf16>,
    %c8_i32_356 = arith.constant 8 : i32
    %401 = arith.muli %arg1, %c8_i32_356 : i32
    %c5_i32 = arith.constant 5 : i32
    %402 = arith.addi %401, %c5_i32 : i32
    %cst_357 = arith.constant 0.000000e+00 : f32
    %403 = vector.broadcast %cst_357 : f32 to vector<8x4xf32>
    %c2_i32_358 = arith.constant 2 : i32
    %404 = arith.muli %402, %c2_i32_358 : i32
    %c0_i32_359 = arith.constant 0 : i32
    %405 = arith.addi %404, %c0_i32_359 : i32
    %c0_360 = arith.constant 0 : index
    %406 = arith.index_cast %405 : i32 to index
    %c0_361 = arith.constant 0 : index
    %c0_362 = arith.constant 0 : index
    %c0_363 = arith.constant 0 : index
    %407 = vector.load %arg2[%c0_360, %406, %c0_361, %c0_362, %c0_363] : memref<1x18x2x9x4xbf16, #tpu.memory_space<vmem>>, vector<1x1x1x9x4xbf16>
    %408 = vector.shape_cast %407 : vector<1x1x1x9x4xbf16> to vector<9x4xbf16>
    %c0_364 = arith.constant 0 : index
    %409 = arith.index_cast %405 : i32 to index
    %c1_365 = arith.constant 1 : index
    %c0_366 = arith.constant 0 : index
    %c0_367 = arith.constant 0 : index
    %410 = vector.load %arg2[%c0_364, %409, %c1_365, %c0_366, %c0_367] : memref<1x18x2x9x4xbf16, #tpu.memory_space<vmem>>, vector<1x1x1x9x4xbf16>
    %411 = vector.shape_cast %410 : vector<1x1x1x9x4xbf16> to vector<9x4xbf16>
    %412 = vector.extract_strided_slice %408 {offsets = [0, 0], sizes = [8, 4], strides = [1, 1]} : vector<9x4xbf16> to vector<8x4xbf16>
    %c0_368 = arith.constant 0 : index
    %c0_369 = arith.constant 0 : index
    %c0_370 = arith.constant 0 : index
    %413 = vector.load %arg3[%c0_368, %c0_369, %c0_370] : memref<9x4x4xbf16, #tpu.memory_space<vmem>>, vector<1x4x4xbf16>
    %414 = vector.shape_cast %413 : vector<1x4x4xbf16> to vector<4x4xbf16>
    %cst_371 = arith.constant dense<0.000000e+00> : vector<8x4xf32>
    %415 = tpu.matmul %412, %414, %cst_371 {dimension_numbers = #tpu.dot_dimension_numbers<[1], [0], [0], [1], [0, 0, 1, 1], [], []>} : vector<8x4xbf16>, vector<4x4xbf16>, vector<8x4xf32> -> vector<8x4xf32>
    %416 = arith.addf %403, %415 : vector<8x4xf32>
    %417 = vector.extract_strided_slice %411 {offsets = [0, 0], sizes = [8, 4], strides = [1, 1]} : vector<9x4xbf16> to vector<8x4xbf16>
    %c1_372 = arith.constant 1 : index
    %c0_373 = arith.constant 0 : index
    %c0_374 = arith.constant 0 : index
    %418 = vector.load %arg3[%c1_372, %c0_373, %c0_374] : memref<9x4x4xbf16, #tpu.memory_space<vmem>>, vector<1x4x4xbf16>
    %419 = vector.shape_cast %418 : vector<1x4x4xbf16> to vector<4x4xbf16>
    %cst_375 = arith.constant dense<0.000000e+00> : vector<8x4xf32>
    %420 = tpu.matmul %417, %419, %cst_375 {dimension_numbers = #tpu.dot_dimension_numbers<[1], [0], [0], [1], [0, 0, 1, 1], [], []>} : vector<8x4xbf16>, vector<4x4xbf16>, vector<8x4xf32> -> vector<8x4xf32>
    %421 = arith.addf %416, %420 : vector<8x4xf32>
    %422 = vector.extract_strided_slice %408 {offsets = [1, 0], sizes = [8, 4], strides = [1, 1]} : vector<9x4xbf16> to vector<8x4xbf16>
    %c2_376 = arith.constant 2 : index
    %c0_377 = arith.constant 0 : index
    %c0_378 = arith.constant 0 : index
    %423 = vector.load %arg3[%c2_376, %c0_377, %c0_378] : memref<9x4x4xbf16, #tpu.memory_space<vmem>>, vector<1x4x4xbf16>
    %424 = vector.shape_cast %423 : vector<1x4x4xbf16> to vector<4x4xbf16>
    %cst_379 = arith.constant dense<0.000000e+00> : vector<8x4xf32>
    %425 = tpu.matmul %422, %424, %cst_379 {dimension_numbers = #tpu.dot_dimension_numbers<[1], [0], [0], [1], [0, 0, 1, 1], [], []>} : vector<8x4xbf16>, vector<4x4xbf16>, vector<8x4xf32> -> vector<8x4xf32>
    %426 = arith.addf %421, %425 : vector<8x4xf32>
    %c2_i32_380 = arith.constant 2 : i32
    %427 = arith.muli %402, %c2_i32_380 : i32
    %c1_i32_381 = arith.constant 1 : i32
    %428 = arith.addi %427, %c1_i32_381 : i32
    %c0_382 = arith.constant 0 : index
    %429 = arith.index_cast %428 : i32 to index
    %c0_383 = arith.constant 0 : index
    %c0_384 = arith.constant 0 : index
    %c0_385 = arith.constant 0 : index
    %430 = vector.load %arg2[%c0_382, %429, %c0_383, %c0_384, %c0_385] : memref<1x18x2x9x4xbf16, #tpu.memory_space<vmem>>, vector<1x1x1x9x4xbf16>
    %431 = vector.shape_cast %430 : vector<1x1x1x9x4xbf16> to vector<9x4xbf16>
    %c0_386 = arith.constant 0 : index
    %432 = arith.index_cast %428 : i32 to index
    %c1_387 = arith.constant 1 : index
    %c0_388 = arith.constant 0 : index
    %c0_389 = arith.constant 0 : index
    %433 = vector.load %arg2[%c0_386, %432, %c1_387, %c0_388, %c0_389] : memref<1x18x2x9x4xbf16, #tpu.memory_space<vmem>>, vector<1x1x1x9x4xbf16>
    %434 = vector.shape_cast %433 : vector<1x1x1x9x4xbf16> to vector<9x4xbf16>
    %435 = vector.extract_strided_slice %431 {offsets = [0, 0], sizes = [8, 4], strides = [1, 1]} : vector<9x4xbf16> to vector<8x4xbf16>
    %c3_390 = arith.constant 3 : index
    %c0_391 = arith.constant 0 : index
    %c0_392 = arith.constant 0 : index
    %436 = vector.load %arg3[%c3_390, %c0_391, %c0_392] : memref<9x4x4xbf16, #tpu.memory_space<vmem>>, vector<1x4x4xbf16>
    %437 = vector.shape_cast %436 : vector<1x4x4xbf16> to vector<4x4xbf16>
    %cst_393 = arith.constant dense<0.000000e+00> : vector<8x4xf32>
    %438 = tpu.matmul %435, %437, %cst_393 {dimension_numbers = #tpu.dot_dimension_numbers<[1], [0], [0], [1], [0, 0, 1, 1], [], []>} : vector<8x4xbf16>, vector<4x4xbf16>, vector<8x4xf32> -> vector<8x4xf32>
    %439 = arith.addf %426, %438 : vector<8x4xf32>
    %440 = vector.extract_strided_slice %434 {offsets = [0, 0], sizes = [8, 4], strides = [1, 1]} : vector<9x4xbf16> to vector<8x4xbf16>
    %c4_394 = arith.constant 4 : index
    %c0_395 = arith.constant 0 : index
    %c0_396 = arith.constant 0 : index
    %441 = vector.load %arg3[%c4_394, %c0_395, %c0_396] : memref<9x4x4xbf16, #tpu.memory_space<vmem>>, vector<1x4x4xbf16>
    %442 = vector.shape_cast %441 : vector<1x4x4xbf16> to vector<4x4xbf16>
    %cst_397 = arith.constant dense<0.000000e+00> : vector<8x4xf32>
    %443 = tpu.matmul %440, %442, %cst_397 {dimension_numbers = #tpu.dot_dimension_numbers<[1], [0], [0], [1], [0, 0, 1, 1], [], []>} : vector<8x4xbf16>, vector<4x4xbf16>, vector<8x4xf32> -> vector<8x4xf32>
    %444 = arith.addf %439, %443 : vector<8x4xf32>
    %445 = vector.extract_strided_slice %431 {offsets = [1, 0], sizes = [8, 4], strides = [1, 1]} : vector<9x4xbf16> to vector<8x4xbf16>
    %c5_398 = arith.constant 5 : index
    %c0_399 = arith.constant 0 : index
    %c0_400 = arith.constant 0 : index
    %446 = vector.load %arg3[%c5_398, %c0_399, %c0_400] : memref<9x4x4xbf16, #tpu.memory_space<vmem>>, vector<1x4x4xbf16>
    %447 = vector.shape_cast %446 : vector<1x4x4xbf16> to vector<4x4xbf16>
    %cst_401 = arith.constant dense<0.000000e+00> : vector<8x4xf32>
    %448 = tpu.matmul %445, %447, %cst_401 {dimension_numbers = #tpu.dot_dimension_numbers<[1], [0], [0], [1], [0, 0, 1, 1], [], []>} : vector<8x4xbf16>, vector<4x4xbf16>, vector<8x4xf32> -> vector<8x4xf32>
    %449 = arith.addf %444, %448 : vector<8x4xf32>
    %c2_i32_402 = arith.constant 2 : i32
    %450 = arith.muli %402, %c2_i32_402 : i32
    %c2_i32_403 = arith.constant 2 : i32
    %451 = arith.addi %450, %c2_i32_403 : i32
    %c0_404 = arith.constant 0 : index
    %452 = arith.index_cast %451 : i32 to index
    %c0_405 = arith.constant 0 : index
    %c0_406 = arith.constant 0 : index
    %c0_407 = arith.constant 0 : index
    %453 = vector.load %arg2[%c0_404, %452, %c0_405, %c0_406, %c0_407] : memref<1x18x2x9x4xbf16, #tpu.memory_space<vmem>>, vector<1x1x1x9x4xbf16>
    %454 = vector.shape_cast %453 : vector<1x1x1x9x4xbf16> to vector<9x4xbf16>
    %c0_408 = arith.constant 0 : index
    %455 = arith.index_cast %451 : i32 to index
    %c1_409 = arith.constant 1 : index
    %c0_410 = arith.constant 0 : index
    %c0_411 = arith.constant 0 : index
    %456 = vector.load %arg2[%c0_408, %455, %c1_409, %c0_410, %c0_411] : memref<1x18x2x9x4xbf16, #tpu.memory_space<vmem>>, vector<1x1x1x9x4xbf16>
    %457 = vector.shape_cast %456 : vector<1x1x1x9x4xbf16> to vector<9x4xbf16>
    %458 = vector.extract_strided_slice %454 {offsets = [0, 0], sizes = [8, 4], strides = [1, 1]} : vector<9x4xbf16> to vector<8x4xbf16>
    %c6_412 = arith.constant 6 : index
    %c0_413 = arith.constant 0 : index
    %c0_414 = arith.constant 0 : index
    %459 = vector.load %arg3[%c6_412, %c0_413, %c0_414] : memref<9x4x4xbf16, #tpu.memory_space<vmem>>, vector<1x4x4xbf16>
    %460 = vector.shape_cast %459 : vector<1x4x4xbf16> to vector<4x4xbf16>
    %cst_415 = arith.constant dense<0.000000e+00> : vector<8x4xf32>
    %461 = tpu.matmul %458, %460, %cst_415 {dimension_numbers = #tpu.dot_dimension_numbers<[1], [0], [0], [1], [0, 0, 1, 1], [], []>} : vector<8x4xbf16>, vector<4x4xbf16>, vector<8x4xf32> -> vector<8x4xf32>
    %462 = arith.addf %449, %461 : vector<8x4xf32>
    %463 = vector.extract_strided_slice %457 {offsets = [0, 0], sizes = [8, 4], strides = [1, 1]} : vector<9x4xbf16> to vector<8x4xbf16>
    %c7_416 = arith.constant 7 : index
    %c0_417 = arith.constant 0 : index
    %c0_418 = arith.constant 0 : index
    %464 = vector.load %arg3[%c7_416, %c0_417, %c0_418] : memref<9x4x4xbf16, #tpu.memory_space<vmem>>, vector<1x4x4xbf16>
    %465 = vector.shape_cast %464 : vector<1x4x4xbf16> to vector<4x4xbf16>
    %cst_419 = arith.constant dense<0.000000e+00> : vector<8x4xf32>
    %466 = tpu.matmul %463, %465, %cst_419 {dimension_numbers = #tpu.dot_dimension_numbers<[1], [0], [0], [1], [0, 0, 1, 1], [], []>} : vector<8x4xbf16>, vector<4x4xbf16>, vector<8x4xf32> -> vector<8x4xf32>
    %467 = arith.addf %462, %466 : vector<8x4xf32>
    %468 = vector.extract_strided_slice %454 {offsets = [1, 0], sizes = [8, 4], strides = [1, 1]} : vector<9x4xbf16> to vector<8x4xbf16>
    %c8_420 = arith.constant 8 : index
    %c0_421 = arith.constant 0 : index
    %c0_422 = arith.constant 0 : index
    %469 = vector.load %arg3[%c8_420, %c0_421, %c0_422] : memref<9x4x4xbf16, #tpu.memory_space<vmem>>, vector<1x4x4xbf16>
    %470 = vector.shape_cast %469 : vector<1x4x4xbf16> to vector<4x4xbf16>
    %cst_423 = arith.constant dense<0.000000e+00> : vector<8x4xf32>
    %471 = tpu.matmul %468, %470, %cst_423 {dimension_numbers = #tpu.dot_dimension_numbers<[1], [0], [0], [1], [0, 0, 1, 1], [], []>} : vector<8x4xbf16>, vector<4x4xbf16>, vector<8x4xf32> -> vector<8x4xf32>
    %472 = arith.addf %467, %471 : vector<8x4xf32>
    %473 = vector.broadcast %0 : vector<1x4xf32> to vector<8x4xf32>
    %474 = arith.addf %472, %473 : vector<8x4xf32>
    %cst_424 = arith.constant 0.000000e+00 : f32
    %475 = vector.broadcast %cst_424 : f32 to vector<8x4xf32>
    %476 = arith.maximumf %474, %475 : vector<8x4xf32>
    %477 = arith.truncf %476 : vector<8x4xf32> to vector<8x4xbf16>
    %c0_425 = arith.constant 0 : index
    %c5_426 = arith.constant 5 : index
    %c0_427 = arith.constant 0 : index
    %c0_428 = arith.constant 0 : index
    %478 = vector.load %arg5[%c0_425, %c5_426, %c0_427, %c0_428] : memref<1x8x8x4xbf16, #tpu.memory_space<vmem>>, vector<1x1x8x4xbf16>
    %479 = vector.shape_cast %478 : vector<1x1x8x4xbf16> to vector<8x4xbf16>
    %480 = vector.shape_cast %477 : vector<8x4xbf16> to vector<1x1x8x4xbf16>
    tpu.vector_store %arg5[%c0_425, %c5_426, %c0_427, %c0_428], %480 {strides = array<i32>} : memref<1x8x8x4xbf16, #tpu.memory_space<vmem>>, vector<1x1x8x4xbf16>,
    %c8_i32_429 = arith.constant 8 : i32
    %481 = arith.muli %arg1, %c8_i32_429 : i32
    %c6_i32 = arith.constant 6 : i32
    %482 = arith.addi %481, %c6_i32 : i32
    %cst_430 = arith.constant 0.000000e+00 : f32
    %483 = vector.broadcast %cst_430 : f32 to vector<8x4xf32>
    %c2_i32_431 = arith.constant 2 : i32
    %484 = arith.muli %482, %c2_i32_431 : i32
    %c0_i32_432 = arith.constant 0 : i32
    %485 = arith.addi %484, %c0_i32_432 : i32
    %c0_433 = arith.constant 0 : index
    %486 = arith.index_cast %485 : i32 to index
    %c0_434 = arith.constant 0 : index
    %c0_435 = arith.constant 0 : index
    %c0_436 = arith.constant 0 : index
    %487 = vector.load %arg2[%c0_433, %486, %c0_434, %c0_435, %c0_436] : memref<1x18x2x9x4xbf16, #tpu.memory_space<vmem>>, vector<1x1x1x9x4xbf16>
    %488 = vector.shape_cast %487 : vector<1x1x1x9x4xbf16> to vector<9x4xbf16>
    %c0_437 = arith.constant 0 : index
    %489 = arith.index_cast %485 : i32 to index
    %c1_438 = arith.constant 1 : index
    %c0_439 = arith.constant 0 : index
    %c0_440 = arith.constant 0 : index
    %490 = vector.load %arg2[%c0_437, %489, %c1_438, %c0_439, %c0_440] : memref<1x18x2x9x4xbf16, #tpu.memory_space<vmem>>, vector<1x1x1x9x4xbf16>
    %491 = vector.shape_cast %490 : vector<1x1x1x9x4xbf16> to vector<9x4xbf16>
    %492 = vector.extract_strided_slice %488 {offsets = [0, 0], sizes = [8, 4], strides = [1, 1]} : vector<9x4xbf16> to vector<8x4xbf16>
    %c0_441 = arith.constant 0 : index
    %c0_442 = arith.constant 0 : index
    %c0_443 = arith.constant 0 : index
    %493 = vector.load %arg3[%c0_441, %c0_442, %c0_443] : memref<9x4x4xbf16, #tpu.memory_space<vmem>>, vector<1x4x4xbf16>
    %494 = vector.shape_cast %493 : vector<1x4x4xbf16> to vector<4x4xbf16>
    %cst_444 = arith.constant dense<0.000000e+00> : vector<8x4xf32>
    %495 = tpu.matmul %492, %494, %cst_444 {dimension_numbers = #tpu.dot_dimension_numbers<[1], [0], [0], [1], [0, 0, 1, 1], [], []>} : vector<8x4xbf16>, vector<4x4xbf16>, vector<8x4xf32> -> vector<8x4xf32>
    %496 = arith.addf %483, %495 : vector<8x4xf32>
    %497 = vector.extract_strided_slice %491 {offsets = [0, 0], sizes = [8, 4], strides = [1, 1]} : vector<9x4xbf16> to vector<8x4xbf16>
    %c1_445 = arith.constant 1 : index
    %c0_446 = arith.constant 0 : index
    %c0_447 = arith.constant 0 : index
    %498 = vector.load %arg3[%c1_445, %c0_446, %c0_447] : memref<9x4x4xbf16, #tpu.memory_space<vmem>>, vector<1x4x4xbf16>
    %499 = vector.shape_cast %498 : vector<1x4x4xbf16> to vector<4x4xbf16>
    %cst_448 = arith.constant dense<0.000000e+00> : vector<8x4xf32>
    %500 = tpu.matmul %497, %499, %cst_448 {dimension_numbers = #tpu.dot_dimension_numbers<[1], [0], [0], [1], [0, 0, 1, 1], [], []>} : vector<8x4xbf16>, vector<4x4xbf16>, vector<8x4xf32> -> vector<8x4xf32>
    %501 = arith.addf %496, %500 : vector<8x4xf32>
    %502 = vector.extract_strided_slice %488 {offsets = [1, 0], sizes = [8, 4], strides = [1, 1]} : vector<9x4xbf16> to vector<8x4xbf16>
    %c2_449 = arith.constant 2 : index
    %c0_450 = arith.constant 0 : index
    %c0_451 = arith.constant 0 : index
    %503 = vector.load %arg3[%c2_449, %c0_450, %c0_451] : memref<9x4x4xbf16, #tpu.memory_space<vmem>>, vector<1x4x4xbf16>
    %504 = vector.shape_cast %503 : vector<1x4x4xbf16> to vector<4x4xbf16>
    %cst_452 = arith.constant dense<0.000000e+00> : vector<8x4xf32>
    %505 = tpu.matmul %502, %504, %cst_452 {dimension_numbers = #tpu.dot_dimension_numbers<[1], [0], [0], [1], [0, 0, 1, 1], [], []>} : vector<8x4xbf16>, vector<4x4xbf16>, vector<8x4xf32> -> vector<8x4xf32>
    %506 = arith.addf %501, %505 : vector<8x4xf32>
    %c2_i32_453 = arith.constant 2 : i32
    %507 = arith.muli %482, %c2_i32_453 : i32
    %c1_i32_454 = arith.constant 1 : i32
    %508 = arith.addi %507, %c1_i32_454 : i32
    %c0_455 = arith.constant 0 : index
    %509 = arith.index_cast %508 : i32 to index
    %c0_456 = arith.constant 0 : index
    %c0_457 = arith.constant 0 : index
    %c0_458 = arith.constant 0 : index
    %510 = vector.load %arg2[%c0_455, %509, %c0_456, %c0_457, %c0_458] : memref<1x18x2x9x4xbf16, #tpu.memory_space<vmem>>, vector<1x1x1x9x4xbf16>
    %511 = vector.shape_cast %510 : vector<1x1x1x9x4xbf16> to vector<9x4xbf16>
    %c0_459 = arith.constant 0 : index
    %512 = arith.index_cast %508 : i32 to index
    %c1_460 = arith.constant 1 : index
    %c0_461 = arith.constant 0 : index
    %c0_462 = arith.constant 0 : index
    %513 = vector.load %arg2[%c0_459, %512, %c1_460, %c0_461, %c0_462] : memref<1x18x2x9x4xbf16, #tpu.memory_space<vmem>>, vector<1x1x1x9x4xbf16>
    %514 = vector.shape_cast %513 : vector<1x1x1x9x4xbf16> to vector<9x4xbf16>
    %515 = vector.extract_strided_slice %511 {offsets = [0, 0], sizes = [8, 4], strides = [1, 1]} : vector<9x4xbf16> to vector<8x4xbf16>
    %c3_463 = arith.constant 3 : index
    %c0_464 = arith.constant 0 : index
    %c0_465 = arith.constant 0 : index
    %516 = vector.load %arg3[%c3_463, %c0_464, %c0_465] : memref<9x4x4xbf16, #tpu.memory_space<vmem>>, vector<1x4x4xbf16>
    %517 = vector.shape_cast %516 : vector<1x4x4xbf16> to vector<4x4xbf16>
    %cst_466 = arith.constant dense<0.000000e+00> : vector<8x4xf32>
    %518 = tpu.matmul %515, %517, %cst_466 {dimension_numbers = #tpu.dot_dimension_numbers<[1], [0], [0], [1], [0, 0, 1, 1], [], []>} : vector<8x4xbf16>, vector<4x4xbf16>, vector<8x4xf32> -> vector<8x4xf32>
    %519 = arith.addf %506, %518 : vector<8x4xf32>
    %520 = vector.extract_strided_slice %514 {offsets = [0, 0], sizes = [8, 4], strides = [1, 1]} : vector<9x4xbf16> to vector<8x4xbf16>
    %c4_467 = arith.constant 4 : index
    %c0_468 = arith.constant 0 : index
    %c0_469 = arith.constant 0 : index
    %521 = vector.load %arg3[%c4_467, %c0_468, %c0_469] : memref<9x4x4xbf16, #tpu.memory_space<vmem>>, vector<1x4x4xbf16>
    %522 = vector.shape_cast %521 : vector<1x4x4xbf16> to vector<4x4xbf16>
    %cst_470 = arith.constant dense<0.000000e+00> : vector<8x4xf32>
    %523 = tpu.matmul %520, %522, %cst_470 {dimension_numbers = #tpu.dot_dimension_numbers<[1], [0], [0], [1], [0, 0, 1, 1], [], []>} : vector<8x4xbf16>, vector<4x4xbf16>, vector<8x4xf32> -> vector<8x4xf32>
    %524 = arith.addf %519, %523 : vector<8x4xf32>
    %525 = vector.extract_strided_slice %511 {offsets = [1, 0], sizes = [8, 4], strides = [1, 1]} : vector<9x4xbf16> to vector<8x4xbf16>
    %c5_471 = arith.constant 5 : index
    %c0_472 = arith.constant 0 : index
    %c0_473 = arith.constant 0 : index
    %526 = vector.load %arg3[%c5_471, %c0_472, %c0_473] : memref<9x4x4xbf16, #tpu.memory_space<vmem>>, vector<1x4x4xbf16>
    %527 = vector.shape_cast %526 : vector<1x4x4xbf16> to vector<4x4xbf16>
    %cst_474 = arith.constant dense<0.000000e+00> : vector<8x4xf32>
    %528 = tpu.matmul %525, %527, %cst_474 {dimension_numbers = #tpu.dot_dimension_numbers<[1], [0], [0], [1], [0, 0, 1, 1], [], []>} : vector<8x4xbf16>, vector<4x4xbf16>, vector<8x4xf32> -> vector<8x4xf32>
    %529 = arith.addf %524, %528 : vector<8x4xf32>
    %c2_i32_475 = arith.constant 2 : i32
    %530 = arith.muli %482, %c2_i32_475 : i32
    %c2_i32_476 = arith.constant 2 : i32
    %531 = arith.addi %530, %c2_i32_476 : i32
    %c0_477 = arith.constant 0 : index
    %532 = arith.index_cast %531 : i32 to index
    %c0_478 = arith.constant 0 : index
    %c0_479 = arith.constant 0 : index
    %c0_480 = arith.constant 0 : index
    %533 = vector.load %arg2[%c0_477, %532, %c0_478, %c0_479, %c0_480] : memref<1x18x2x9x4xbf16, #tpu.memory_space<vmem>>, vector<1x1x1x9x4xbf16>
    %534 = vector.shape_cast %533 : vector<1x1x1x9x4xbf16> to vector<9x4xbf16>
    %c0_481 = arith.constant 0 : index
    %535 = arith.index_cast %531 : i32 to index
    %c1_482 = arith.constant 1 : index
    %c0_483 = arith.constant 0 : index
    %c0_484 = arith.constant 0 : index
    %536 = vector.load %arg2[%c0_481, %535, %c1_482, %c0_483, %c0_484] : memref<1x18x2x9x4xbf16, #tpu.memory_space<vmem>>, vector<1x1x1x9x4xbf16>
    %537 = vector.shape_cast %536 : vector<1x1x1x9x4xbf16> to vector<9x4xbf16>
    %538 = vector.extract_strided_slice %534 {offsets = [0, 0], sizes = [8, 4], strides = [1, 1]} : vector<9x4xbf16> to vector<8x4xbf16>
    %c6_485 = arith.constant 6 : index
    %c0_486 = arith.constant 0 : index
    %c0_487 = arith.constant 0 : index
    %539 = vector.load %arg3[%c6_485, %c0_486, %c0_487] : memref<9x4x4xbf16, #tpu.memory_space<vmem>>, vector<1x4x4xbf16>
    %540 = vector.shape_cast %539 : vector<1x4x4xbf16> to vector<4x4xbf16>
    %cst_488 = arith.constant dense<0.000000e+00> : vector<8x4xf32>
    %541 = tpu.matmul %538, %540, %cst_488 {dimension_numbers = #tpu.dot_dimension_numbers<[1], [0], [0], [1], [0, 0, 1, 1], [], []>} : vector<8x4xbf16>, vector<4x4xbf16>, vector<8x4xf32> -> vector<8x4xf32>
    %542 = arith.addf %529, %541 : vector<8x4xf32>
    %543 = vector.extract_strided_slice %537 {offsets = [0, 0], sizes = [8, 4], strides = [1, 1]} : vector<9x4xbf16> to vector<8x4xbf16>
    %c7_489 = arith.constant 7 : index
    %c0_490 = arith.constant 0 : index
    %c0_491 = arith.constant 0 : index
    %544 = vector.load %arg3[%c7_489, %c0_490, %c0_491] : memref<9x4x4xbf16, #tpu.memory_space<vmem>>, vector<1x4x4xbf16>
    %545 = vector.shape_cast %544 : vector<1x4x4xbf16> to vector<4x4xbf16>
    %cst_492 = arith.constant dense<0.000000e+00> : vector<8x4xf32>
    %546 = tpu.matmul %543, %545, %cst_492 {dimension_numbers = #tpu.dot_dimension_numbers<[1], [0], [0], [1], [0, 0, 1, 1], [], []>} : vector<8x4xbf16>, vector<4x4xbf16>, vector<8x4xf32> -> vector<8x4xf32>
    %547 = arith.addf %542, %546 : vector<8x4xf32>
    %548 = vector.extract_strided_slice %534 {offsets = [1, 0], sizes = [8, 4], strides = [1, 1]} : vector<9x4xbf16> to vector<8x4xbf16>
    %c8_493 = arith.constant 8 : index
    %c0_494 = arith.constant 0 : index
    %c0_495 = arith.constant 0 : index
    %549 = vector.load %arg3[%c8_493, %c0_494, %c0_495] : memref<9x4x4xbf16, #tpu.memory_space<vmem>>, vector<1x4x4xbf16>
    %550 = vector.shape_cast %549 : vector<1x4x4xbf16> to vector<4x4xbf16>
    %cst_496 = arith.constant dense<0.000000e+00> : vector<8x4xf32>
    %551 = tpu.matmul %548, %550, %cst_496 {dimension_numbers = #tpu.dot_dimension_numbers<[1], [0], [0], [1], [0, 0, 1, 1], [], []>} : vector<8x4xbf16>, vector<4x4xbf16>, vector<8x4xf32> -> vector<8x4xf32>
    %552 = arith.addf %547, %551 : vector<8x4xf32>
    %553 = vector.broadcast %0 : vector<1x4xf32> to vector<8x4xf32>
    %554 = arith.addf %552, %553 : vector<8x4xf32>
    %cst_497 = arith.constant 0.000000e+00 : f32
    %555 = vector.broadcast %cst_497 : f32 to vector<8x4xf32>
    %556 = arith.maximumf %554, %555 : vector<8x4xf32>
    %557 = arith.truncf %556 : vector<8x4xf32> to vector<8x4xbf16>
    %c0_498 = arith.constant 0 : index
    %c6_499 = arith.constant 6 : index
    %c0_500 = arith.constant 0 : index
    %c0_501 = arith.constant 0 : index
    %558 = vector.load %arg5[%c0_498, %c6_499, %c0_500, %c0_501] : memref<1x8x8x4xbf16, #tpu.memory_space<vmem>>, vector<1x1x8x4xbf16>
    %559 = vector.shape_cast %558 : vector<1x1x8x4xbf16> to vector<8x4xbf16>
    %560 = vector.shape_cast %557 : vector<8x4xbf16> to vector<1x1x8x4xbf16>
    tpu.vector_store %arg5[%c0_498, %c6_499, %c0_500, %c0_501], %560 {strides = array<i32>} : memref<1x8x8x4xbf16, #tpu.memory_space<vmem>>, vector<1x1x8x4xbf16>,
    %c8_i32_502 = arith.constant 8 : i32
    %561 = arith.muli %arg1, %c8_i32_502 : i32
    %c7_i32 = arith.constant 7 : i32
    %562 = arith.addi %561, %c7_i32 : i32
    %cst_503 = arith.constant 0.000000e+00 : f32
    %563 = vector.broadcast %cst_503 : f32 to vector<8x4xf32>
    %c2_i32_504 = arith.constant 2 : i32
    %564 = arith.muli %562, %c2_i32_504 : i32
    %c0_i32_505 = arith.constant 0 : i32
    %565 = arith.addi %564, %c0_i32_505 : i32
    %c0_506 = arith.constant 0 : index
    %566 = arith.index_cast %565 : i32 to index
    %c0_507 = arith.constant 0 : index
    %c0_508 = arith.constant 0 : index
    %c0_509 = arith.constant 0 : index
    %567 = vector.load %arg2[%c0_506, %566, %c0_507, %c0_508, %c0_509] : memref<1x18x2x9x4xbf16, #tpu.memory_space<vmem>>, vector<1x1x1x9x4xbf16>
    %568 = vector.shape_cast %567 : vector<1x1x1x9x4xbf16> to vector<9x4xbf16>
    %c0_510 = arith.constant 0 : index
    %569 = arith.index_cast %565 : i32 to index
    %c1_511 = arith.constant 1 : index
    %c0_512 = arith.constant 0 : index
    %c0_513 = arith.constant 0 : index
    %570 = vector.load %arg2[%c0_510, %569, %c1_511, %c0_512, %c0_513] : memref<1x18x2x9x4xbf16, #tpu.memory_space<vmem>>, vector<1x1x1x9x4xbf16>
    %571 = vector.shape_cast %570 : vector<1x1x1x9x4xbf16> to vector<9x4xbf16>
    %572 = vector.extract_strided_slice %568 {offsets = [0, 0], sizes = [8, 4], strides = [1, 1]} : vector<9x4xbf16> to vector<8x4xbf16>
    %c0_514 = arith.constant 0 : index
    %c0_515 = arith.constant 0 : index
    %c0_516 = arith.constant 0 : index
    %573 = vector.load %arg3[%c0_514, %c0_515, %c0_516] : memref<9x4x4xbf16, #tpu.memory_space<vmem>>, vector<1x4x4xbf16>
    %574 = vector.shape_cast %573 : vector<1x4x4xbf16> to vector<4x4xbf16>
    %cst_517 = arith.constant dense<0.000000e+00> : vector<8x4xf32>
    %575 = tpu.matmul %572, %574, %cst_517 {dimension_numbers = #tpu.dot_dimension_numbers<[1], [0], [0], [1], [0, 0, 1, 1], [], []>} : vector<8x4xbf16>, vector<4x4xbf16>, vector<8x4xf32> -> vector<8x4xf32>
    %576 = arith.addf %563, %575 : vector<8x4xf32>
    %577 = vector.extract_strided_slice %571 {offsets = [0, 0], sizes = [8, 4], strides = [1, 1]} : vector<9x4xbf16> to vector<8x4xbf16>
    %c1_518 = arith.constant 1 : index
    %c0_519 = arith.constant 0 : index
    %c0_520 = arith.constant 0 : index
    %578 = vector.load %arg3[%c1_518, %c0_519, %c0_520] : memref<9x4x4xbf16, #tpu.memory_space<vmem>>, vector<1x4x4xbf16>
    %579 = vector.shape_cast %578 : vector<1x4x4xbf16> to vector<4x4xbf16>
    %cst_521 = arith.constant dense<0.000000e+00> : vector<8x4xf32>
    %580 = tpu.matmul %577, %579, %cst_521 {dimension_numbers = #tpu.dot_dimension_numbers<[1], [0], [0], [1], [0, 0, 1, 1], [], []>} : vector<8x4xbf16>, vector<4x4xbf16>, vector<8x4xf32> -> vector<8x4xf32>
    %581 = arith.addf %576, %580 : vector<8x4xf32>
    %582 = vector.extract_strided_slice %568 {offsets = [1, 0], sizes = [8, 4], strides = [1, 1]} : vector<9x4xbf16> to vector<8x4xbf16>
    %c2_522 = arith.constant 2 : index
    %c0_523 = arith.constant 0 : index
    %c0_524 = arith.constant 0 : index
    %583 = vector.load %arg3[%c2_522, %c0_523, %c0_524] : memref<9x4x4xbf16, #tpu.memory_space<vmem>>, vector<1x4x4xbf16>
    %584 = vector.shape_cast %583 : vector<1x4x4xbf16> to vector<4x4xbf16>
    %cst_525 = arith.constant dense<0.000000e+00> : vector<8x4xf32>
    %585 = tpu.matmul %582, %584, %cst_525 {dimension_numbers = #tpu.dot_dimension_numbers<[1], [0], [0], [1], [0, 0, 1, 1], [], []>} : vector<8x4xbf16>, vector<4x4xbf16>, vector<8x4xf32> -> vector<8x4xf32>
    %586 = arith.addf %581, %585 : vector<8x4xf32>
    %c2_i32_526 = arith.constant 2 : i32
    %587 = arith.muli %562, %c2_i32_526 : i32
    %c1_i32_527 = arith.constant 1 : i32
    %588 = arith.addi %587, %c1_i32_527 : i32
    %c0_528 = arith.constant 0 : index
    %589 = arith.index_cast %588 : i32 to index
    %c0_529 = arith.constant 0 : index
    %c0_530 = arith.constant 0 : index
    %c0_531 = arith.constant 0 : index
    %590 = vector.load %arg2[%c0_528, %589, %c0_529, %c0_530, %c0_531] : memref<1x18x2x9x4xbf16, #tpu.memory_space<vmem>>, vector<1x1x1x9x4xbf16>
    %591 = vector.shape_cast %590 : vector<1x1x1x9x4xbf16> to vector<9x4xbf16>
    %c0_532 = arith.constant 0 : index
    %592 = arith.index_cast %588 : i32 to index
    %c1_533 = arith.constant 1 : index
    %c0_534 = arith.constant 0 : index
    %c0_535 = arith.constant 0 : index
    %593 = vector.load %arg2[%c0_532, %592, %c1_533, %c0_534, %c0_535] : memref<1x18x2x9x4xbf16, #tpu.memory_space<vmem>>, vector<1x1x1x9x4xbf16>
    %594 = vector.shape_cast %593 : vector<1x1x1x9x4xbf16> to vector<9x4xbf16>
    %595 = vector.extract_strided_slice %591 {offsets = [0, 0], sizes = [8, 4], strides = [1, 1]} : vector<9x4xbf16> to vector<8x4xbf16>
    %c3_536 = arith.constant 3 : index
    %c0_537 = arith.constant 0 : index
    %c0_538 = arith.constant 0 : index
    %596 = vector.load %arg3[%c3_536, %c0_537, %c0_538] : memref<9x4x4xbf16, #tpu.memory_space<vmem>>, vector<1x4x4xbf16>
    %597 = vector.shape_cast %596 : vector<1x4x4xbf16> to vector<4x4xbf16>
    %cst_539 = arith.constant dense<0.000000e+00> : vector<8x4xf32>
    %598 = tpu.matmul %595, %597, %cst_539 {dimension_numbers = #tpu.dot_dimension_numbers<[1], [0], [0], [1], [0, 0, 1, 1], [], []>} : vector<8x4xbf16>, vector<4x4xbf16>, vector<8x4xf32> -> vector<8x4xf32>
    %599 = arith.addf %586, %598 : vector<8x4xf32>
    %600 = vector.extract_strided_slice %594 {offsets = [0, 0], sizes = [8, 4], strides = [1, 1]} : vector<9x4xbf16> to vector<8x4xbf16>
    %c4_540 = arith.constant 4 : index
    %c0_541 = arith.constant 0 : index
    %c0_542 = arith.constant 0 : index
    %601 = vector.load %arg3[%c4_540, %c0_541, %c0_542] : memref<9x4x4xbf16, #tpu.memory_space<vmem>>, vector<1x4x4xbf16>
    %602 = vector.shape_cast %601 : vector<1x4x4xbf16> to vector<4x4xbf16>
    %cst_543 = arith.constant dense<0.000000e+00> : vector<8x4xf32>
    %603 = tpu.matmul %600, %602, %cst_543 {dimension_numbers = #tpu.dot_dimension_numbers<[1], [0], [0], [1], [0, 0, 1, 1], [], []>} : vector<8x4xbf16>, vector<4x4xbf16>, vector<8x4xf32> -> vector<8x4xf32>
    %604 = arith.addf %599, %603 : vector<8x4xf32>
    %605 = vector.extract_strided_slice %591 {offsets = [1, 0], sizes = [8, 4], strides = [1, 1]} : vector<9x4xbf16> to vector<8x4xbf16>
    %c5_544 = arith.constant 5 : index
    %c0_545 = arith.constant 0 : index
    %c0_546 = arith.constant 0 : index
    %606 = vector.load %arg3[%c5_544, %c0_545, %c0_546] : memref<9x4x4xbf16, #tpu.memory_space<vmem>>, vector<1x4x4xbf16>
    %607 = vector.shape_cast %606 : vector<1x4x4xbf16> to vector<4x4xbf16>
    %cst_547 = arith.constant dense<0.000000e+00> : vector<8x4xf32>
    %608 = tpu.matmul %605, %607, %cst_547 {dimension_numbers = #tpu.dot_dimension_numbers<[1], [0], [0], [1], [0, 0, 1, 1], [], []>} : vector<8x4xbf16>, vector<4x4xbf16>, vector<8x4xf32> -> vector<8x4xf32>
    %609 = arith.addf %604, %608 : vector<8x4xf32>
    %c2_i32_548 = arith.constant 2 : i32
    %610 = arith.muli %562, %c2_i32_548 : i32
    %c2_i32_549 = arith.constant 2 : i32
    %611 = arith.addi %610, %c2_i32_549 : i32
    %c0_550 = arith.constant 0 : index
    %612 = arith.index_cast %611 : i32 to index
    %c0_551 = arith.constant 0 : index
    %c0_552 = arith.constant 0 : index
    %c0_553 = arith.constant 0 : index
    %613 = vector.load %arg2[%c0_550, %612, %c0_551, %c0_552, %c0_553] : memref<1x18x2x9x4xbf16, #tpu.memory_space<vmem>>, vector<1x1x1x9x4xbf16>
    %614 = vector.shape_cast %613 : vector<1x1x1x9x4xbf16> to vector<9x4xbf16>
    %c0_554 = arith.constant 0 : index
    %615 = arith.index_cast %611 : i32 to index
    %c1_555 = arith.constant 1 : index
    %c0_556 = arith.constant 0 : index
    %c0_557 = arith.constant 0 : index
    %616 = vector.load %arg2[%c0_554, %615, %c1_555, %c0_556, %c0_557] : memref<1x18x2x9x4xbf16, #tpu.memory_space<vmem>>, vector<1x1x1x9x4xbf16>
    %617 = vector.shape_cast %616 : vector<1x1x1x9x4xbf16> to vector<9x4xbf16>
    %618 = vector.extract_strided_slice %614 {offsets = [0, 0], sizes = [8, 4], strides = [1, 1]} : vector<9x4xbf16> to vector<8x4xbf16>
    %c6_558 = arith.constant 6 : index
    %c0_559 = arith.constant 0 : index
    %c0_560 = arith.constant 0 : index
    %619 = vector.load %arg3[%c6_558, %c0_559, %c0_560] : memref<9x4x4xbf16, #tpu.memory_space<vmem>>, vector<1x4x4xbf16>
    %620 = vector.shape_cast %619 : vector<1x4x4xbf16> to vector<4x4xbf16>
    %cst_561 = arith.constant dense<0.000000e+00> : vector<8x4xf32>
    %621 = tpu.matmul %618, %620, %cst_561 {dimension_numbers = #tpu.dot_dimension_numbers<[1], [0], [0], [1], [0, 0, 1, 1], [], []>} : vector<8x4xbf16>, vector<4x4xbf16>, vector<8x4xf32> -> vector<8x4xf32>
    %622 = arith.addf %609, %621 : vector<8x4xf32>
    %623 = vector.extract_strided_slice %617 {offsets = [0, 0], sizes = [8, 4], strides = [1, 1]} : vector<9x4xbf16> to vector<8x4xbf16>
    %c7_562 = arith.constant 7 : index
    %c0_563 = arith.constant 0 : index
    %c0_564 = arith.constant 0 : index
    %624 = vector.load %arg3[%c7_562, %c0_563, %c0_564] : memref<9x4x4xbf16, #tpu.memory_space<vmem>>, vector<1x4x4xbf16>
    %625 = vector.shape_cast %624 : vector<1x4x4xbf16> to vector<4x4xbf16>
    %cst_565 = arith.constant dense<0.000000e+00> : vector<8x4xf32>
    %626 = tpu.matmul %623, %625, %cst_565 {dimension_numbers = #tpu.dot_dimension_numbers<[1], [0], [0], [1], [0, 0, 1, 1], [], []>} : vector<8x4xbf16>, vector<4x4xbf16>, vector<8x4xf32> -> vector<8x4xf32>
    %627 = arith.addf %622, %626 : vector<8x4xf32>
    %628 = vector.extract_strided_slice %614 {offsets = [1, 0], sizes = [8, 4], strides = [1, 1]} : vector<9x4xbf16> to vector<8x4xbf16>
    %c8_566 = arith.constant 8 : index
    %c0_567 = arith.constant 0 : index
    %c0_568 = arith.constant 0 : index
    %629 = vector.load %arg3[%c8_566, %c0_567, %c0_568] : memref<9x4x4xbf16, #tpu.memory_space<vmem>>, vector<1x4x4xbf16>
    %630 = vector.shape_cast %629 : vector<1x4x4xbf16> to vector<4x4xbf16>
    %cst_569 = arith.constant dense<0.000000e+00> : vector<8x4xf32>
    %631 = tpu.matmul %628, %630, %cst_569 {dimension_numbers = #tpu.dot_dimension_numbers<[1], [0], [0], [1], [0, 0, 1, 1], [], []>} : vector<8x4xbf16>, vector<4x4xbf16>, vector<8x4xf32> -> vector<8x4xf32>
    %632 = arith.addf %627, %631 : vector<8x4xf32>
    %633 = vector.broadcast %0 : vector<1x4xf32> to vector<8x4xf32>
    %634 = arith.addf %632, %633 : vector<8x4xf32>
    %cst_570 = arith.constant 0.000000e+00 : f32
    %635 = vector.broadcast %cst_570 : f32 to vector<8x4xf32>
    %636 = arith.maximumf %634, %635 : vector<8x4xf32>
    %637 = arith.truncf %636 : vector<8x4xf32> to vector<8x4xbf16>
    %c0_571 = arith.constant 0 : index
    %c7_572 = arith.constant 7 : index
    %c0_573 = arith.constant 0 : index
    %c0_574 = arith.constant 0 : index
    %638 = vector.load %arg5[%c0_571, %c7_572, %c0_573, %c0_574] : memref<1x8x8x4xbf16, #tpu.memory_space<vmem>>, vector<1x1x8x4xbf16>
    %639 = vector.shape_cast %638 : vector<1x1x8x4xbf16> to vector<8x4xbf16>
    %640 = vector.shape_cast %637 : vector<8x4xbf16> to vector<1x1x8x4xbf16>
    tpu.vector_store %arg5[%c0_571, %c7_572, %c0_573, %c0_574], %640 {strides = array<i32>} : memref<1x8x8x4xbf16, #tpu.memory_space<vmem>>, vector<1x1x8x4xbf16>,
    return
  }
  func.func @transform_0(%arg0: i32, %arg1: i32) -> (i32, i32, i32, i32, i32) {
    %c0_i32 = arith.constant 0 : i32
    %c0_i32_0 = arith.constant 0 : i32
    %c0_i32_1 = arith.constant 0 : i32
    %c0_i32_2 = arith.constant 0 : i32
    %c0_i32_3 = arith.constant 0 : i32
    return %arg0, %c0_i32, %c0_i32_0, %c0_i32_1, %c0_i32_2 : i32, i32, i32, i32, i32
  }
  func.func @transform_1(%arg0: i32, %arg1: i32) -> (i32, i32, i32) {
    %c0_i32 = arith.constant 0 : i32
    %c0_i32_0 = arith.constant 0 : i32
    %c0_i32_1 = arith.constant 0 : i32
    %c0_i32_2 = arith.constant 0 : i32
    return %c0_i32, %c0_i32_0, %c0_i32_1 : i32, i32, i32
  }
  func.func @transform_2(%arg0: i32, %arg1: i32) -> (i32, i32) {
    %c0_i32 = arith.constant 0 : i32
    %c0_i32_0 = arith.constant 0 : i32
    %c0_i32_1 = arith.constant 0 : i32
    return %c0_i32, %c0_i32_0 : i32, i32
  }
  func.func @transform_3(%arg0: i32, %arg1: i32) -> (i32, i32, i32, i32) {
    %c0_i32 = arith.constant 0 : i32
    %c0_i32_0 = arith.constant 0 : i32
    %c0_i32_1 = arith.constant 0 : i32
    return %arg0, %arg1, %c0_i32, %c0_i32_0 : i32, i32, i32, i32
  }
}

module attributes {stable_mosaic.version = 11 : i64} {
  func.func @_mm_bias_down_add_relu_kernel(%arg0: i32, %arg1: memref<64x4xbf16, #tpu.memory_space<vmem>>, %arg2: memref<4x16xbf16, #tpu.memory_space<vmem>>, %arg3: memref<1x16xf32, #tpu.memory_space<vmem>>, %arg4: memref<64x8xf32, #tpu.memory_space<vmem>>, %arg5: memref<8x16xbf16, #tpu.memory_space<vmem>>, %arg6: memref<1x16xf32, #tpu.memory_space<vmem>>, %arg7: memref<64x16xf32, #tpu.memory_space<vmem>>) attributes {dimension_semantics = [#tpu.dimension_semantics<parallel>], iteration_bounds = array<i64: 2>, scalar_prefetch = 0 : i64, scratch_operands = 0 : i64, tpu.core_type = #tpu.core_type<tc>, window_params = [{transform_indices = @transform_0, window_bounds = array<i64: 64, 4>}, {pipeline_mode = #tpu.pipeline_mode<synchronous>, transform_indices = @transform_1, window_bounds = array<i64: 4, 16>}, {pipeline_mode = #tpu.pipeline_mode<synchronous>, transform_indices = @transform_2, window_bounds = array<i64: 1, 16>}, {transform_indices = @transform_3, window_bounds = array<i64: 64, 8>}, {pipeline_mode = #tpu.pipeline_mode<synchronous>, transform_indices = @transform_4, window_bounds = array<i64: 8, 16>}, {pipeline_mode = #tpu.pipeline_mode<synchronous>, transform_indices = @transform_5, window_bounds = array<i64: 1, 16>}, {transform_indices = @transform_6, window_bounds = array<i64: 64, 16>}]} {
    %c0 = arith.constant 0 : index
    %c0_0 = arith.constant 0 : index
    %0 = vector.load %arg1[%c0, %c0_0] : memref<64x4xbf16, #tpu.memory_space<vmem>>, vector<64x4xbf16>
    %c0_1 = arith.constant 0 : index
    %c0_2 = arith.constant 0 : index
    %1 = vector.load %arg2[%c0_1, %c0_2] : memref<4x16xbf16, #tpu.memory_space<vmem>>, vector<4x16xbf16>
    %cst = arith.constant dense<0.000000e+00> : vector<64x16xf32>
    %2 = tpu.matmul %0, %1, %cst {dimension_numbers = #tpu.dot_dimension_numbers<[1], [0], [0], [1], [0, 0, 1, 1], [], []>} : vector<64x4xbf16>, vector<4x16xbf16>, vector<64x16xf32> -> vector<64x16xf32>
    %c0_3 = arith.constant 0 : index
    %c0_4 = arith.constant 0 : index
    %3 = vector.load %arg4[%c0_3, %c0_4] : memref<64x8xf32, #tpu.memory_space<vmem>>, vector<64x8xf32>
    %4 = arith.truncf %3 : vector<64x8xf32> to vector<64x8xbf16>
    %c0_5 = arith.constant 0 : index
    %c0_6 = arith.constant 0 : index
    %5 = vector.load %arg5[%c0_5, %c0_6] : memref<8x16xbf16, #tpu.memory_space<vmem>>, vector<8x16xbf16>
    %cst_7 = arith.constant dense<0.000000e+00> : vector<64x16xf32>
    %6 = tpu.matmul %4, %5, %cst_7 {dimension_numbers = #tpu.dot_dimension_numbers<[1], [0], [0], [1], [0, 0, 1, 1], [], []>} : vector<64x8xbf16>, vector<8x16xbf16>, vector<64x16xf32> -> vector<64x16xf32>
    %c0_8 = arith.constant 0 : index
    %c0_9 = arith.constant 0 : index
    %7 = vector.load %arg3[%c0_8, %c0_9] : memref<1x16xf32, #tpu.memory_space<vmem>>, vector<1x16xf32>
    %8 = vector.broadcast %7 : vector<1x16xf32> to vector<64x16xf32>
    %9 = arith.addf %2, %8 : vector<64x16xf32>
    %10 = arith.addf %9, %6 : vector<64x16xf32>
    %c0_10 = arith.constant 0 : index
    %c0_11 = arith.constant 0 : index
    %11 = vector.load %arg6[%c0_10, %c0_11] : memref<1x16xf32, #tpu.memory_space<vmem>>, vector<1x16xf32>
    %12 = vector.broadcast %11 : vector<1x16xf32> to vector<64x16xf32>
    %13 = arith.addf %10, %12 : vector<64x16xf32>
    %cst_12 = arith.constant 0.000000e+00 : f32
    %14 = vector.broadcast %cst_12 : f32 to vector<64x16xf32>
    %15 = arith.maximumf %13, %14 : vector<64x16xf32>
    %c0_13 = arith.constant 0 : index
    %c0_14 = arith.constant 0 : index
    %16 = vector.load %arg7[%c0_13, %c0_14] : memref<64x16xf32, #tpu.memory_space<vmem>>, vector<64x16xf32>
    tpu.vector_store %arg7[%c0_13, %c0_14], %15 {strides = array<i32>} : memref<64x16xf32, #tpu.memory_space<vmem>>, vector<64x16xf32>,
    return
  }
  func.func @transform_0(%arg0: i32) -> (i32, i32) {
    %c0_i32 = arith.constant 0 : i32
    %c0_i32_0 = arith.constant 0 : i32
    return %arg0, %c0_i32 : i32, i32
  }
  func.func @transform_1(%arg0: i32) -> (i32, i32) {
    %c0_i32 = arith.constant 0 : i32
    %c0_i32_0 = arith.constant 0 : i32
    %c0_i32_1 = arith.constant 0 : i32
    return %c0_i32, %c0_i32_0 : i32, i32
  }
  func.func @transform_2(%arg0: i32) -> (i32, i32) {
    %c0_i32 = arith.constant 0 : i32
    %c0_i32_0 = arith.constant 0 : i32
    %c0_i32_1 = arith.constant 0 : i32
    return %c0_i32, %c0_i32_0 : i32, i32
  }
  func.func @transform_3(%arg0: i32) -> (i32, i32) {
    %c0_i32 = arith.constant 0 : i32
    %c0_i32_0 = arith.constant 0 : i32
    return %arg0, %c0_i32 : i32, i32
  }
  func.func @transform_4(%arg0: i32) -> (i32, i32) {
    %c0_i32 = arith.constant 0 : i32
    %c0_i32_0 = arith.constant 0 : i32
    %c0_i32_1 = arith.constant 0 : i32
    return %c0_i32, %c0_i32_0 : i32, i32
  }
  func.func @transform_5(%arg0: i32) -> (i32, i32) {
    %c0_i32 = arith.constant 0 : i32
    %c0_i32_0 = arith.constant 0 : i32
    %c0_i32_1 = arith.constant 0 : i32
    return %c0_i32, %c0_i32_0 : i32, i32
  }
  func.func @transform_6(%arg0: i32) -> (i32, i32) {
    %c0_i32 = arith.constant 0 : i32
    %c0_i32_0 = arith.constant 0 : i32
    return %arg0, %c0_i32 : i32, i32
  }
}

</mosaic_0001>

<bundles_post_ra>
// kernel: bottleneck_forward.3
= control target key start
LH: loop header
LB: loop body
LE: loop exit
PB: predicated region body
PF: predicated region fallthrough
CT: control target
= control target key end

     0   :  { %s877_s12 = smov 0   ;;  %s1054_s0 = inlined_call_operand.vmem [shape: f32[512,8], index: 0, kind: input, shape index: {}]   ;;  %s1055_s1 = inlined_call_operand.vmem [shape: bf16[8,4], index: 1, kind: input, shape index: {}]   ;;  %s1056_s2 = inlined_call_operand.vmem [shape: f32[1,4], index: 2, kind: input, shape index: {}]   ;;  %s1057_s3 = inlined_call_operand.vmem [shape: bf16[512,4], index: 3, kind: output, shape index: {}]  }
   0x1 LB: > { %s694_s13 = sadd.s32 4294967295, %s855_s12   ;;  %p698_p0 = scmp.ge.s32.totalorder %s855_s12, 1  ;;  %s855_s12 = sphi %s877_s12, %s13_s12  }
   0x2   : > { %p138_p1 = scmp.lt.s32.totalorder %s855_s12, 3 }
   0x4   : > { %p139_p2 = pnand %p698_p0, %p138_p1 }
   0x5   : > { %v223_v0 = vld [vmem:[%s1055_s1] sm:$0xf] (!%p139_p2)  ;;  %vm280_vm0 = vcmask (!%p139_p2), 1043456   ;;  %s699_s16 = sshll.u32 (!%p139_p2), %s694_s13, 5  ;;  %vm231_vm1 = vcmask (!%p139_p2), 64512   ;;  %vm605_vm2 = vcmask (!%p139_p2), 27648  }
   0x6   : > { %142 = sbr.rel (%p139_p2) target bundleno = 267 (0x10b), region = 32  ;;  %839 = vmatprep.subr.msk.bf16.mxu0 (!%p139_p2), %vm280_vm0, %v223_v0  ;;  %840 = vmatprep.subr.msk.bf16.mxu1 (!%p139_p2), %vm280_vm0, %v223_v0  ;;  %v282_v1 = vsel (!%p139_p2), %vm280_vm0, %v223_v0, 0  ;;  %p163_p3 = scmp.lt.s32.totalorder (!%p139_p2), %s699_s16, 63  ;;  %v947_v50 = vld [vmem:[%s1056_s2] ss:$0 sm:$0xff] (!%p139_p2) }
   0x7   : > { %804 = vmatpush3.bf16.msra.mxu0 (!%p139_p2), %v282_v1  ;;  %838 = vmatpush3.bf16.msra.mxu1 (!%p139_p2), %v282_v1 }
   0xd   : > { %s1059_s16 = smov (!%p163_p3, %s699_s16), 63 }
   0xe   : > { %s700_s17 = sshll.u32 %s1059_s16, 3  ;;  %s702_s23 = sshll.u32 %s1059_s16, 2 }
   0xf   : > { %s894_s20 = scalar_lea.vmem %s1054_s0, %s700_s17  ;;  %s958_s26 = scalar_lea.vmem %s1057_s3, %s702_s23 }
  0x10   : > { %v175_v2 = vld [vmem:[%s894_s20] sm:$0xff]  ;;  %v176_v3 = vld [vmem:[%s894_s20 + $0x8] sm:$0xff]  ;;  %v177_v7 = vld [vmem:[%s894_s20 + $0x10] sm:$0xff] }
  0x11   : > { %v191_v4 = vld [vmem:[%s894_s20 + $0x80] sm:$0xff]  ;;  %v207_v5 = vpack.c.bf16 %v176_v3, %v175_v2  ;;  %v192_v6 = vld [vmem:[%s894_s20 + $0x88] sm:$0xff]  ;;  %v178_v8 = vld [vmem:[%s894_s20 + $0x18] sm:$0xff] }
  0x12   : > { %v215_v9 = vpack.c.bf16 %v192_v6, %v191_v4  ;;  %v208_v10 = vpack.c.bf16 %v178_v8, %v177_v7  ;;  %v193_v11 = vld [vmem:[%s894_s20 + $0x90] sm:$0xff]  ;;  %v194_v12 = vld [vmem:[%s894_s20 + $0x98] sm:$0xff]  ;;  %v179_v13 = vld [vmem:[%s894_s20 + $0x20] sm:$0xff] }
  0x13   : > { %805 = vmatprep.mubr.msk.bf16.mxu0 %vm231_vm1, %v207_v5  ;;  %v216_v14 = vpack.c.bf16 %v194_v12, %v193_v11  ;;  %v180_v15 = vld [vmem:[%s894_s20 + $0x28] sm:$0xff]  ;;  %v195_v16 = vld [vmem:[%s894_s20 + $0xa0] sm:$0xff]  ;;  %v181_v20 = vld [vmem:[%s894_s20 + $0x30] sm:$0xff] }
  0x14   : > { %v196_v17 = vld [vmem:[%s894_s20 + $0xa8] sm:$0xff]  ;;  %821 = vmatprep.mubr.msk.bf16.mxu1 %vm231_vm1, %v215_v9  ;;  %806 = vmatmul.mubr.msk.bf16.vlgmr.msra.gmra.mrb[0].mxu0 %vm231_vm1, %v208_v10  ;;  %v209_v18 = vpack.c.bf16 %v180_v15, %v179_v13  ;;  %v182_v21 = vld [vmem:[%s894_s20 + $0x38] sm:$0xff]  ;;  %v197_v22 = vld [vmem:[%s894_s20 + $0xb0] sm:$0xff] }
  0x15   : > { %v217_v19 = vpack.c.bf16 %v196_v17, %v195_v16  ;;  %822 = vmatmul.mubr.msk.bf16.vlgmr.msra.gmra.mrb[0].mxu1 %vm231_vm1, %v216_v14  ;;  %v198_v23 = vld [vmem:[%s894_s20 + $0xb8] sm:$0xff]  ;;  %v183_v24 = vld [vmem:[%s894_s20 + $0x40] sm:$0xff]  ;;  %v184_v25 = vld [vmem:[%s894_s20 + $0x48] sm:$0xff]  ;;  %v210_v28 = vpack.c.bf16 %v182_v21, %v181_v20 }
  0x16   : > { %809 = vmatprep.mubr.msk.bf16.mxu0 %vm231_vm1, %v209_v18  ;;  %v199_v26 = vld [vmem:[%s894_s20 + $0xc0] sm:$0xff]  ;;  %v200_v27 = vld [vmem:[%s894_s20 + $0xc8] sm:$0xff]  ;;  %v218_v29 = vpack.c.bf16 %v198_v23, %v197_v22  ;;  %v211_v30 = vpack.c.bf16 %v184_v25, %v183_v24  ;;  %v185_v32 = vld [vmem:[%s894_s20 + $0x50] sm:$0xff] }
  0x17   : > { %825 = vmatprep.mubr.msk.bf16.mxu1 %vm231_vm1, %v217_v19  ;;  %v219_v31 = vpack.c.bf16 %v200_v27, %v199_v26  ;;  %v186_v33 = vld [vmem:[%s894_s20 + $0x58] sm:$0xff]  ;;  %v201_v34 = vld [vmem:[%s894_s20 + $0xd0] sm:$0xff]  ;;  %v187_v36 = vld [vmem:[%s894_s20 + $0x60] sm:$0xff] }
  0x18   : > { %v202_v35 = vld [vmem:[%s894_s20 + $0xd8] sm:$0xff]  ;;  %v188_v37 = vld [vmem:[%s894_s20 + $0x68] sm:$0xff]  ;;  %v203_v38 = vld [vmem:[%s894_s20 + $0xe0] sm:$0xff]  ;;  %v212_v40 = vpack.c.bf16 %v186_v33, %v185_v32 }
  0x19   : > { %v204_v39 = vld [vmem:[%s894_s20 + $0xe8] sm:$0xff]  ;;  %v220_v41 = vpack.c.bf16 %v202_v35, %v201_v34  ;;  %v213_v42 = vpack.c.bf16 %v188_v37, %v187_v36  ;;  %v189_v44 = vld [vmem:[%s894_s20 + $0x70] sm:$0xff]  ;;  %v190_v45 = vld [vmem:[%s894_s20 + $0x78] sm:$0xff] }
  0x1a   : > { %v221_v43 = vpack.c.bf16 %v204_v39, %v203_v38  ;;  %v205_v46 = vld [vmem:[%s894_s20 + $0xf0] sm:$0xff]  ;;  %v206_v47 = vld [vmem:[%s894_s20 + $0xf8] sm:$0xff]  ;;  %v214_v48 = vpack.c.bf16 %v190_v45, %v189_v44 }
  0x1b   : > { %v222_v49 = vpack.c.bf16 %v206_v47, %v205_v46 }
  0x1c   : > { %810 = vmatmul.mubr.msk.bf16.gmra.mrb[4].mxu0 %vm231_vm1, %v210_v28 }
  0x1d   : > { %826 = vmatmul.mubr.msk.bf16.gmra.mrb[4].mxu1 %vm231_vm1, %v218_v29  ;;  %813 = vmatprep.mubr.msk.bf16.mxu0 %vm231_vm1, %v211_v30 }
  0x1e   : > { %829 = vmatprep.mubr.msk.bf16.mxu1 %vm231_vm1, %v219_v31 }
  0x24   : > { %814 = vmatmul.mubr.msk.bf16.gmra.mrb[8].mxu0 %vm231_vm1, %v212_v40 }
  0x25   : > { %830 = vmatmul.mubr.msk.bf16.gmra.mrb[8].mxu1 %vm231_vm1, %v220_v41  ;;  %817 = vmatprep.mubr.msk.bf16.mxu0 %vm231_vm1, %v213_v42 }
  0x26   : > { %833 = vmatprep.mubr.msk.bf16.mxu1 %vm231_vm1, %v221_v43 }
  0x2c   : > { %818 = vmatmul.mubr.msk.bf16.gmra.mrb[12].mxu0 %vm231_vm1, %v214_v48 }
  0x2d   : > { %834 = vmatmul.mubr.msk.bf16.gmra.mrb[12].mxu1 %vm231_vm1, %v222_v49 }
  0xe7   : > { %v807_v51 = vpop.f32.mrb[0].mxu0 }
  0xe8   : > { %v327_v52 = vadd.f32 %v807_v51, %v947_v50  ;;  %v823_v53 = vpop.f32.mrb[0].mxu1  ;;  %v318_v54 = vpop.f32.mrb[1].mxu0 }
  0xe9   : > { %v391_v55 = vadd.f32 %v823_v53, %v947_v50  ;;  %v319_v56 = vadd.f32 %v947_v50, %v318_v54  ;;  %v382_v57 = vpop.f32.mrb[1].mxu1  ;;  %v808_v58 = vpop.f32.mrb[2].mxu0 }
  0xea   : > { %v447_v59 = vmax.f32 %v327_v52, 0.0  ;;  %v383_v60 = vadd.f32 %v947_v50, %v382_v57  ;;  %v330_v61 = vadd.f32 %v808_v58, %v947_v50  ;;  %v824_v62 = vpop.f32.mrb[2].mxu1  ;;  %v321_v63 = vpop.f32.mrb[3].mxu0 }
  0xeb   : > { %v463_v0 = vmax.f32 %v391_v55, 0.0  ;;  %v445_v1 = vmax.f32 %v319_v56, 0.0  ;;  %v394_v2 = vadd.f32 %v824_v62, %v947_v50  ;;  %v322_v3 = vadd.f32 %v947_v50, %v321_v63  ;;  %v385_v4 = vpop.f32.mrb[3].mxu1 }
  0xec   : > { %v756_v5 = vpack.c.bf16 %v447_v59, %v447_v59  ;;  %v461_v6 = vmax.f32 %v383_v60, 0.0  ;;  %v448_v7 = vmax.f32 %v330_v61, 0.0  ;;  %v386_v8 = vadd.f32 %v947_v50, %v385_v4 }
  0xed   : > { %v772_v9 = vpack.c.bf16 %v463_v0, %v463_v0  ;;  %v754_v10 = vpack.c.bf16 %v445_v1, %v445_v1  ;;  %v464_v11 = vmax.f32 %v394_v2, 0.0  ;;  %v446_v12 = vmax.f32 %v322_v3, 0.0 }
  0xee   : > { %608 = vst.msk [vmem:[%s958_s26 + $0x8] sm:$0xf] %vm605_vm2, %v756_v5  ;;  %v770_v13 = vpack.c.bf16 %v461_v6, %v461_v6  ;;  %v757_v14 = vpack.c.bf16 %v448_v7, %v448_v7  ;;  %v462_v15 = vmax.f32 %v386_v8, 0.0 }
  0xef   : > { %624 = vst.msk [vmem:[%s958_s26 + $0x48] sm:$0xf] %vm605_vm2, %v772_v9  ;;  %606 = vst.msk [vmem:[%s958_s26] sm:$0xf] %vm605_vm2, %v754_v10  ;;  %v773_v16 = vpack.c.bf16 %v464_v11, %v464_v11  ;;  %v755_v17 = vpack.c.bf16 %v446_v12, %v446_v12  ;;  %v811_v18 = vpop.f32.mrb[4].mxu0 }
  0xf0   : > { %622 = vst.msk [vmem:[%s958_s26 + $0x40] sm:$0xf] %vm605_vm2, %v770_v13  ;;  %609 = vst.msk [vmem:[%s958_s26 + $0xc] sm:$0xf] %vm605_vm2, %v757_v14  ;;  %v771_v19 = vpack.c.bf16 %v462_v15, %v462_v15  ;;  %v343_v20 = vadd.f32 %v811_v18, %v947_v50  ;;  %v827_v21 = vpop.f32.mrb[4].mxu1  ;;  %v334_v22 = vpop.f32.mrb[5].mxu0 }
  0xf1   : > { %625 = vst.msk [vmem:[%s958_s26 + $0x4c] sm:$0xf] %vm605_vm2, %v773_v16  ;;  %607 = vst.msk [vmem:[%s958_s26 + $0x4] sm:$0xf] %vm605_vm2, %v755_v17  ;;  %v407_v23 = vadd.f32 %v827_v21, %v947_v50  ;;  %v335_v24 = vadd.f32 %v947_v50, %v334_v22  ;;  %v398_v25 = vpop.f32.mrb[5].mxu1  ;;  %v812_v26 = vpop.f32.mrb[6].mxu0 }
  0xf2   : > { %623 = vst.msk [vmem:[%s958_s26 + $0x44] sm:$0xf] %vm605_vm2, %v771_v19  ;;  %v451_v27 = vmax.f32 %v343_v20, 0.0  ;;  %v399_v28 = vadd.f32 %v947_v50, %v398_v25  ;;  %v346_v29 = vadd.f32 %v812_v26, %v947_v50  ;;  %v828_v30 = vpop.f32.mrb[6].mxu1  ;;  %v337_v31 = vpop.f32.mrb[7].mxu0 }
  0xf3   : > { %v467_v32 = vmax.f32 %v407_v23, 0.0  ;;  %v449_v33 = vmax.f32 %v335_v24, 0.0  ;;  %v410_v34 = vadd.f32 %v828_v30, %v947_v50  ;;  %v338_v35 = vadd.f32 %v947_v50, %v337_v31  ;;  %v401_v36 = vpop.f32.mrb[7].mxu1 }
  0xf4   : > { %v760_v37 = vpack.c.bf16 %v451_v27, %v451_v27  ;;  %v465_v38 = vmax.f32 %v399_v28, 0.0  ;;  %v452_v39 = vmax.f32 %v346_v29, 0.0  ;;  %v402_v40 = vadd.f32 %v947_v50, %v401_v36 }
  0xf5   : > { %v776_v41 = vpack.c.bf16 %v467_v32, %v467_v32  ;;  %v758_v42 = vpack.c.bf16 %v449_v33, %v449_v33  ;;  %v468_v43 = vmax.f32 %v410_v34, 0.0  ;;  %v450_v44 = vmax.f32 %v338_v35, 0.0 }
  0xf6   : > { %612 = vst.msk [vmem:[%s958_s26 + $0x18] sm:$0xf] %vm605_vm2, %v760_v37  ;;  %v774_v45 = vpack.c.bf16 %v465_v38, %v465_v38  ;;  %v761_v46 = vpack.c.bf16 %v452_v39, %v452_v39  ;;  %v466_v47 = vmax.f32 %v402_v40, 0.0 }
  0xf7   : > { %628 = vst.msk [vmem:[%s958_s26 + $0x58] sm:$0xf] %vm605_vm2, %v776_v41  ;;  %610 = vst.msk [vmem:[%s958_s26 + $0x10] sm:$0xf] %vm605_vm2, %v758_v42  ;;  %v777_v48 = vpack.c.bf16 %v468_v43, %v468_v43  ;;  %v759_v49 = vpack.c.bf16 %v450_v44, %v450_v44  ;;  %v815_v51 = vpop.f32.mrb[8].mxu0 }
  0xf8   : > { %626 = vst.msk [vmem:[%s958_s26 + $0x50] sm:$0xf] %vm605_vm2, %v774_v45  ;;  %613 = vst.msk [vmem:[%s958_s26 + $0x1c] sm:$0xf] %vm605_vm2, %v761_v46  ;;  %v775_v52 = vpack.c.bf16 %v466_v47, %v466_v47  ;;  %v359_v53 = vadd.f32 %v815_v51, %v947_v50  ;;  %v831_v54 = vpop.f32.mrb[8].mxu1  ;;  %v350_v55 = vpop.f32.mrb[9].mxu0 }
  0xf9   : > { %629 = vst.msk [vmem:[%s958_s26 + $0x5c] sm:$0xf] %vm605_vm2, %v777_v48  ;;  %611 = vst.msk [vmem:[%s958_s26 + $0x14] sm:$0xf] %vm605_vm2, %v759_v49  ;;  %v423_v56 = vadd.f32 %v831_v54, %v947_v50  ;;  %v351_v57 = vadd.f32 %v947_v50, %v350_v55  ;;  %v414_v58 = vpop.f32.mrb[9].mxu1  ;;  %v816_v59 = vpop.f32.mrb[10].mxu0 }
  0xfa   : > { %627 = vst.msk [vmem:[%s958_s26 + $0x54] sm:$0xf] %vm605_vm2, %v775_v52  ;;  %v455_v60 = vmax.f32 %v359_v53, 0.0  ;;  %v415_v61 = vadd.f32 %v947_v50, %v414_v58  ;;  %v362_v62 = vadd.f32 %v816_v59, %v947_v50  ;;  %v832_v63 = vpop.f32.mrb[10].mxu1  ;;  %v353_v0 = vpop.f32.mrb[11].mxu0 }
  0xfb   : > { %v471_v1 = vmax.f32 %v423_v56, 0.0  ;;  %v453_v2 = vmax.f32 %v351_v57, 0.0  ;;  %v426_v3 = vadd.f32 %v832_v63, %v947_v50  ;;  %v354_v4 = vadd.f32 %v947_v50, %v353_v0  ;;  %v417_v5 = vpop.f32.mrb[11].mxu1 }
  0xfc   : > { %v764_v6 = vpack.c.bf16 %v455_v60, %v455_v60  ;;  %v469_v7 = vmax.f32 %v415_v61, 0.0  ;;  %v456_v8 = vmax.f32 %v362_v62, 0.0  ;;  %v418_v9 = vadd.f32 %v947_v50, %v417_v5 }
  0xfd   : > { %v780_v10 = vpack.c.bf16 %v471_v1, %v471_v1  ;;  %v762_v11 = vpack.c.bf16 %v453_v2, %v453_v2  ;;  %v472_v12 = vmax.f32 %v426_v3, 0.0  ;;  %v454_v13 = vmax.f32 %v354_v4, 0.0 }
  0xfe   : > { %616 = vst.msk [vmem:[%s958_s26 + $0x28] sm:$0xf] %vm605_vm2, %v764_v6  ;;  %v778_v14 = vpack.c.bf16 %v469_v7, %v469_v7  ;;  %v765_v15 = vpack.c.bf16 %v456_v8, %v456_v8  ;;  %v470_v16 = vmax.f32 %v418_v9, 0.0 }
  0xff   : > { %632 = vst.msk [vmem:[%s958_s26 + $0x68] sm:$0xf] %vm605_vm2, %v780_v10  ;;  %614 = vst.msk [vmem:[%s958_s26 + $0x20] sm:$0xf] %vm605_vm2, %v762_v11  ;;  %v781_v17 = vpack.c.bf16 %v472_v12, %v472_v12  ;;  %v763_v18 = vpack.c.bf16 %v454_v13, %v454_v13  ;;  %v819_v19 = vpop.f32.mrb[12].mxu0 }
 0x100   : > { %630 = vst.msk [vmem:[%s958_s26 + $0x60] sm:$0xf] %vm605_vm2, %v778_v14  ;;  %617 = vst.msk [vmem:[%s958_s26 + $0x2c] sm:$0xf] %vm605_vm2, %v765_v15  ;;  %v779_v20 = vpack.c.bf16 %v470_v16, %v470_v16  ;;  %v375_v21 = vadd.f32 %v819_v19, %v947_v50  ;;  %v835_v22 = vpop.f32.mrb[12].mxu1  ;;  %v366_v23 = vpop.f32.mrb[13].mxu0 }
 0x101   : > { %633 = vst.msk [vmem:[%s958_s26 + $0x6c] sm:$0xf] %vm605_vm2, %v781_v17  ;;  %615 = vst.msk [vmem:[%s958_s26 + $0x24] sm:$0xf] %vm605_vm2, %v763_v18  ;;  %v439_v24 = vadd.f32 %v835_v22, %v947_v50  ;;  %v367_v25 = vadd.f32 %v947_v50, %v366_v23  ;;  %v430_v26 = vpop.f32.mrb[13].mxu1  ;;  %v820_v27 = vpop.f32.mrb[14].mxu0 }
 0x102   : > { %631 = vst.msk [vmem:[%s958_s26 + $0x64] sm:$0xf] %vm605_vm2, %v779_v20  ;;  %v459_v28 = vmax.f32 %v375_v21, 0.0  ;;  %v431_v29 = vadd.f32 %v947_v50, %v430_v26  ;;  %v378_v30 = vadd.f32 %v820_v27, %v947_v50  ;;  %v836_v31 = vpop.f32.mrb[14].mxu1  ;;  %v369_v32 = vpop.f32.mrb[15].mxu0 }
 0x103   : > { %v475_v33 = vmax.f32 %v439_v24, 0.0  ;;  %v457_v34 = vmax.f32 %v367_v25, 0.0  ;;  %v442_v35 = vadd.f32 %v836_v31, %v947_v50  ;;  %v370_v36 = vadd.f32 %v947_v50, %v369_v32  ;;  %v433_v37 = vpop.f32.mrb[15].mxu1 }
 0x104   : > { %v768_v38 = vpack.c.bf16 %v459_v28, %v459_v28  ;;  %v473_v39 = vmax.f32 %v431_v29, 0.0  ;;  %v460_v40 = vmax.f32 %v378_v30, 0.0  ;;  %v434_v41 = vadd.f32 %v947_v50, %v433_v37 }
 0x105   : > { %v784_v42 = vpack.c.bf16 %v475_v33, %v475_v33  ;;  %v766_v43 = vpack.c.bf16 %v457_v34, %v457_v34  ;;  %v476_v44 = vmax.f32 %v442_v35, 0.0  ;;  %v458_v45 = vmax.f32 %v370_v36, 0.0 }
 0x106   : > { %620 = vst.msk [vmem:[%s958_s26 + $0x38] sm:$0xf] %vm605_vm2, %v768_v38  ;;  %v782_v46 = vpack.c.bf16 %v473_v39, %v473_v39  ;;  %v769_v47 = vpack.c.bf16 %v460_v40, %v460_v40  ;;  %v474_v48 = vmax.f32 %v434_v41, 0.0 }
 0x107   : > { %636 = vst.msk [vmem:[%s958_s26 + $0x78] sm:$0xf] %vm605_vm2, %v784_v42  ;;  %618 = vst.msk [vmem:[%s958_s26 + $0x30] sm:$0xf] %vm605_vm2, %v766_v43  ;;  %v785_v49 = vpack.c.bf16 %v476_v44, %v476_v44  ;;  %v767_v51 = vpack.c.bf16 %v458_v45, %v458_v45 }
 0x108   : > { %634 = vst.msk [vmem:[%s958_s26 + $0x70] sm:$0xf] %vm605_vm2, %v782_v46  ;;  %621 = vst.msk [vmem:[%s958_s26 + $0x3c] sm:$0xf] %vm605_vm2, %v769_v47  ;;  %v783_v50 = vpack.c.bf16 %v474_v48, %v474_v48 }
 0x109   : > { %637 = vst.msk [vmem:[%s958_s26 + $0x7c] sm:$0xf] %vm605_vm2, %v785_v49  ;;  %619 = vst.msk [vmem:[%s958_s26 + $0x34] sm:$0xf] %vm605_vm2, %v767_v51 }
 0x10a   : > { %635 = vst.msk [vmem:[%s958_s26 + $0x74] sm:$0xf] %vm605_vm2, %v783_v50 }
 0x10b PF: > { %s13_s12 = sadd.s32 1, %s855_s12  }
 0x10c   : > { %p10_p4 = scmp.ge.s32.totalorder %s13_s12, 4  }
 0x10e   :  { %12 = sbr.rel (!%p10_p4) target bundleno = 1 (0x1), region = 62 }

// kernel: bottleneck_forward.5
= control target key start
LH: loop header
LB: loop body
LE: loop exit
PB: predicated region body
PF: predicated region fallthrough
CT: control target
= control target key end

     0   :  { %11 = vsyncpa [#allocation3], 0  ;;  %s989_s0 = inlined_call_operand.vmem [shape: bf16[128,4], index: 0, kind: input, shape index: {}]   ;;  %s990_s1 = inlined_call_operand.vmem [shape: bf16[4,16], index: 1, kind: input, shape index: {}]   ;;  %s991_s2 = inlined_call_operand.vmem [shape: f32[1,16], index: 2, kind: input, shape index: {}]   ;;  %s992_s3 = inlined_call_operand.vmem [shape: f32[128,8], index: 3, kind: input, shape index: {}]   ;;  %s993_s4 = inlined_call_operand.vmem [shape: bf16[8,16], index: 4, kind: input, shape index: {}]   ;;  %s994_s5 = inlined_call_operand.vmem [shape: f32[1,16], index: 5, kind: input, shape index: {}]   ;;  %s995_s6 = inlined_call_operand.hbm [shape: f32[128,16], index: 6, kind: output, shape index: {}]  }
   0x1   :  { %13 = vsyncpa [#allocation3 + $0x1], 0  ;;  %s841_s21 = smov 0   ;;  %s843_s22 = smov 0  }
   0x2   :  { %s845_s23 = smov 0   ;;  %s847_s24 = smov 0  }
   0x3 LB: > { %s862_s25 = sadd.s32 4294967295, %s801_s24   ;;  %s617_s26 = sadd.s32 4294967294, %s801_s24   ;;  %s801_s24 = sphi %s847_s24, %s1001_s24   ;;  %s797_s23 = sphi %s845_s23, %s1000_s23   ;;  %s793_s22 = sphi %s843_s22, %s999_s22   ;;  %s789_s21 = sphi %s841_s21, %s998_s21  }
   0x4   : > { %s866_s27 = sadd.s32 1, %s801_s24   ;;  %s162_s28 = sadd.s32 1, %s797_s23 }
   0x5   : > { %s159_s29 = ssub.s32 %s801_s24, %s866_s27  ;;  %p172_p0 = scmp.ne.s32.totalorder %s797_s23, %s793_s22 }
   0x6   : > { %p160_p1 = scmp.eq.s32.totalorder %s159_s29, 0  ;;  %p173_p2 = scmp.eq.s32.totalorder %s862_s25, 1 }
   0x7   : > { %p178_p3 = scmp.ne.s32.totalorder %s793_s22, %s789_s21  ;;  %p179_p4 = scmp.eq.s32.totalorder %s617_s26, 1 }
   0x8   : > { %s877_s30 = scalar_select %p160_p1, %s797_s23, %s162_s28  }
   0x9   : > { %p879_p5 = por %p173_p2, %p172_p0  ;;  %p883_p6 = por %p179_p4, %p178_p3 }
   0xa   : > { %p620_p7 = scmp.ge.s32.totalorder %s801_s24, 1  ;;  %p227_p8 = scmp.lt.s32.totalorder %s801_s24, 3 }
   0xc   : > { %p228_p9 = pnand %p620_p7, %p227_p8 }
   0xd   : > { %v297_v0 = vld [vmem:[%s993_s4] sm:$0xf] (!%p228_p9)  ;;  %vm311_vm0 = vcmask (!%p228_p9), 1043456   ;;  %vm420_vm1 = vcmask (!%p228_p9), 1041408   ;;  %s622_s13 = sshll.u32 (!%p228_p9), %s862_s25, 3  ;;  %vm298_vm2 = vcmask (!%p228_p9), 64512  }
   0xe   : > { %231 = sbr.rel (%p228_p9) target bundleno = 274 (0x112), region = 44  ;;  %v284_v1 = vld [vmem:[%s990_s1] sm:$0x3] (!%p228_p9)  ;;  %692 = vmatprep.subr.msk.bf16.mxu1 (!%p228_p9), %vm311_vm0, %v297_v0  ;;  %v313_v2 = vsel (!%p228_p9), %vm311_vm0, %v297_v0, 0  ;;  %p263_p10 = scmp.lt.s32.totalorder (!%p228_p9), %s622_s13, 15  ;;  %vm407_vm3 = vcmask (!%p228_p9), 31744  }
   0xf   : > { %693 = vmatprep.subr.msk.bf16.mxu0 (!%p228_p9), %vm420_vm1, %v284_v1  ;;  %v422_v3 = vsel (!%p228_p9), %vm420_vm1, %v284_v1, 0  ;;  %657 = vmatpush3.bf16.msra.mxu1 (!%p228_p9), %v313_v2  ;;  %s259_s28 = sand.u32 (!%p228_p9), 1, %s793_s22   ;;  %v630_v22 = vld [vmem:[%s991_s2] ss:$0 sm:$0xff] (!%p228_p9)  ;;  %vm520_vm4 = vcmask (!%p228_p9), 130048   ;;  %s803_s20 = smov (!%p228_p9), [#allocation2]  }
  0x10   : > { %667 = vmatpush3.bf16.msra.mxu0 (!%p228_p9), %v422_v3  ;;  %v639_v26 = vld [vmem:[%s994_s5] ss:$0 sm:$0xff] (!%p228_p9)  ;;  %s621_s12 = sshll.u32 (!%p228_p9), %s259_s28, 6 }
  0x15   : > { %s1003_s13 = smov (!%p263_p10, %s622_s13), 15 }
  0x16   : > { %s625_s14 = sshll.u32 %s1003_s13, 3  ;;  %s623_s15 = sshll.u32 %s1003_s13, 2 }
  0x17   : > { %s272_s18 = scalar_lea.vmem %s992_s3, %s625_s14  ;;  %s266_s26 = scalar_lea.vmem %s989_s0, %s623_s15 }
  0x18   : > { %v285_v4 = vld [vmem:[%s272_s18] sm:$0xff]  ;;  %v286_v5 = vld [vmem:[%s272_s18 + $0x8] sm:$0xff]  ;;  %v287_v8 = vld [vmem:[%s272_s18 + $0x10] sm:$0xff]  ;;  %s919_s13 = scalar_lea.vmem [#allocation2], %s621_s12  ;;  %s645_s14 = sshll.u32 %s862_s25, 10 }
  0x19   : > { %v293_v6 = vpack.c.bf16 %v286_v5, %v285_v4  ;;  %v735_v7 = vld [vmem:[%s266_s26] sm:$0xff]   ;;  %v288_v9 = vld [vmem:[%s272_s18 + $0x18] sm:$0xff]  ;;  %v736_v11 = vld [vmem:[%s266_s26 + $0x8] sm:$0xff]   ;;  %s543_s15 = sshll.u32 %s919_s13, 4  ;;  %s948_s25 = scalar_lea.sflag [#allocation3], %s259_s28  ;;  %s938_s15 = int_to_ptr.vmem [resolvable:$true] %s543_s15 }
  0x1a   : > { %668 = vmatprep.mubr.msk.bf16.mxu0 %vm407_vm3, %v735_v7  ;;  %v294_v10 = vpack.c.bf16 %v288_v9, %v287_v8  ;;  %v289_v12 = vld [vmem:[%s272_s18 + $0x20] sm:$0xff]  ;;  %v290_v13 = vld [vmem:[%s272_s18 + $0x28] sm:$0xff]  ;;  %v737_v15 = vld [vmem:[%s266_s26 + $0x10] sm:$0xff]   ;;  %s739_s19 = scalar_lea.vmem %s938_s15, 1024 }
  0x1b   : > { %658 = vmatprep.mubr.msk.bf16.mxu1 %vm298_vm2, %v293_v6  ;;  %v295_v14 = vpack.c.bf16 %v290_v13, %v289_v12  ;;  %669 = vmatmul.mubr.msk.bf16.vlgmr.msra.gmra.mrb[0].mxu0 %vm407_vm3, %v736_v11  ;;  %v291_v16 = vld [vmem:[%s272_s18 + $0x30] sm:$0xff]  ;;  %v292_v17 = vld [vmem:[%s272_s18 + $0x38] sm:$0xff]  ;;  %s936_s18 = scalar_lea.hbm %s995_s6, %s645_s14  ;;  %p740_p11 = scmp.ne.s32.totalorder %s938_s15, %s739_s19 }
  0x1c   : > { %659 = vmatmul.mubr.msk.bf16.vlgmr.msra.gmra.mrb[0].mxu1 %vm298_vm2, %v294_v10  ;;  %672 = vmatprep.mubr.msk.bf16.mxu0 %vm407_vm3, %v737_v15  ;;  %v296_v18 = vpack.c.bf16 %v292_v17, %v291_v16  ;;  %v738_v19 = vld [vmem:[%s266_s26 + $0x18] sm:$0xff]   ;;  %s743_s26 = sshll.u32 %s803_s20, 4  ;;  %s744_s26 = int_to_ptr.vmem [resolvable:$false] %s743_s26 }
  0x1d   : > { %662 = vmatprep.mubr.msk.bf16.mxu1 %vm298_vm2, %v295_v14  ;;  %p741_p12 = pnand %p740_p11, %p879_p5  ;;  %s745_s29 = scalar_lea.vmem %s744_s26, 2048 }
  0x1e   : > { %p746_p0 = scmp.lt.s32.totalorder %s938_s15, %s744_s26  ;;  %p747_p1 = scmp.lt.s32.totalorder %s745_s29, %s739_s19 }
  0x1f   : > { %p742_p13 = pneg %p741_p12 }
  0x20   : > { %p748_p2 = por %p747_p1, %p746_p0 }
  0x22   : > { %p749_p3 = pnand %p748_p2, %p742_p13 }
  0x23   : > { %673 = vmatmul.mubr.msk.bf16.gmra.mrb[4].mxu0 %vm407_vm3, %v738_v19 }
  0x24   : > { %663 = vmatmul.mubr.msk.bf16.gmra.mrb[4].mxu1 %vm298_vm2, %v296_v18 }
  0xee   : > { %v670_v21 = vpop.f32.mrb[0].mxu0 }
  0xef   : > { %v660_v20 = vpop.f32.mrb[0].mxu1  ;;  %v458_v25 = vpop.f32.mrb[1].mxu0 }
  0xf0   : > { %v676_v23 = vadd.f32 %v670_v21, %v660_v20  ;;  %v349_v24 = vpop.f32.mrb[1].mxu1  ;;  %v671_v29 = vpop.f32.mrb[2].mxu0 }
  0xf1   : > { %v678_v27 = vadd.f32 %v458_v25, %v349_v24  ;;  %v661_v28 = vpop.f32.mrb[2].mxu1  ;;  %v461_v33 = vpop.f32.mrb[3].mxu0 }
  0xf2   : > { %v677_v30 = vadd.f32 %v676_v23, %v630_v22  ;;  %v680_v31 = vadd.f32 %v661_v28, %v630_v22  ;;  %v352_v32 = vpop.f32.mrb[3].mxu1 }
  0xf3   : > { %v679_v34 = vadd.f32 %v678_v27, %v630_v22  ;;  %v682_v35 = vadd.f32 %v630_v22, %v352_v32 }
  0xf4   : > { %v506_v36 = vadd.f32 %v677_v30, %v639_v26  ;;  %v681_v37 = vadd.f32 %v680_v31, %v671_v29 }
  0xf5   : > { %v504_v38 = vadd.f32 %v679_v34, %v639_v26  ;;  %v683_v39 = vadd.f32 %v682_v35, %v461_v33 }
  0xf6   : > { %v514_v40 = vmax.f32 %v506_v36, 0.0  ;;  %v507_v41 = vadd.f32 %v681_v37, %v639_v26  ;;  %v674_v45 = vpop.f32.mrb[4].mxu0 }
  0xf7   : > { %v512_v42 = vmax.f32 %v504_v38, 0.0  ;;  %v505_v43 = vadd.f32 %v683_v39, %v639_v26  ;;  %v664_v44 = vpop.f32.mrb[4].mxu1  ;;  %v474_v49 = vpop.f32.mrb[5].mxu0 }
  0xf8   : > { %523 = vst.msk [vmem:[%s919_s13 + $0x10] sm:$0xff] %vm520_vm4, %v514_v40  ;;  %v515_v46 = vmax.f32 %v507_v41, 0.0  ;;  %v684_v47 = vadd.f32 %v664_v44, %v630_v22  ;;  %v365_v48 = vpop.f32.mrb[5].mxu1  ;;  %v675_v53 = vpop.f32.mrb[6].mxu0 }
  0xf9   : > { %521 = vst.msk [vmem:[%s919_s13] sm:$0xff] %vm520_vm4, %v512_v42  ;;  %v513_v50 = vmax.f32 %v505_v43, 0.0  ;;  %v686_v51 = vadd.f32 %v630_v22, %v365_v48  ;;  %v665_v52 = vpop.f32.mrb[6].mxu1  ;;  %v477_v57 = vpop.f32.mrb[7].mxu0 }
  0xfa   : > { %524 = vst.msk [vmem:[%s919_s13 + $0x18] sm:$0xff] %vm520_vm4, %v515_v46  ;;  %v685_v54 = vadd.f32 %v684_v47, %v674_v45  ;;  %v688_v55 = vadd.f32 %v665_v52, %v630_v22  ;;  %v368_v56 = vpop.f32.mrb[7].mxu1 }
  0xfb   : > { %522 = vst.msk [vmem:[%s919_s13 + $0x8] sm:$0xff] %vm520_vm4, %v513_v50  ;;  %v687_v58 = vadd.f32 %v686_v51, %v474_v49  ;;  %v690_v59 = vadd.f32 %v630_v22, %v368_v56 }
  0xfc   : > { %v510_v60 = vadd.f32 %v685_v54, %v639_v26  ;;  %v689_v61 = vadd.f32 %v688_v55, %v675_v53 }
  0xfd   : > { %v508_v62 = vadd.f32 %v687_v58, %v639_v26  ;;  %v691_v63 = vadd.f32 %v690_v59, %v477_v57 }
  0xfe   : > { %v518_v0 = vmax.f32 %v510_v60, 0.0  ;;  %v511_v1 = vadd.f32 %v689_v61, %v639_v26 }
  0xff   : > { %v516_v2 = vmax.f32 %v508_v62, 0.0  ;;  %v509_v3 = vadd.f32 %v691_v63, %v639_v26 }
 0x100   : > { %527 = vst.msk [vmem:[%s919_s13 + $0x30] sm:$0xff] %vm520_vm4, %v518_v0  ;;  %v519_v4 = vmax.f32 %v511_v1, 0.0 }
 0x101   : > { %525 = vst.msk [vmem:[%s919_s13 + $0x20] sm:$0xff] %vm520_vm4, %v516_v2  ;;  %v517_v5 = vmax.f32 %v509_v3, 0.0 }
 0x102   : > { %528 = vst.msk [vmem:[%s919_s13 + $0x38] sm:$0xff] %vm520_vm4, %v519_v4 }
 0x103   : > { %526 = vst.msk [vmem:[%s919_s13 + $0x28] sm:$0xff] %vm520_vm4, %v517_v5 }
 0x104   : > { %752 = shalt.err (!%p749_p3)
}
 0x105   : > { %s753_s28 = scalar_lea.hbm %s936_s18, 1024  ;;  %s757_s11 = scalar_lea.hbm %s995_s6, 2048 }
 0x106   : > { %p754_p4 = scmp.ne.s32.totalorder %s936_s18, %s753_s28  ;;  %p758_p9 = scmp.lt.u32.totalorder %s936_s18, %s995_s6 }
 0x107   : > { %p759_p10 = scmp.lt.u32.totalorder %s757_s11, %s753_s28  ;;  %p761_p12 = scmp.lt.u32.totalorder %s753_s28, %s936_s18 }
 0x108   : > { %p755_p7 = pnand %p754_p4, %p879_p5 }
 0x109   : > { %p760_p11 = por %p759_p10, %p758_p9 }
 0x10a   : > { %p756_p8 = pneg %p755_p7 }
 0x10b   : > { %p762_p13 = por %p761_p12, %p760_p11 }
 0x10d   : > { %p763_p0 = pnand %p762_p13, %p756_p8 }
 0x10f   : > { %766 = shalt.err (!%p763_p0)
}
 0x110   : > { %s804_s14 = smov 128   ;;  %s805_s16 = smov 8  }
 0x111   : > { %694 = dma.vmem_to_hbm [thread:$0]  (%p879_p5), %s938_s15, 1024, %s936_s18, %s948_s25, %s804_s14, %s804_s14, %s805_s16  }
 0x112 PF: > { %p700_p1 = scmp.ge.s32.totalorder %s801_s24, 2  ;;  %s558_s17 = sand.u32 1, %s789_s21  }
 0x113   : > { %s559_s19 = scalar_lea.sflag [#allocation3], %s558_s17 }
 0x114   : > { %p697_p2 = pnand %p700_p1, %p883_p6 }
 0x116   : > { %784 = dma.done.wait (!%p697_p2), %s559_s19, 1024  }
 0x117   : > { %786 = vsyncadd (!%p697_p2), %s559_s19, 4294966272  ;;  %p16_p3 = scmp.ge.s32.totalorder %s866_s27, 4   ;;  %s998_s21 = smov %s793_s22 }
 0x118   : > { %s999_s22 = smov %s797_s23  ;;  %s1000_s23 = smov %s877_s30 }
 0x119   : > { %s1001_s24 = smov %s866_s27  ;;  %18 = sbr.rel (!%p16_p3) target bundleno = 3 (0x3), region = 82 }
 0x120   :  { %564 = vsyncpa [#allocation3], 1 }
 0x121   :  { %566 = vsyncpa [#allocation3 + $0x1], 1 }

// kernel: bottleneck_forward.4
= control target key start
LH: loop header
LB: loop body
LE: loop exit
PB: predicated region body
PF: predicated region fallthrough
CT: control target
= control target key end

     0   :  { %s5472_s12 = smov 0   ;;  %s5474_s13 = smov 0   ;;  %s6194_s0 = inlined_call_operand.vmem [shape: bf16[2,18,2,9,4], index: 0, kind: input, shape index: {}]   ;;  %s6195_s1 = inlined_call_operand.vmem [shape: bf16[9,4,4], index: 1, kind: input, shape index: {}]   ;;  %s6196_s2 = inlined_call_operand.vmem [shape: f32[1,4], index: 2, kind: input, shape index: {}]   ;;  %s6197_s3 = inlined_call_operand.vmem [shape: bf16[2,8,8,4], index: 3, kind: output, shape index: {}]  }
   0x1   :  { %s5476_s14 = smov 0  }
   0x2 LB: > { %s25_s15 = sadd.s32 1, %s5444_s13  ;;  %p4554_p0 = scmp.ge.s32.totalorder %s5448_s14, 1  ;;  %s5448_s14 = sphi %s5476_s14, %s13_s14   ;;  %s5444_s13 = sphi %s5474_s13, %s6199_s13   ;;  %s5440_s12 = sphi %s5472_s12, %s6198_s12  }
   0x3   : > { %p27_p1 = scmp.ge.s32.totalorder %s25_s15, 2  ;;  %p151_p2 = scmp.lt.s32.totalorder %s5448_s14, 3 }
   0x5   : > { %s6201_s15 = smov (%p27_p1, %s25_s15), 0  ;;  %p152_p3 = pnand %p4554_p0, %p151_p2 }
   0x6   : > { %v4559_v0 = vld [vmem:[%s6195_s1 + $0x2] sm:$0x3] (!%p152_p3)  ;;  %vm213_vm0 = vcmask (!%p152_p3), 1041408   ;;  %v206_v1 = vld [vmem:[%s6195_s1] sm:$0x3] (!%p152_p3)  ;;  %v5450_v2 = vmov (!%p152_p3), 0.0  }
   0x7   : > { %155 = sbr.rel (%p152_p3) target bundleno = 522 (0x20a), region = 32  ;;  %4943 = vmatprep.subr.bf16.mxu0 (!%p152_p3), %v5450_v2  ;;  %v215_v3 = vsel (!%p152_p3), %vm213_vm0, %v4559_v0, 0  ;;  %4949 = vmatprep.subr.bf16.mxu1 (!%p152_p3), %v5450_v2  ;;  %v261_v4 = vsel (!%p152_p3), %vm213_vm0, %v206_v1, 0  ;;  %p179_p4 = scmp.lt.s32.totalorder (!%p152_p3), %s5440_s12, 1  ;;  %vm5451_vm1 = vmmov (!%p152_p3), 0   ;;  %vm209_vm2 = vcmask (!%p152_p3), 31744  }
   0x8   : > { %4944 = vmatpush3.bf16.msra.mxu0 (!%p152_p3), %v215_v3  ;;  %4950 = vmatpush3.bf16.msra.mxu1 (!%p152_p3), %v261_v4  ;;  %v4562_v5 = vld [vmem:[%s6195_s1 + $0x4] sm:$0x3] (!%p152_p3)  ;;  %v4568_v6 = vld [vmem:[%s6195_s1 + $0x6] sm:$0x3] (!%p152_p3)  ;;  %v4570_v18 = vld [vmem:[%s6195_s1 + $0x8] sm:$0x3] (!%p152_p3) }
   0x9   : > { %4945 = vmatprep.mubr.msk.bf16.mxu0 (!%p152_p3), %vm5451_vm1, %v5450_v2  ;;  %4951 = vmatprep.mubr.msk.bf16.mxu1 (!%p152_p3), %vm5451_vm1, %v5450_v2  ;;  %v321_v7 = vsel (!%p152_p3), %vm213_vm0, %v4562_v5, 0  ;;  %v380_v8 = vsel (!%p152_p3), %vm213_vm0, %v4568_v6, 0  ;;  %v4572_v19 = vld [vmem:[%s6195_s1 + $0xa] sm:$0x3] (!%p152_p3)  ;;  %v429_v23 = vsel (!%p152_p3), %vm213_vm0, %v4570_v18, 0  ;;  %vm711_vm3 = vcmask (!%p152_p3), 27648  }
   0xa   : > { %4955 = vmatprep.subr.bf16.mxu0 (!%p152_p3), %v5450_v2  ;;  %4961 = vmatprep.subr.bf16.mxu1 (!%p152_p3), %v5450_v2  ;;  %v490_v24 = vsel (!%p152_p3), %vm213_vm0, %v4572_v19, 0  ;;  %v4578_v27 = vld [vmem:[%s6195_s1 + $0xc] sm:$0x3] (!%p152_p3)  ;;  %v4580_v28 = vld [vmem:[%s6195_s1 + $0xe] sm:$0x3] (!%p152_p3) }
   0xb   : > { %v549_v33 = vsel (!%p152_p3), %vm213_vm0, %v4578_v27, 0  ;;  %v598_v34 = vsel (!%p152_p3), %vm213_vm0, %v4580_v28, 0  ;;  %v4582_v36 = vld [vmem:[%s6195_s1 + $0x10] sm:$0x3] (!%p152_p3)  ;;  %v4589_v37 = vld [vmem:[%s6195_s1 + $0x2] sm:$0x3] (!%p152_p3) }
   0xc   : > { %v659_v42 = vsel (!%p152_p3), %vm213_vm0, %v4582_v36, 0  ;;  %v731_v43 = vsel (!%p152_p3), %vm213_vm0, %v4589_v37, 0  ;;  %v725_v47 = vld [vmem:[%s6195_s1] sm:$0x3] (!%p152_p3)  ;;  %v4592_v48 = vld [vmem:[%s6195_s1 + $0x4] sm:$0x3] (!%p152_p3) }
   0xd   : > { %v777_v52 = vsel (!%p152_p3), %vm213_vm0, %v725_v47, 0  ;;  %v836_v53 = vsel (!%p152_p3), %vm213_vm0, %v4592_v48, 0  ;;  %v4598_v56 = vld [vmem:[%s6195_s1 + $0x6] sm:$0x3] (!%p152_p3)  ;;  %v4600_v57 = vld [vmem:[%s6195_s1 + $0x8] sm:$0x3] (!%p152_p3) }
   0xe   : > { %s6203_s12 = smov (!%p179_p4, %s5440_s12), 1  ;;  %v894_v61 = vsel %vm213_vm0, %v4598_v56, 0  ;;  %v942_v62 = vsel %vm213_vm0, %v4600_v57, 0  ;;  %v4602_v0 = vld [vmem:[%s6195_s1 + $0xa] sm:$0x3] }
   0xf   : > { %s5375_s24 = smul.u32 288, %s6203_s12  ;;  %v4608_v1 = vld [vmem:[%s6195_s1 + $0xc] sm:$0x3]  ;;  %v4642_v57 = vld [vmem:[%s6195_s1 + $0x10] sm:$0x3]  ;;  %s4798_s21 = sshll.u32 %s6203_s12, 5 }
  0x10   : > { %v4638_v48 = vld [vmem:[%s6195_s1 + $0xc] sm:$0x3] }
  0x11   : > { %s5518_s27 = scalar_lea.vmem %s6194_s0, %s5375_s24  ;;  %s6099_s24 = scalar_lea.vmem %s6197_s3, %s4798_s21 }
  0x12   : > { %v4558_v9 = vld [vmem:[%s5518_s27 + $0x8] sm:$0xf]  ;;  %v200_v10 = vld [vmem:[%s5518_s27] sm:$0xf]  ;;  %v201_v11 = vld [vmem:[%s5518_s27 + $0x4] sm:$0x1] }
  0x13   : > { %4946 = vmatmul.mubr.msk.bf16.vlgmr.msra.gmra.mrb[0].mxu0 %vm209_vm2, %v4558_v9  ;;  %4952 = vmatmul.mubr.msk.bf16.vlgmr.msra.gmra.mrb[0].mxu1 %vm209_vm2, %v200_v10  ;;  %v4563_v12 = vcombine.low %v200_v10, %v201_v11  ;;  %v4565_v13 = vld [vmem:[%s5518_s27 + $0x10] sm:$0xf]  ;;  %v4566_v14 = vld [vmem:[%s5518_s27 + $0x14] sm:$0x1]  ;;  %v4567_v30 = vld [vmem:[%s5518_s27 + $0x18] sm:$0xf] }
  0x14   : > { %4956 = vmatpush3.bf16.msra.mxu0 %v321_v7  ;;  %4962 = vmatpush3.bf16.msra.mxu1 %v380_v8  ;;  %v4573_v15 = vcombine.low %v4565_v13, %v4566_v14  ;;  %v4575_v31 = vld [vmem:[%s5518_s27 + $0x20] sm:$0xf]  ;;  %v4576_v32 = vld [vmem:[%s5518_s27 + $0x24] sm:$0x1]  ;;  %v4577_v39 = vld [vmem:[%s5518_s27 + $0x28] sm:$0xf] }
  0x15   : > { %v311_v16 = vshrl.u32 %v4563_v12, 16  ;;  %v313_v17 = vshll.u32 %v4563_v12, 16  ;;  %4957 = vmatprep.mubr.msk.bf16.mxu0 %vm5451_vm1, %v5450_v2  ;;  %4963 = vmatprep.mubr.msk.bf16.mxu1 %vm5451_vm1, %v5450_v2  ;;  %v4583_v35 = vcombine.low %v4575_v31, %v4576_v32  ;;  %v4586_v40 = vld [vmem:[%s5518_s27 + $0x20] sm:$0xf]  ;;  %v4587_v41 = vld [vmem:[%s5518_s27 + $0x24] sm:$0x1] }
  0x16   : > { %4967 = vmatprep.subr.bf16.mxu0 %v5450_v2  ;;  %4973 = vmatprep.subr.bf16.mxu1 %v5450_v2  ;;  %v482_v21 = vshll.u32 %v4573_v15, 16  ;;  %v480_v25 = vshrl.u32 %v4573_v15, 16  ;;  %v4593_v46 = vcombine.low %v4586_v40, %v4587_v41  ;;  %v4588_v51 = vld [vmem:[%s5518_s27 + $0x28] sm:$0xf]  ;;  %v4595_v59 = vld [vmem:[%s5518_s27 + $0x30] sm:$0xf] }
  0x17   : > { %v315_v20 = vrot.slane %v313_v17, 1  ;;  %v651_v38 = vshll.u32 %v4583_v35, 16  ;;  %v649_v44 = vshrl.u32 %v4583_v35, 16  ;;  %v4596_v60 = vld [vmem:[%s5518_s27 + $0x34] sm:$0x1]  ;;  %v1002_v7 = vsel %vm213_vm0, %v4602_v0, 0 }
  0x18   : > { %v484_v26 = vrot.slane %v482_v21, 1  ;;  %v828_v50 = vshll.u32 %v4593_v46, 16  ;;  %v826_v54 = vshrl.u32 %v4593_v46, 16  ;;  %v4603_v63 = vcombine.low %v4595_v59, %v4596_v60  ;;  %v4597_v4 = vld [vmem:[%s5518_s27 + $0x38] sm:$0xf] }
  0x19   : > { %v316_v22 = vor.u32 %v315_v20, %v311_v16  ;;  %v653_v45 = vrot.slane %v651_v38, 1  ;;  %v4605_v5 = vld [vmem:[%s5518_s27 + $0x40] sm:$0xf]  ;;  %v4606_v6 = vld [vmem:[%s5518_s27 + $0x44] sm:$0x1]  ;;  %v1060_v8 = vsel %vm213_vm0, %v4608_v1, 0 }
  0x1a   : > { %v485_v29 = vor.u32 %v484_v26, %v480_v25  ;;  %v830_v55 = vrot.slane %v828_v50, 1  ;;  %v994_v3 = vshll.u32 %v4603_v63, 16  ;;  %v992_v9 = vshrl.u32 %v4603_v63, 16  ;;  %v4610_v12 = vld [vmem:[%s6195_s1 + $0xe] sm:$0x3] }
  0x1b   : > { %4958 = vmatmul.mubr.msk.bf16.vlgmr.msra.gmra.mrb[4].mxu0 %vm209_vm2, %v316_v22  ;;  %4964 = vmatmul.mubr.msk.bf16.vlgmr.msra.gmra.mrb[4].mxu1 %vm209_vm2, %v4565_v13  ;;  %v654_v49 = vor.u32 %v653_v45, %v649_v44  ;;  %v4613_v11 = vcombine.low %v4605_v5, %v4606_v6  ;;  %v4612_v13 = vld [vmem:[%s6195_s1 + $0x10] sm:$0x3]  ;;  %v1108_v16 = vsel %vm213_vm0, %v4610_v12, 0  ;;  %v4619_v20 = vld [vmem:[%s6195_s1 + $0x2] sm:$0x3]  ;;  %v1670_v63 = vsel %vm213_vm0, %v4642_v57, 0 }
  0x1c   : > { %4968 = vmatpush3.bf16.msra.mxu0 %v429_v23  ;;  %4974 = vmatpush3.bf16.msra.mxu1 %v490_v24  ;;  %v831_v58 = vor.u32 %v830_v55, %v826_v54  ;;  %v996_v10 = vrot.slane %v994_v3, 1  ;;  %v1168_v17 = vsel %vm213_vm0, %v4612_v13, 0  ;;  %v1227_v21 = vld [vmem:[%s6195_s1] sm:$0x3]  ;;  %v4607_v23 = vld [vmem:[%s5518_s27 + $0x48] sm:$0xf] }
  0x1d   : > { %4969 = vmatprep.mubr.msk.bf16.mxu0 %vm5451_vm1, %v5450_v2  ;;  %4975 = vmatprep.mubr.msk.bf16.mxu1 %vm5451_vm1, %v5450_v2  ;;  %v1160_v15 = vshll.u32 %v4613_v11, 16  ;;  %v1158_v18 = vshrl.u32 %v4613_v11, 16  ;;  %v4616_v24 = vld [vmem:[%s5518_s27 + $0x40] sm:$0xf]  ;;  %v4617_v25 = vld [vmem:[%s5518_s27 + $0x44] sm:$0x1] }
  0x1e   : > { %4979 = vmatprep.subr.bf16.mxu0 %v5450_v2  ;;  %4985 = vmatprep.subr.bf16.mxu1 %v5450_v2  ;;  %v997_v14 = vor.u32 %v996_v10, %v992_v9  ;;  %v1233_v26 = vsel %vm213_vm0, %v4619_v20, 0  ;;  %v1279_v27 = vsel %vm213_vm0, %v1227_v21, 0  ;;  %v4623_v28 = vcombine.low %v4616_v24, %v4617_v25  ;;  %v4618_v32 = vld [vmem:[%s5518_s27 + $0x48] sm:$0xf]  ;;  %v4652_v6 = vld [vmem:[%s6195_s1 + $0x4] sm:$0x3] }
  0x1f   : > { %v1162_v19 = vrot.slane %v1160_v15, 1  ;;  %v4632_v41 = vld [vmem:[%s6195_s1 + $0xa] sm:$0x3]  ;;  %v1562_v54 = vsel %vm213_vm0, %v4638_v48, 0  ;;  %v1840_v11 = vsel %vm213_vm0, %v4652_v6, 0 }
  0x20   : > { %v1328_v37 = vshrl.u32 %v4623_v28, 16  ;;  %v1504_v45 = vsel %vm213_vm0, %v4632_v41, 0  ;;  %v4637_v60 = vld [vmem:[%s5518_s27 + $0x68] sm:$0xf]  ;;  %v4657_v25 = vld [vmem:[%s5518_s27 + $0x78] sm:$0xf] }
  0x21   : > { %v1163_v22 = vor.u32 %v1162_v19, %v1158_v18  ;;  %v4648_v9 = vld [vmem:[%s5518_s27 + $0x68] sm:$0xf]  ;;  %v4656_v18 = vld [vmem:[%s5518_s27 + $0x74] sm:$0x1]  ;;  %v4679_v41 = vld [vmem:[%s6195_s1 + $0x2] sm:$0x3] }
  0x22   : > { %v4660_v15 = vld [vmem:[%s6195_s1 + $0x8] sm:$0x3]  ;;  %v4698_v6 = vld [vmem:[%s6195_s1 + $0xc] sm:$0x3] }
  0x23   : > { %4970 = vmatmul.mubr.msk.bf16.vlgmr.msra.gmra.mrb[8].mxu0 %vm209_vm2, %v4567_v30  ;;  %4976 = vmatmul.mubr.msk.bf16.vlgmr.msra.gmra.mrb[8].mxu1 %vm209_vm2, %v485_v29  ;;  %v4622_v29 = vld [vmem:[%s6195_s1 + $0x4] sm:$0x3]  ;;  %v4628_v30 = vld [vmem:[%s6195_s1 + $0x6] sm:$0x3]  ;;  %v1946_v20 = vsel %vm213_vm0, %v4660_v15, 0 }
  0x24   : > { %4980 = vmatpush3.bf16.msra.mxu0 %v549_v33  ;;  %4986 = vmatpush3.bf16.msra.mxu1 %v598_v34  ;;  %v4625_v33 = vld [vmem:[%s5518_s27 + $0x50] sm:$0xf]  ;;  %v4626_v34 = vld [vmem:[%s5518_s27 + $0x54] sm:$0x1]  ;;  %v1338_v35 = vsel %vm213_vm0, %v4622_v29, 0  ;;  %v1396_v36 = vsel %vm213_vm0, %v4628_v30, 0 }
  0x25   : > { %4981 = vmatprep.mubr.msk.bf16.mxu0 %vm5451_vm1, %v5450_v2  ;;  %4987 = vmatprep.mubr.msk.bf16.mxu1 %vm5451_vm1, %v5450_v2  ;;  %v4702_v15 = vld [vmem:[%s6195_s1 + $0x10] sm:$0x3] }
  0x26   : > { %4991 = vmatprep.subr.bf16.mxu0 %v5450_v2  ;;  %4997 = vmatprep.subr.bf16.mxu1 %v5450_v2 }
  0x2b   : > { %4982 = vmatmul.mubr.msk.bf16.vlgmr.msra.gmra.mrb[12].mxu0 %vm209_vm2, %v4575_v31  ;;  %4988 = vmatmul.mubr.msk.bf16.vlgmr.msra.gmra.mrb[12].mxu1 %vm209_vm2, %v4577_v39  ;;  %v1330_v31 = vshll.u32 %v4623_v28, 16  ;;  %v4633_v39 = vcombine.low %v4625_v33, %v4626_v34  ;;  %v4672_v34 = vld [vmem:[%s6195_s1 + $0x10] sm:$0x3] }
  0x2c   : > { %4992 = vmatpush3.bf16.msra.mxu0 %v659_v42  ;;  %4998 = vmatpush3.bf16.msra.mxu1 %v731_v43 }
  0x2d   : > { %4993 = vmatprep.mubr.msk.bf16.mxu0 %vm5451_vm1, %v5450_v2  ;;  %4999 = vmatprep.mubr.msk.bf16.mxu1 %vm5451_vm1, %v5450_v2  ;;  %v1332_v38 = vrot.slane %v1330_v31, 1  ;;  %v1496_v43 = vshll.u32 %v4633_v39, 16  ;;  %v1494_v46 = vshrl.u32 %v4633_v39, 16 }
  0x2e   : > { %5003 = vmatprep.subr.bf16.mxu0 %v5450_v2  ;;  %5009 = vmatprep.subr.bf16.mxu1 %v5450_v2 }
  0x2f   : > { %v1333_v42 = vor.u32 %v1332_v38, %v1328_v37  ;;  %v1498_v47 = vrot.slane %v1496_v43, 1  ;;  %v2172_v38 = vsel %vm213_vm0, %v4672_v34, 0 }
  0x31   : > { %v1499_v50 = vor.u32 %v1498_v47, %v1494_v46  ;;  %v4677_v46 = vld [vmem:[%s5518_s27 + $0x84] sm:$0x1]  ;;  %v2237_v47 = vsel %vm213_vm0, %v4679_v41, 0 }
  0x33   : > { %4994 = vmatmul.mubr.msk.bf16.vlgmr.msra.gmra.mrb[16].mxu0 %vm209_vm2, %v654_v49  ;;  %5000 = vmatmul.mubr.msk.bf16.vlgmr.msra.gmra.mrb[16].mxu1 %vm209_vm2, %v4588_v51  ;;  %v4640_v49 = vld [vmem:[%s6195_s1 + $0xe] sm:$0x3]  ;;  %v4627_v51 = vld [vmem:[%s5518_s27 + $0x58] sm:$0xf] }
  0x34   : > { %5004 = vmatpush3.bf16.msra.mxu0 %v777_v52  ;;  %5010 = vmatpush3.bf16.msra.mxu1 %v836_v53  ;;  %v4635_v52 = vld [vmem:[%s5518_s27 + $0x60] sm:$0xf]  ;;  %v4636_v53 = vld [vmem:[%s5518_s27 + $0x64] sm:$0x1]  ;;  %v1610_v55 = vsel %vm213_vm0, %v4640_v49, 0 }
  0x35   : > { %5005 = vmatprep.mubr.msk.bf16.mxu0 %vm5451_vm1, %v5450_v2  ;;  %5011 = vmatprep.mubr.msk.bf16.mxu1 %vm5451_vm1, %v5450_v2  ;;  %v4643_v56 = vcombine.low %v4635_v52, %v4636_v53  ;;  %v4678_v53 = vld [vmem:[%s5518_s27 + $0x88] sm:$0xf] }
  0x36   : > { %5015 = vmatprep.subr.bf16.mxu0 %v5450_v2  ;;  %5021 = vmatprep.subr.bf16.mxu1 %v5450_v2 }
  0x37   : > { %v1660_v1 = vshrl.u32 %v4643_v56, 16 }
  0x3b   : > { %5006 = vmatmul.mubr.msk.bf16.vlgmr.msra.gmra.mrb[20].mxu0 %vm209_vm2, %v4586_v40  ;;  %5012 = vmatmul.mubr.msk.bf16.vlgmr.msra.gmra.mrb[20].mxu1 %vm209_vm2, %v831_v58  ;;  %v4630_v40 = vld [vmem:[%s6195_s1 + $0x8] sm:$0x3]  ;;  %v4649_v58 = vld [vmem:[%s6195_s1 + $0x2] sm:$0x3] }
  0x3c   : > { %5016 = vmatpush3.bf16.msra.mxu0 %v894_v61  ;;  %5022 = vmatpush3.bf16.msra.mxu1 %v942_v62  ;;  %v1444_v44 = vsel %vm213_vm0, %v4630_v40, 0  ;;  %v4646_v61 = vld [vmem:[%s5518_s27 + $0x60] sm:$0xf]  ;;  %v4647_v62 = vld [vmem:[%s5518_s27 + $0x64] sm:$0x1]  ;;  %v1735_v0 = vsel %vm213_vm0, %v4649_v58, 0 }
  0x3d   : > { %5017 = vmatprep.mubr.msk.bf16.mxu0 %vm5451_vm1, %v5450_v2  ;;  %5023 = vmatprep.mubr.msk.bf16.mxu1 %vm5451_vm1, %v5450_v2 }
  0x3e   : > { %5027 = vmatprep.subr.bf16.mxu0 %v5450_v2  ;;  %5033 = vmatprep.subr.bf16.mxu1 %v5450_v2 }
  0x43   : > { %5018 = vmatmul.mubr.msk.bf16.vlgmr.msra.gmra.mrb[24].mxu0 %vm209_vm2, %v4595_v59  ;;  %5024 = vmatmul.mubr.msk.bf16.vlgmr.msra.gmra.mrb[24].mxu1 %vm209_vm2, %v4597_v4  ;;  %v1662_v59 = vshll.u32 %v4643_v56, 16  ;;  %v4653_v4 = vcombine.low %v4646_v61, %v4647_v62  ;;  %v4692_v62 = vld [vmem:[%s6195_s1 + $0xa] sm:$0x3] }
  0x44   : > { %5028 = vmatpush3.bf16.msra.mxu0 %v1002_v7  ;;  %5034 = vmatpush3.bf16.msra.mxu1 %v1060_v8 }
  0x45   : > { %5029 = vmatprep.mubr.msk.bf16.mxu0 %vm5451_vm1, %v5450_v2  ;;  %5035 = vmatprep.mubr.msk.bf16.mxu1 %vm5451_vm1, %v5450_v2  ;;  %v1664_v3 = vrot.slane %v1662_v59, 1  ;;  %v1832_v8 = vshll.u32 %v4653_v4, 16  ;;  %v1830_v12 = vshrl.u32 %v4653_v4, 16 }
  0x46   : > { %5039 = vmatprep.subr.bf16.mxu0 %v5450_v2  ;;  %5045 = vmatprep.subr.bf16.mxu1 %v5450_v2 }
  0x47   : > { %v1665_v7 = vor.u32 %v1664_v3, %v1660_v1  ;;  %v1834_v13 = vrot.slane %v1832_v8, 1  ;;  %v2508_v3 = vsel %vm213_vm0, %v4692_v62, 0  ;;  %v4739_v62 = vld [vmem:[%s6195_s1 + $0x2] sm:$0x3] }
  0x4b   : > { %5030 = vmatmul.mubr.msk.bf16.vlgmr.msra.gmra.mrb[28].mxu0 %vm209_vm2, %v997_v14  ;;  %5036 = vmatmul.mubr.msk.bf16.vlgmr.msra.gmra.mrb[28].mxu1 %vm209_vm2, %v4605_v5  ;;  %v1729_v5 = vld [vmem:[%s6195_s1] sm:$0x3]  ;;  %v4658_v14 = vld [vmem:[%s6195_s1 + $0x6] sm:$0x3] }
  0x4c   : > { %5040 = vmatpush3.bf16.msra.mxu0 %v1108_v16  ;;  %5046 = vmatpush3.bf16.msra.mxu1 %v1168_v17  ;;  %v1781_v10 = vsel %vm213_vm0, %v1729_v5, 0  ;;  %v1835_v16 = vor.u32 %v1834_v13, %v1830_v12  ;;  %v4655_v17 = vld [vmem:[%s5518_s27 + $0x70] sm:$0xf]  ;;  %v1898_v19 = vsel %vm213_vm0, %v4658_v14, 0  ;;  %v2566_v12 = vsel %vm213_vm0, %v4698_v6, 0 }
  0x4d   : > { %5041 = vmatprep.mubr.msk.bf16.mxu0 %vm5451_vm1, %v5450_v2  ;;  %5047 = vmatprep.mubr.msk.bf16.mxu1 %vm5451_vm1, %v5450_v2  ;;  %v4663_v21 = vcombine.low %v4655_v17, %v4656_v18  ;;  %v4697_v18 = vld [vmem:[%s5518_s27 + $0xa8] sm:$0xf] }
  0x4e   : > { %5051 = vmatprep.subr.bf16.mxu0 %v5450_v2  ;;  %5057 = vmatprep.subr.bf16.mxu1 %v5450_v2 }
  0x4f   : > { %v1996_v30 = vshrl.u32 %v4663_v21, 16 }
  0x53   : > { %5042 = vmatmul.mubr.msk.bf16.vlgmr.msra.gmra.mrb[32].mxu0 %vm209_vm2, %v4607_v23  ;;  %5048 = vmatmul.mubr.msk.bf16.vlgmr.msra.gmra.mrb[32].mxu1 %vm209_vm2, %v1163_v22  ;;  %v4662_v22 = vld [vmem:[%s6195_s1 + $0xa] sm:$0x3]  ;;  %v4668_v23 = vld [vmem:[%s6195_s1 + $0xc] sm:$0x3] }
  0x54   : > { %5052 = vmatpush3.bf16.msra.mxu0 %v1233_v26  ;;  %5058 = vmatpush3.bf16.msra.mxu1 %v1279_v27  ;;  %v4665_v26 = vld [vmem:[%s5518_s27 + $0x80] sm:$0xf]  ;;  %v4666_v27 = vld [vmem:[%s5518_s27 + $0x84] sm:$0x1]  ;;  %v2006_v28 = vsel %vm213_vm0, %v4662_v22, 0  ;;  %v2064_v29 = vsel %vm213_vm0, %v4668_v23, 0 }
  0x55   : > { %5053 = vmatprep.mubr.msk.bf16.mxu0 %vm5451_vm1, %v5450_v2  ;;  %5059 = vmatprep.mubr.msk.bf16.mxu1 %vm5451_vm1, %v5450_v2 }
  0x56   : > { %5063 = vmatprep.subr.bf16.mxu0 %v5450_v2  ;;  %5069 = vmatprep.subr.bf16.mxu1 %v5450_v2 }
  0x5b   : > { %5054 = vmatmul.mubr.msk.bf16.vlgmr.msra.gmra.mrb[36].mxu0 %vm209_vm2, %v4618_v32  ;;  %5060 = vmatmul.mubr.msk.bf16.vlgmr.msra.gmra.mrb[36].mxu1 %vm209_vm2, %v4616_v24  ;;  %v1998_v24 = vshll.u32 %v4663_v21, 16  ;;  %v4673_v32 = vcombine.low %v4665_v26, %v4666_v27  ;;  %v2674_v21 = vsel %vm213_vm0, %v4702_v15, 0  ;;  %v4712_v27 = vld [vmem:[%s6195_s1 + $0x4] sm:$0x3]  ;;  %v4738_v15 = vld [vmem:[%s5518_s27 + $0xc8] sm:$0xf] }
  0x5c   : > { %5064 = vmatpush3.bf16.msra.mxu0 %v1338_v35  ;;  %5070 = vmatpush3.bf16.msra.mxu1 %v1396_v36 }
  0x5d   : > { %5065 = vmatprep.mubr.msk.bf16.mxu0 %vm5451_vm1, %v5450_v2  ;;  %5071 = vmatprep.mubr.msk.bf16.mxu1 %vm5451_vm1, %v5450_v2  ;;  %v2000_v31 = vrot.slane %v1998_v24, 1  ;;  %v2164_v36 = vshll.u32 %v4673_v32, 16  ;;  %v2162_v39 = vshrl.u32 %v4673_v32, 16  ;;  %v2844_v32 = vsel %vm213_vm0, %v4712_v27, 0 }
  0x5e   : > { %5075 = vmatprep.subr.bf16.mxu0 %v5450_v2  ;;  %5081 = vmatprep.subr.bf16.mxu1 %v5450_v2 }
  0x5f   : > { %v2001_v35 = vor.u32 %v2000_v31, %v1996_v30  ;;  %v2166_v40 = vrot.slane %v2164_v36, 1  ;;  %v4708_v30 = vld [vmem:[%s5518_s27 + $0xa8] sm:$0xf] }
  0x60   : > { %v4720_v36 = vld [vmem:[%s6195_s1 + $0x8] sm:$0x3] }
  0x61   : > { %v2167_v43 = vor.u32 %v2166_v40, %v2162_v39  ;;  %v4716_v39 = vld [vmem:[%s5518_s27 + $0xb4] sm:$0x1]  ;;  %v2950_v41 = vsel %vm213_vm0, %v4720_v36, 0 }
  0x63   : > { %5066 = vmatmul.mubr.msk.bf16.vlgmr.msra.gmra.mrb[40].mxu0 %vm209_vm2, %v1333_v42  ;;  %5072 = vmatmul.mubr.msk.bf16.vlgmr.msra.gmra.mrb[40].mxu1 %vm209_vm2, %v4625_v33  ;;  %v4670_v33 = vld [vmem:[%s6195_s1 + $0xe] sm:$0x3]  ;;  %v2231_v42 = vld [vmem:[%s6195_s1] sm:$0x3] }
  0x64   : > { %5076 = vmatpush3.bf16.msra.mxu0 %v1444_v44  ;;  %5082 = vmatpush3.bf16.msra.mxu1 %v1504_v45  ;;  %v2112_v37 = vsel %vm213_vm0, %v4670_v33, 0  ;;  %v4667_v44 = vld [vmem:[%s5518_s27 + $0x88] sm:$0xf]  ;;  %v4676_v45 = vld [vmem:[%s5518_s27 + $0x80] sm:$0xf]  ;;  %v2283_v48 = vsel %vm213_vm0, %v2231_v42, 0 }
  0x65   : > { %5077 = vmatprep.mubr.msk.bf16.mxu0 %vm5451_vm1, %v5450_v2  ;;  %5083 = vmatprep.mubr.msk.bf16.mxu1 %vm5451_vm1, %v5450_v2  ;;  %v4683_v49 = vcombine.low %v4676_v45, %v4677_v46  ;;  %v4717_v46 = vld [vmem:[%s5518_s27 + $0xb8] sm:$0xf] }
  0x66   : > { %5087 = vmatprep.subr.bf16.mxu0 %v5450_v2  ;;  %5093 = vmatprep.subr.bf16.mxu1 %v5450_v2 }
  0x67   : > { %v2332_v58 = vshrl.u32 %v4683_v49, 16 }
  0x6b   : > { %5078 = vmatmul.mubr.msk.bf16.vlgmr.msra.gmra.mrb[44].mxu0 %vm209_vm2, %v4627_v51  ;;  %5084 = vmatmul.mubr.msk.bf16.vlgmr.msra.gmra.mrb[44].mxu1 %vm209_vm2, %v1499_v50  ;;  %v4682_v50 = vld [vmem:[%s6195_s1 + $0x4] sm:$0x3]  ;;  %v4688_v51 = vld [vmem:[%s6195_s1 + $0x6] sm:$0x3] }
  0x6c   : > { %5088 = vmatpush3.bf16.msra.mxu0 %v1562_v54  ;;  %5094 = vmatpush3.bf16.msra.mxu1 %v1610_v55  ;;  %v4685_v54 = vld [vmem:[%s5518_s27 + $0x90] sm:$0xf]  ;;  %v4686_v55 = vld [vmem:[%s5518_s27 + $0x94] sm:$0x1]  ;;  %v2342_v56 = vsel %vm213_vm0, %v4682_v50, 0  ;;  %v2400_v57 = vsel %vm213_vm0, %v4688_v51, 0 }
  0x6d   : > { %5089 = vmatprep.mubr.msk.bf16.mxu0 %vm5451_vm1, %v5450_v2  ;;  %5095 = vmatprep.mubr.msk.bf16.mxu1 %vm5451_vm1, %v5450_v2 }
  0x6e   : > { %5099 = vmatprep.subr.bf16.mxu0 %v5450_v2  ;;  %5105 = vmatprep.subr.bf16.mxu1 %v5450_v2 }
  0x73   : > { %5090 = vmatmul.mubr.msk.bf16.vlgmr.msra.gmra.mrb[48].mxu0 %vm209_vm2, %v4635_v52  ;;  %5096 = vmatmul.mubr.msk.bf16.vlgmr.msra.gmra.mrb[48].mxu1 %vm209_vm2, %v4637_v60  ;;  %v2334_v52 = vshll.u32 %v4683_v49, 16  ;;  %v4693_v60 = vcombine.low %v4685_v54, %v4686_v55  ;;  %v4732_v55 = vld [vmem:[%s6195_s1 + $0x10] sm:$0x3] }
  0x74   : > { %5100 = vmatpush3.bf16.msra.mxu0 %v1670_v63  ;;  %5106 = vmatpush3.bf16.msra.mxu1 %v1735_v0 }
  0x75   : > { %5101 = vmatprep.mubr.msk.bf16.mxu0 %vm5451_vm1, %v5450_v2  ;;  %5107 = vmatprep.mubr.msk.bf16.mxu1 %vm5451_vm1, %v5450_v2  ;;  %v2336_v59 = vrot.slane %v2334_v52, 1  ;;  %v2500_v0 = vshll.u32 %v4693_v60, 16  ;;  %v2498_v4 = vshrl.u32 %v4693_v60, 16 }
  0x76   : > { %5111 = vmatprep.subr.bf16.mxu0 %v5450_v2  ;;  %5117 = vmatprep.subr.bf16.mxu1 %v5450_v2 }
  0x77   : > { %v2337_v63 = vor.u32 %v2336_v59, %v2332_v58  ;;  %v2502_v5 = vrot.slane %v2500_v0, 1  ;;  %v3176_v59 = vsel %vm213_vm0, %v4732_v55, 0 }
  0x79   : > { %v2503_v8 = vor.u32 %v2502_v5, %v2498_v4  ;;  %v4737_v4 = vld [vmem:[%s5518_s27 + $0xc4] sm:$0x1]  ;;  %v3241_v5 = vsel %vm213_vm0, %v4739_v62, 0 }
  0x7b   : > { %5102 = vmatmul.mubr.msk.bf16.vlgmr.msra.gmra.mrb[52].mxu0 %vm209_vm2, %v1665_v7  ;;  %5108 = vmatmul.mubr.msk.bf16.vlgmr.msra.gmra.mrb[52].mxu1 %vm209_vm2, %v4648_v9  ;;  %v4700_v7 = vld [vmem:[%s6195_s1 + $0xe] sm:$0x3]  ;;  %v4687_v9 = vld [vmem:[%s5518_s27 + $0x98] sm:$0xf] }
  0x7c   : > { %5112 = vmatpush3.bf16.msra.mxu0 %v1781_v10  ;;  %5118 = vmatpush3.bf16.msra.mxu1 %v1840_v11  ;;  %v4695_v10 = vld [vmem:[%s5518_s27 + $0xa0] sm:$0xf]  ;;  %v4696_v11 = vld [vmem:[%s5518_s27 + $0xa4] sm:$0x1]  ;;  %v2614_v13 = vsel %vm213_vm0, %v4700_v7, 0 }
  0x7d   : > { %5113 = vmatprep.mubr.msk.bf16.mxu0 %vm5451_vm1, %v5450_v2  ;;  %5119 = vmatprep.mubr.msk.bf16.mxu1 %vm5451_vm1, %v5450_v2  ;;  %v4703_v14 = vcombine.low %v4695_v10, %v4696_v11  ;;  %v4748_v11 = vld [vmem:[%s6195_s1 + $0x6] sm:$0x3] }
  0x7e   : > { %5123 = vmatprep.subr.bf16.mxu0 %v5450_v2  ;;  %5129 = vmatprep.subr.bf16.mxu1 %v5450_v2 }
  0x7f   : > { %v2664_v23 = vshrl.u32 %v4703_v14, 16 }
  0x83   : > { %5114 = vmatmul.mubr.msk.bf16.vlgmr.msra.gmra.mrb[56].mxu0 %vm209_vm2, %v4646_v61  ;;  %5120 = vmatmul.mubr.msk.bf16.vlgmr.msra.gmra.mrb[56].mxu1 %vm209_vm2, %v1835_v16  ;;  %v4690_v61 = vld [vmem:[%s6195_s1 + $0x8] sm:$0x3]  ;;  %v4709_v16 = vld [vmem:[%s6195_s1 + $0x2] sm:$0x3] }
  0x84   : > { %5124 = vmatpush3.bf16.msra.mxu0 %v1898_v19  ;;  %5130 = vmatpush3.bf16.msra.mxu1 %v1946_v20  ;;  %v2448_v1 = vsel %vm213_vm0, %v4690_v61, 0  ;;  %v4706_v19 = vld [vmem:[%s5518_s27 + $0xa0] sm:$0xf]  ;;  %v4707_v20 = vld [vmem:[%s5518_s27 + $0xa4] sm:$0x1]  ;;  %v2739_v22 = vsel %vm213_vm0, %v4709_v16, 0 }
  0x85   : > { %5125 = vmatprep.mubr.msk.bf16.mxu0 %vm5451_vm1, %v5450_v2  ;;  %5131 = vmatprep.mubr.msk.bf16.mxu1 %vm5451_vm1, %v5450_v2 }
  0x86   : > { %5135 = vmatprep.subr.bf16.mxu0 %v5450_v2  ;;  %5141 = vmatprep.subr.bf16.mxu1 %v5450_v2 }
  0x8b   : > { %5126 = vmatmul.mubr.msk.bf16.vlgmr.msra.gmra.mrb[60].mxu0 %vm209_vm2, %v4655_v17  ;;  %5132 = vmatmul.mubr.msk.bf16.vlgmr.msra.gmra.mrb[60].mxu1 %vm209_vm2, %v4657_v25  ;;  %v2666_v17 = vshll.u32 %v4703_v14, 16  ;;  %v4713_v25 = vcombine.low %v4706_v19, %v4707_v20  ;;  %v4746_v20 = vld [vmem:[%s5518_s27 + $0xd4] sm:$0x1] }
  0x8c   : > { %5136 = vmatpush3.bf16.msra.mxu0 %v2006_v28  ;;  %5142 = vmatpush3.bf16.msra.mxu1 %v2064_v29 }
  0x8d   : > { %5137 = vmatprep.mubr.msk.bf16.mxu0 %vm5451_vm1, %v5450_v2  ;;  %5143 = vmatprep.mubr.msk.bf16.mxu1 %vm5451_vm1, %v5450_v2  ;;  %v2668_v24 = vrot.slane %v2666_v17, 1  ;;  %v2836_v29 = vshll.u32 %v4713_v25, 16  ;;  %v2834_v33 = vshrl.u32 %v4713_v25, 16 }
  0x8e   : > { %5147 = vmatprep.subr.bf16.mxu0 %v5450_v2  ;;  %5153 = vmatprep.subr.bf16.mxu1 %v5450_v2 }
  0x8f   : > { %v2669_v28 = vor.u32 %v2668_v24, %v2664_v23  ;;  %v2838_v34 = vrot.slane %v2836_v29, 1  ;;  %v3404_v24 = vsel %vm213_vm0, %v4748_v11, 0 }
  0x93   : > { %5138 = vmatmul.mubr.msk.bf16.vlgmr.msra.gmra.mrb[64].mxu0 %vm209_vm2, %v2001_v35  ;;  %5144 = vmatmul.mubr.msk.bf16.vlgmr.msra.gmra.mrb[64].mxu1 %vm209_vm2, %v4665_v26  ;;  %v2733_v26 = vld [vmem:[%s6195_s1] sm:$0x3]  ;;  %v4718_v35 = vld [vmem:[%s6195_s1 + $0x6] sm:$0x3] }
  0x94   : > { %5148 = vmatpush3.bf16.msra.mxu0 %v2112_v37  ;;  %5154 = vmatpush3.bf16.msra.mxu1 %v2172_v38  ;;  %v2785_v31 = vsel %vm213_vm0, %v2733_v26, 0  ;;  %v2839_v37 = vor.u32 %v2838_v34, %v2834_v33  ;;  %v4715_v38 = vld [vmem:[%s5518_s27 + $0xb0] sm:$0xf]  ;;  %v2902_v40 = vsel %vm213_vm0, %v4718_v35, 0 }
  0x95   : > { %5149 = vmatprep.mubr.msk.bf16.mxu0 %vm5451_vm1, %v5450_v2  ;;  %5155 = vmatprep.mubr.msk.bf16.mxu1 %vm5451_vm1, %v5450_v2  ;;  %v4723_v42 = vcombine.low %v4715_v38, %v4716_v39 }
  0x96   : > { %5159 = vmatprep.subr.bf16.mxu0 %v5450_v2  ;;  %5165 = vmatprep.subr.bf16.mxu1 %v5450_v2 }
  0x97   : > { %v3000_v51 = vshrl.u32 %v4723_v42, 16 }
  0x9b   : > { %5150 = vmatmul.mubr.msk.bf16.vlgmr.msra.gmra.mrb[68].mxu0 %vm209_vm2, %v4667_v44  ;;  %5156 = vmatmul.mubr.msk.bf16.vlgmr.msra.gmra.mrb[68].mxu1 %vm209_vm2, %v2167_v43  ;;  %v4722_v43 = vld [vmem:[%s6195_s1 + $0xa] sm:$0x3]  ;;  %v4728_v44 = vld [vmem:[%s6195_s1 + $0xc] sm:$0x3] }
  0x9c   : > { %5160 = vmatpush3.bf16.msra.mxu0 %v2237_v47  ;;  %5166 = vmatpush3.bf16.msra.mxu1 %v2283_v48  ;;  %v4725_v47 = vld [vmem:[%s5518_s27 + $0xc0] sm:$0xf]  ;;  %v4726_v48 = vld [vmem:[%s5518_s27 + $0xc4] sm:$0x1]  ;;  %v3010_v49 = vsel %vm213_vm0, %v4722_v43, 0  ;;  %v3068_v50 = vsel %vm213_vm0, %v4728_v44, 0 }
  0x9d   : > { %5161 = vmatprep.mubr.msk.bf16.mxu0 %vm5451_vm1, %v5450_v2  ;;  %5167 = vmatprep.mubr.msk.bf16.mxu1 %vm5451_vm1, %v5450_v2 }
  0x9e   : > { %5171 = vmatprep.subr.bf16.mxu0 %v5450_v2  ;;  %5177 = vmatprep.subr.bf16.mxu1 %v5450_v2 }
  0xa3   : > { %5162 = vmatmul.mubr.msk.bf16.vlgmr.msra.gmra.mrb[72].mxu0 %vm209_vm2, %v4678_v53  ;;  %5168 = vmatmul.mubr.msk.bf16.vlgmr.msra.gmra.mrb[72].mxu1 %vm209_vm2, %v4676_v45  ;;  %v3002_v45 = vshll.u32 %v4723_v42, 16  ;;  %v4733_v53 = vcombine.low %v4725_v47, %v4726_v48  ;;  %v4758_v48 = vld [vmem:[%s6195_s1 + $0xc] sm:$0x3] }
  0xa4   : > { %5172 = vmatpush3.bf16.msra.mxu0 %v2342_v56  ;;  %5178 = vmatpush3.bf16.msra.mxu1 %v2400_v57  ;;  %v3570_v62 = vsel %vm213_vm0, %v4758_v48, 0  ;;  %v4780_v48 = vld [vmem:[%s6195_s1 + $0x8] sm:$0x3] }
  0xa5   : > { %5173 = vmatprep.mubr.msk.bf16.mxu0 %vm5451_vm1, %v5450_v2  ;;  %5179 = vmatprep.mubr.msk.bf16.mxu1 %vm5451_vm1, %v5450_v2  ;;  %v3004_v52 = vrot.slane %v3002_v45, 1  ;;  %v3168_v57 = vshll.u32 %v4733_v53, 16  ;;  %v3166_v60 = vshrl.u32 %v4733_v53, 16 }
  0xa6   : > { %5183 = vmatprep.subr.bf16.mxu0 %v5450_v2  ;;  %5189 = vmatprep.subr.bf16.mxu1 %v5450_v2 }
  0xa7   : > { %v3005_v56 = vor.u32 %v3004_v52, %v3000_v51  ;;  %v3170_v61 = vrot.slane %v3168_v57, 1  ;;  %v4755_v57 = vld [vmem:[%s5518_s27 + $0xe0] sm:$0xf] }
  0xa9   : > { %v3171_v0 = vor.u32 %v3170_v61, %v3166_v60 }
  0xab   : > { %5174 = vmatmul.mubr.msk.bf16.vlgmr.msra.gmra.mrb[76].mxu0 %vm209_vm2, %v2337_v63  ;;  %5180 = vmatmul.mubr.msk.bf16.vlgmr.msra.gmra.mrb[76].mxu1 %vm209_vm2, %v4685_v54  ;;  %v4730_v54 = vld [vmem:[%s6195_s1 + $0xe] sm:$0x3]  ;;  %v3235_v63 = vld [vmem:[%s6195_s1] sm:$0x3] }
  0xac   : > { %5184 = vmatpush3.bf16.msra.mxu0 %v2448_v1  ;;  %5190 = vmatpush3.bf16.msra.mxu1 %v2508_v3  ;;  %v3116_v58 = vsel %vm213_vm0, %v4730_v54, 0  ;;  %v4727_v1 = vld [vmem:[%s5518_s27 + $0xc8] sm:$0xf]  ;;  %v4736_v3 = vld [vmem:[%s5518_s27 + $0xc0] sm:$0xf]  ;;  %v3287_v6 = vsel %vm213_vm0, %v3235_v63, 0 }
  0xad   : > { %5185 = vmatprep.mubr.msk.bf16.mxu0 %vm5451_vm1, %v5450_v2  ;;  %5191 = vmatprep.mubr.msk.bf16.mxu1 %vm5451_vm1, %v5450_v2  ;;  %v4743_v7 = vcombine.low %v4736_v3, %v4737_v4  ;;  %v4747_v54 = vld [vmem:[%s5518_s27 + $0xd8] sm:$0xf]  ;;  %v4762_v4 = vld [vmem:[%s6195_s1 + $0x10] sm:$0x3] }
  0xae   : > { %5195 = vmatprep.subr.bf16.mxu0 %v5450_v2  ;;  %5201 = vmatprep.subr.bf16.mxu1 %v5450_v2 }
  0xaf   : > { %v3338_v16 = vshll.u32 %v4743_v7, 16  ;;  %v3336_v25 = vshrl.u32 %v4743_v7, 16 }
  0xb1   : > { %v3340_v26 = vrot.slane %v3338_v16, 1 }
  0xb3   : > { %5186 = vmatmul.mubr.msk.bf16.vlgmr.msra.gmra.mrb[80].mxu0 %vm209_vm2, %v4687_v9  ;;  %5192 = vmatmul.mubr.msk.bf16.vlgmr.msra.gmra.mrb[80].mxu1 %vm209_vm2, %v2503_v8 }
  0xb4   : > { %5196 = vmatpush3.bf16.msra.mxu0 %v2566_v12  ;;  %5202 = vmatpush3.bf16.msra.mxu1 %v2614_v13 }
  0xb5   : > { %5197 = vmatprep.mubr.msk.bf16.mxu0 %vm5451_vm1, %v5450_v2  ;;  %5203 = vmatprep.mubr.msk.bf16.mxu1 %vm5451_vm1, %v5450_v2 }
  0xb6   : > { %5207 = vmatprep.subr.bf16.mxu0 %v5450_v2  ;;  %5213 = vmatprep.subr.bf16.mxu1 %v5450_v2 }
  0xbb   : > { %5198 = vmatmul.mubr.msk.bf16.vlgmr.msra.gmra.mrb[84].mxu0 %vm209_vm2, %v4695_v10  ;;  %5204 = vmatmul.mubr.msk.bf16.vlgmr.msra.gmra.mrb[84].mxu1 %vm209_vm2, %v4697_v18  ;;  %v4742_v10 = vld [vmem:[%s6195_s1 + $0x4] sm:$0x3] }
  0xbc   : > { %5208 = vmatpush3.bf16.msra.mxu0 %v2674_v21  ;;  %5214 = vmatpush3.bf16.msra.mxu1 %v2739_v22  ;;  %v3346_v23 = vsel %vm213_vm0, %v4742_v10, 0  ;;  %v4757_v10 = vld [vmem:[%s5518_s27 + $0xe8] sm:$0xf] }
  0xbd   : > { %5209 = vmatprep.mubr.msk.bf16.mxu0 %vm5451_vm1, %v5450_v2  ;;  %5215 = vmatprep.mubr.msk.bf16.mxu1 %vm5451_vm1, %v5450_v2 }
  0xbe   : > { %5219 = vmatprep.subr.bf16.mxu0 %v5450_v2  ;;  %5225 = vmatprep.subr.bf16.mxu1 %v5450_v2 }
  0xc3   : > { %5210 = vmatmul.mubr.msk.bf16.vlgmr.msra.gmra.mrb[88].mxu0 %vm209_vm2, %v2669_v28  ;;  %5216 = vmatmul.mubr.msk.bf16.vlgmr.msra.gmra.mrb[88].mxu1 %vm209_vm2, %v4708_v30  ;;  %v4750_v30 = vld [vmem:[%s6195_s1 + $0x8] sm:$0x3] }
  0xc4   : > { %5220 = vmatpush3.bf16.msra.mxu0 %v2785_v31  ;;  %5226 = vmatpush3.bf16.msra.mxu1 %v2844_v32  ;;  %v4752_v31 = vld [vmem:[%s6195_s1 + $0xa] sm:$0x3]  ;;  %v3341_v32 = vor.u32 %v3340_v26, %v3336_v25  ;;  %v3452_v42 = vsel %vm213_vm0, %v4750_v30, 0  ;;  %v3737_v26 = vld [vmem:[%s6195_s1] sm:$0x3] }
  0xc5   : > { %5221 = vmatprep.mubr.msk.bf16.mxu0 %vm5451_vm1, %v5450_v2  ;;  %5227 = vmatprep.mubr.msk.bf16.mxu1 %vm5451_vm1, %v5450_v2  ;;  %v3512_v43 = vsel %vm213_vm0, %v4752_v31, 0 }
  0xc6   : > { %5231 = vmatprep.subr.bf16.mxu0 %v5450_v2  ;;  %5237 = vmatprep.subr.bf16.mxu1 %v5450_v2 }
  0xcb   : > { %5222 = vmatmul.mubr.msk.bf16.vlgmr.msra.gmra.mrb[92].mxu0 %vm209_vm2, %v4706_v19  ;;  %5228 = vmatmul.mubr.msk.bf16.vlgmr.msra.gmra.mrb[92].mxu1 %vm209_vm2, %v2839_v37  ;;  %v4745_v19 = vld [vmem:[%s5518_s27 + $0xd0] sm:$0xf] }
  0xcc   : > { %5232 = vmatpush3.bf16.msra.mxu0 %v2902_v40  ;;  %5238 = vmatpush3.bf16.msra.mxu1 %v2950_v41  ;;  %v4753_v27 = vcombine.low %v4745_v19, %v4746_v20 }
  0xcd   : > { %5233 = vmatprep.mubr.msk.bf16.mxu0 %vm5451_vm1, %v5450_v2  ;;  %5239 = vmatprep.mubr.msk.bf16.mxu1 %vm5451_vm1, %v5450_v2 }
  0xce   : > { %5243 = vmatprep.subr.bf16.mxu0 %v5450_v2  ;;  %5249 = vmatprep.subr.bf16.mxu1 %v5450_v2  ;;  %v3504_v36 = vshll.u32 %v4753_v27, 16  ;;  %v3502_v44 = vshrl.u32 %v4753_v27, 16  ;;  %v4772_v27 = vld [vmem:[%s6195_s1 + $0x4] sm:$0x3] }
  0xd0   : > { %v3506_v45 = vrot.slane %v3504_v36, 1 }
  0xd3   : > { %5234 = vmatmul.mubr.msk.bf16.vlgmr.msra.gmra.mrb[96].mxu0 %vm209_vm2, %v4715_v38  ;;  %5240 = vmatmul.mubr.msk.bf16.vlgmr.msra.gmra.mrb[96].mxu1 %vm209_vm2, %v4717_v46 }
  0xd4   : > { %5244 = vmatpush3.bf16.msra.mxu0 %v3010_v49  ;;  %5250 = vmatpush3.bf16.msra.mxu1 %v3068_v50  ;;  %v4760_v49 = vld [vmem:[%s6195_s1 + $0xe] sm:$0x3]  ;;  %v3507_v50 = vor.u32 %v3506_v45, %v3502_v44 }
  0xd5   : > { %5245 = vmatprep.mubr.msk.bf16.mxu0 %vm5451_vm1, %v5450_v2  ;;  %5251 = vmatprep.mubr.msk.bf16.mxu1 %vm5451_vm1, %v5450_v2  ;;  %v3618_v63 = vsel %vm213_vm0, %v4760_v49, 0 }
  0xd6   : > { %5255 = vmatprep.subr.bf16.mxu0 %v5450_v2  ;;  %5261 = vmatprep.subr.bf16.mxu1 %v5450_v2 }
  0xdb   : > { %5246 = vmatmul.mubr.msk.bf16.vlgmr.msra.gmra.mrb[100].mxu0 %vm209_vm2, %v3005_v56  ;;  %5252 = vmatmul.mubr.msk.bf16.vlgmr.msra.gmra.mrb[100].mxu1 %vm209_vm2, %v4725_v47 }
  0xdc   : > { %5256 = vmatpush3.bf16.msra.mxu0 %v3116_v58  ;;  %5262 = vmatpush3.bf16.msra.mxu1 %v3176_v59  ;;  %v4756_v58 = vld [vmem:[%s5518_s27 + $0xe4] sm:$0x1] }
  0xdd   : > { %5257 = vmatprep.mubr.msk.bf16.mxu0 %vm5451_vm1, %v5450_v2  ;;  %5263 = vmatprep.mubr.msk.bf16.mxu1 %vm5451_vm1, %v5450_v2 }
  0xde   : > { %5267 = vmatprep.subr.bf16.mxu0 %v5450_v2  ;;  %5273 = vmatprep.subr.bf16.mxu1 %v5450_v2 }
  0xe3   : > { %5258 = vmatmul.mubr.msk.bf16.vlgmr.msra.gmra.mrb[104].mxu0 %vm209_vm2, %v4727_v1  ;;  %5264 = vmatmul.mubr.msk.bf16.vlgmr.msra.gmra.mrb[104].mxu1 %vm209_vm2, %v3171_v0  ;;  %v4763_v0 = vcombine.low %v4755_v57, %v4756_v58 }
  0xe4   : > { %5268 = vmatpush3.bf16.msra.mxu0 %v3241_v5  ;;  %5274 = vmatpush3.bf16.msra.mxu1 %v3287_v6  ;;  %v4769_v5 = vld [vmem:[%s6195_s1 + $0x2] sm:$0x3] }
  0xe5   : > { %5269 = vmatprep.mubr.msk.bf16.mxu0 %vm5451_vm1, %v5450_v2  ;;  %5275 = vmatprep.mubr.msk.bf16.mxu1 %vm5451_vm1, %v5450_v2  ;;  %v3668_v20 = vshrl.u32 %v4763_v0, 16 }
  0xe6   : > { %v251_v8 = vpop.f32.mrb[0].mxu0  ;;  %v297_v9 = vpop.f32.mrb[0].mxu1  ;;  %5279 = vmatprep.subr.bf16.mxu0 %v5450_v2  ;;  %5285 = vmatprep.subr.bf16.mxu1 %v5450_v2 }
  0xe7   : > { %v298_v12 = vadd.f32 %v297_v9, %v251_v8  ;;  %v4947_v13 = vpop.f32.mrb[1].mxu0  ;;  %v4953_v14 = vpop.f32.mrb[1].mxu1  ;;  %v3670_v9 = vshll.u32 %v4763_v0, 16 }
  0xe8   : > { %v254_v17 = vpop.f32.mrb[2].mxu0  ;;  %v300_v18 = vpop.f32.mrb[2].mxu1  ;;  %v6064_v13 = vld [vmem:[%s5518_s27 + $0xe0] sm:$0xf]  ;;  %v4767_v14 = vld [vmem:[%s5518_s27 + $0xe4] sm:$0x1] }
  0xe9   : > { %v4948_v21 = vpop.f32.mrb[3].mxu0  ;;  %v4954_v22 = vpop.f32.mrb[3].mxu1  ;;  %v3678_v18 = vsel %vm213_vm0, %v4762_v4, 0 }
  0xea   : > { %v3672_v21 = vrot.slane %v3670_v9, 1  ;;  %v4773_v22 = vcombine.low %v6064_v13, %v4767_v14 }
  0xeb   : > { %5270 = vmatmul.mubr.msk.bf16.vlgmr.msra.gmra.mrb[108].mxu0 %vm209_vm2, %v4738_v15  ;;  %5276 = vmatmul.mubr.msk.bf16.vlgmr.msra.gmra.mrb[108].mxu1 %vm209_vm2, %v4736_v3 }
  0xec   : > { %5280 = vmatpush3.bf16.msra.mxu0 %v3346_v23  ;;  %5286 = vmatpush3.bf16.msra.mxu1 %v3404_v24  ;;  %v6075_v23 = vld [vmem:[%s6196_s2] ss:$0 sm:$0xff] }
  0xed   : > { %5281 = vmatprep.mubr.msk.bf16.mxu0 %vm5451_vm1, %v5450_v2  ;;  %5287 = vmatprep.mubr.msk.bf16.mxu1 %vm5451_vm1, %v5450_v2 }
  0xee   : > { %v357_v28 = vpop.f32.mrb[4].mxu0  ;;  %v416_v29 = vpop.f32.mrb[4].mxu1  ;;  %5291 = vmatprep.subr.bf16.mxu0 %v5450_v2  ;;  %5297 = vmatprep.subr.bf16.mxu1 %v5450_v2 }
  0xef   : > { %v363_v33 = vadd.f32 %v357_v28, %v298_v12  ;;  %v4959_v34 = vpop.f32.mrb[5].mxu0  ;;  %v4965_v35 = vpop.f32.mrb[5].mxu1  ;;  %v3673_v28 = vor.u32 %v3672_v21, %v3668_v20 }
  0xf0   : > { %v360_v37 = vpop.f32.mrb[6].mxu0  ;;  %v419_v38 = vpop.f32.mrb[6].mxu1  ;;  %v4768_v35 = vld [vmem:[%s5518_s27 + $0xe8] sm:$0xf] }
  0xf1   : > { %v422_v39 = vadd.f32 %v416_v29, %v363_v33  ;;  %v4960_v40 = vpop.f32.mrb[7].mxu0  ;;  %v4966_v41 = vpop.f32.mrb[7].mxu1 }
  0xf2   : > { %v3848_v40 = vsel %vm213_vm0, %v4772_v27, 0 }
  0xf3   : > { %5282 = vmatmul.mubr.msk.bf16.vlgmr.msra.gmra.mrb[112].mxu0 %vm209_vm2, %v3341_v32  ;;  %5288 = vmatmul.mubr.msk.bf16.vlgmr.msra.gmra.mrb[112].mxu1 %vm209_vm2, %v4745_v19  ;;  %v3743_v19 = vsel %vm213_vm0, %v4769_v5, 0  ;;  %v3840_v32 = vshll.u32 %v4773_v22, 16 }
  0xf4   : > { %5292 = vmatpush3.bf16.msra.mxu0 %v3452_v42  ;;  %5298 = vmatpush3.bf16.msra.mxu1 %v3512_v43  ;;  %v3838_v42 = vshrl.u32 %v4773_v22, 16 }
  0xf5   : > { %5293 = vmatprep.mubr.msk.bf16.mxu0 %vm5451_vm1, %v5450_v2  ;;  %5299 = vmatprep.mubr.msk.bf16.mxu1 %vm5451_vm1, %v5450_v2  ;;  %v3842_v43 = vrot.slane %v3840_v32, 1 }
  0xf6   : > { %v465_v46 = vpop.f32.mrb[8].mxu0  ;;  %v526_v47 = vpop.f32.mrb[8].mxu1  ;;  %5303 = vmatprep.subr.bf16.mxu0 %v5450_v2  ;;  %5309 = vmatprep.subr.bf16.mxu1 %v5450_v2 }
  0xf7   : > { %v471_v51 = vadd.f32 %v465_v46, %v422_v39  ;;  %v4971_v52 = vpop.f32.mrb[9].mxu0  ;;  %v4977_v53 = vpop.f32.mrb[9].mxu1  ;;  %v3789_v39 = vsel %vm213_vm0, %v3737_v26, 0 }
  0xf8   : > { %v468_v55 = vpop.f32.mrb[10].mxu0  ;;  %v529_v56 = vpop.f32.mrb[10].mxu1  ;;  %v3843_v52 = vor.u32 %v3842_v43, %v3838_v42 }
  0xf9   : > { %v532_v59 = vadd.f32 %v526_v47, %v471_v51  ;;  %v4972_v60 = vpop.f32.mrb[11].mxu0  ;;  %v4978_v61 = vpop.f32.mrb[11].mxu1  ;;  %v4778_v47 = vld [vmem:[%s6195_s1 + $0x6] sm:$0x3]  ;;  %v4775_v55 = vld [vmem:[%s5518_s27 + $0xf0] sm:$0xf] }
  0xfa   : > { %v4776_v56 = vld [vmem:[%s5518_s27 + $0xf4] sm:$0x1]  ;;  %v3906_v60 = vsel %vm213_vm0, %v4778_v47, 0  ;;  %v3954_v61 = vsel %vm213_vm0, %v4780_v48, 0  ;;  %v4787_v48 = vld [vmem:[%s5518_s27 + $0x108] sm:$0xf] }
  0xfb   : > { %5294 = vmatmul.mubr.msk.bf16.vlgmr.msra.gmra.mrb[116].mxu0 %vm209_vm2, %v4747_v54  ;;  %5300 = vmatmul.mubr.msk.bf16.vlgmr.msra.gmra.mrb[116].mxu1 %vm209_vm2, %v3507_v50 }
  0xfc   : > { %5304 = vmatpush3.bf16.msra.mxu0 %v3570_v62  ;;  %5310 = vmatpush3.bf16.msra.mxu1 %v3618_v63  ;;  %v4783_v62 = vcombine.low %v4775_v55, %v4776_v56 }
  0xfd   : > { %5305 = vmatprep.mubr.msk.bf16.mxu0 %vm5451_vm1, %v5450_v2  ;;  %5311 = vmatprep.mubr.msk.bf16.mxu1 %vm5451_vm1, %v5450_v2 }
  0xfe   : > { %v585_v1 = vpop.f32.mrb[12].mxu0  ;;  %v634_v3 = vpop.f32.mrb[12].mxu1  ;;  %5315 = vmatprep.subr.bf16.mxu0 %v5450_v2  ;;  %5321 = vmatprep.subr.bf16.mxu1 %v5450_v2 }
  0xff   : > { %v591_v6 = vadd.f32 %v585_v1, %v532_v59  ;;  %v4983_v7 = vpop.f32.mrb[13].mxu0  ;;  %v4989_v8 = vpop.f32.mrb[13].mxu1  ;;  %v4782_v1 = vld [vmem:[%s6195_s1 + $0xa] sm:$0x3] }
 0x100   : > { %v588_v11 = vpop.f32.mrb[14].mxu0  ;;  %v637_v12 = vpop.f32.mrb[14].mxu1  ;;  %v4006_v7 = vshll.u32 %v4783_v62, 16  ;;  %v4777_v8 = vld [vmem:[%s5518_s27 + $0xf8] sm:$0xf] }
 0x101   : > { %v640_v15 = vadd.f32 %v634_v3, %v591_v6  ;;  %v4984_v16 = vpop.f32.mrb[15].mxu0  ;;  %v4990_v17 = vpop.f32.mrb[15].mxu1  ;;  %v4788_v3 = vld [vmem:[%s6195_s1 + $0xc] sm:$0x3]  ;;  %v4785_v11 = vld [vmem:[%s5518_s27 + $0x100] sm:$0xf] }
 0x102   : > { %v4786_v12 = vld [vmem:[%s5518_s27 + $0x104] sm:$0x1]  ;;  %v4014_v16 = vsel %vm213_vm0, %v4782_v1, 0  ;;  %v4072_v17 = vsel %vm213_vm0, %v4788_v3, 0 }
 0x103   : > { %5306 = vmatmul.mubr.msk.bf16.vlgmr.msra.gmra.mrb[120].mxu0 %vm209_vm2, %v4755_v57  ;;  %5312 = vmatmul.mubr.msk.bf16.vlgmr.msra.gmra.mrb[120].mxu1 %vm209_vm2, %v4757_v10  ;;  %v4793_v20 = vcombine.low %v4785_v11, %v4786_v12 }
 0x104   : > { %5316 = vmatpush3.bf16.msra.mxu0 %v3678_v18  ;;  %5322 = vmatpush3.bf16.msra.mxu1 %v3743_v19  ;;  %v4004_v18 = vshrl.u32 %v4783_v62, 16  ;;  %v4008_v19 = vrot.slane %v4006_v7, 1 }
 0x105   : > { %5317 = vmatprep.mubr.msk.bf16.mxu0 %vm5451_vm1, %v5450_v2  ;;  %5323 = vmatprep.mubr.msk.bf16.mxu1 %vm5451_vm1, %v5450_v2 }
 0x106   : > { %v695_v24 = vpop.f32.mrb[16].mxu0  ;;  %v767_v25 = vpop.f32.mrb[16].mxu1  ;;  %5327 = vmatprep.subr.bf16.mxu0 %v5450_v2  ;;  %5333 = vmatprep.subr.bf16.mxu1 %v5450_v2  ;;  %v4009_v26 = vor.u32 %v4008_v19, %v4004_v18 }
 0x107   : > { %v701_v29 = vadd.f32 %v695_v24, %v640_v15  ;;  %v4995_v30 = vpop.f32.mrb[17].mxu0  ;;  %v5001_v31 = vpop.f32.mrb[17].mxu1  ;;  %v4790_v24 = vld [vmem:[%s6195_s1 + $0xe] sm:$0x3] }
 0x108   : > { %v698_v33 = vpop.f32.mrb[18].mxu0  ;;  %v770_v34 = vpop.f32.mrb[18].mxu1  ;;  %v4172_v30 = vshll.u32 %v4793_v20, 16 }
 0x109   : > { %v708_v36 = vadd.f32 %v6075_v23, %v701_v29  ;;  %v4996_v37 = vpop.f32.mrb[19].mxu0  ;;  %v5002_v38 = vpop.f32.mrb[19].mxu1 }
 0x10a   : > { %v4170_v38 = vshrl.u32 %v4793_v20, 16 }
 0x10b   : > { %v709_v41 = vmax.f32 %v708_v36, 0.0  ;;  %5318 = vmatmul.mubr.msk.bf16.vlgmr.msra.gmra.mrb[124].mxu0 %vm209_vm2, %v3673_v28  ;;  %5324 = vmatmul.mubr.msk.bf16.vlgmr.msra.gmra.mrb[124].mxu1 %vm209_vm2, %v4768_v35  ;;  %v4120_v36 = vsel %vm213_vm0, %v4790_v24, 0 }
 0x10c   : > { %5328 = vmatpush3.bf16.msra.mxu0 %v3789_v39  ;;  %5334 = vmatpush3.bf16.msra.mxu1 %v3848_v40  ;;  %v4174_v39 = vrot.slane %v4172_v30, 1 }
 0x10d   : > { %v710_v44 = vpack.c.bf16 %v709_v41, %v709_v41  ;;  %5329 = vmatprep.mubr.msk.bf16.mxu0 %vm5451_vm1, %v5450_v2  ;;  %5335 = vmatprep.mubr.msk.bf16.mxu1 %vm5451_vm1, %v5450_v2 }
 0x10e   : > { %v813_v45 = vpop.f32.mrb[20].mxu0  ;;  %v872_v46 = vpop.f32.mrb[20].mxu1  ;;  %5339 = vmatprep.subr.bf16.mxu0 %v5450_v2  ;;  %5345 = vmatprep.subr.bf16.mxu1 %v5450_v2  ;;  %v4175_v42 = vor.u32 %v4174_v39, %v4170_v38 }
 0x10f   : > { %712 = vst.msk [vmem:[%s6099_s24] sm:$0xf] %vm711_vm3, %v710_v44  ;;  %v814_v49 = vadd.f32 %v813_v45, %v767_v25  ;;  %v5007_v50 = vpop.f32.mrb[21].mxu0  ;;  %v5013_v51 = vpop.f32.mrb[21].mxu1  ;;  %v4792_v25 = vld [vmem:[%s6195_s1 + $0x10] sm:$0x3] }
 0x110   : > { %v816_v53 = vpop.f32.mrb[22].mxu0  ;;  %v875_v54 = vpop.f32.mrb[22].mxu1  ;;  %v4180_v37 = vsel %vm213_vm0, %v4792_v25, 0 }
 0x111   : > { %v878_v57 = vadd.f32 %v872_v46, %v814_v49  ;;  %v5008_v58 = vpop.f32.mrb[23].mxu0  ;;  %v5014_v59 = vpop.f32.mrb[23].mxu1 }
 0x113   : > { %5330 = vmatmul.mubr.msk.bf16.vlgmr.msra.gmra.mrb[128].mxu0 %vm209_vm2, %v6064_v13  ;;  %5336 = vmatmul.mubr.msk.bf16.vlgmr.msra.gmra.mrb[128].mxu1 %vm209_vm2, %v3843_v52 }
 0x114   : > { %5340 = vmatpush3.bf16.msra.mxu0 %v3906_v60  ;;  %5346 = vmatpush3.bf16.msra.mxu1 %v3954_v61 }
 0x115   : > { %5341 = vmatprep.mubr.msk.bf16.mxu0 %vm5451_vm1, %v5450_v2  ;;  %5347 = vmatprep.mubr.msk.bf16.mxu1 %vm5451_vm1, %v5450_v2 }
 0x116   : > { %v930_v63 = vpop.f32.mrb[24].mxu0  ;;  %v978_v0 = vpop.f32.mrb[24].mxu1  ;;  %5351 = vmatprep.subr.bf16.mxu0 %v5450_v2  ;;  %5357 = vmatprep.subr.bf16.mxu1 %v5450_v2 }
 0x117   : > { %v936_v4 = vadd.f32 %v930_v63, %v878_v57  ;;  %v5019_v5 = vpop.f32.mrb[25].mxu0  ;;  %v5025_v6 = vpop.f32.mrb[25].mxu1 }
 0x118   : > { %v933_v9 = vpop.f32.mrb[26].mxu0  ;;  %v981_v10 = vpop.f32.mrb[26].mxu1 }
 0x119   : > { %v984_v13 = vadd.f32 %v978_v0, %v936_v4  ;;  %v5020_v14 = vpop.f32.mrb[27].mxu0  ;;  %v5026_v15 = vpop.f32.mrb[27].mxu1 }
 0x11b   : > { %5342 = vmatmul.mubr.msk.bf16.vlgmr.msra.gmra.mrb[132].mxu0 %vm209_vm2, %v4775_v55  ;;  %5348 = vmatmul.mubr.msk.bf16.vlgmr.msra.gmra.mrb[132].mxu1 %vm209_vm2, %v4777_v8 }
 0x11c   : > { %5352 = vmatpush3.bf16.msra.mxu0 %v4014_v16  ;;  %5358 = vmatpush3.bf16.msra.mxu1 %v4072_v17 }
 0x11d   : > { %5353 = vmatprep.mubr.msk.bf16.mxu0 %vm5451_vm1, %v5450_v2  ;;  %5359 = vmatprep.mubr.msk.bf16.mxu1 %vm5451_vm1, %v5450_v2 }
 0x11e   : > { %v1038_v21 = vpop.f32.mrb[28].mxu0  ;;  %v1096_v22 = vpop.f32.mrb[28].mxu1  ;;  %5363 = vmatprep.subr.bf16.mxu0 %v5450_v2  ;;  %5369 = vmatprep.subr.bf16.mxu1 %v5450_v2 }
 0x11f   : > { %v1044_v27 = vadd.f32 %v1038_v21, %v984_v13  ;;  %v5031_v28 = vpop.f32.mrb[29].mxu0  ;;  %v5037_v29 = vpop.f32.mrb[29].mxu1 }
 0x120   : > { %v1041_v31 = vpop.f32.mrb[30].mxu0  ;;  %v1099_v32 = vpop.f32.mrb[30].mxu1 }
 0x121   : > { %v1102_v33 = vadd.f32 %v1096_v22, %v1044_v27  ;;  %v5032_v34 = vpop.f32.mrb[31].mxu0  ;;  %v5038_v35 = vpop.f32.mrb[31].mxu1 }
 0x123   : > { %5354 = vmatmul.mubr.msk.bf16.vlgmr.msra.gmra.mrb[136].mxu0 %vm209_vm2, %v4009_v26  ;;  %5360 = vmatmul.mubr.msk.bf16.vlgmr.msra.gmra.mrb[136].mxu1 %vm209_vm2, %v4785_v11 }
 0x124   : > { %5364 = vmatpush3.bf16.msra.mxu0 %v4120_v36  ;;  %5370 = vmatpush3.bf16.msra.mxu1 %v4180_v37 }
 0x125   : > { %5365 = vmatprep.mubr.msk.bf16.mxu0 %vm5451_vm1, %v5450_v2  ;;  %5371 = vmatprep.mubr.msk.bf16.mxu1 %vm5451_vm1, %v5450_v2 }
 0x126   : > { %v1144_v40 = vpop.f32.mrb[32].mxu0  ;;  %v1204_v41 = vpop.f32.mrb[32].mxu1 }
 0x127   : > { %v1150_v43 = vadd.f32 %v1144_v40, %v1102_v33  ;;  %v5043_v44 = vpop.f32.mrb[33].mxu0  ;;  %v5049_v45 = vpop.f32.mrb[33].mxu1 }
 0x128   : > { %v1147_v46 = vpop.f32.mrb[34].mxu0  ;;  %v1207_v47 = vpop.f32.mrb[34].mxu1 }
 0x129   : > { %v1210_v49 = vadd.f32 %v1204_v41, %v1150_v43  ;;  %v5044_v50 = vpop.f32.mrb[35].mxu0  ;;  %v5050_v51 = vpop.f32.mrb[35].mxu1 }
 0x12b   : > { %v1211_v52 = vadd.f32 %v6075_v23, %v1210_v49  ;;  %5366 = vmatmul.mubr.msk.bf16.vlgmr.msra.gmra.mrb[140].mxu0 %vm209_vm2, %v4787_v48  ;;  %5372 = vmatmul.mubr.msk.bf16.vlgmr.msra.gmra.mrb[140].mxu1 %vm209_vm2, %v4175_v42 }
 0x12d   : > { %v1212_v2 = vmax.f32 %v1211_v52, 0.0 }
 0x12e   : > { %v1269_v53 = vpop.f32.mrb[36].mxu0  ;;  %v1315_v54 = vpop.f32.mrb[36].mxu1 }
 0x12f   : > { %v1213_v55 = vpack.c.bf16 %v1212_v2, %v1212_v2  ;;  %v1316_v56 = vadd.f32 %v1315_v54, %v1269_v53  ;;  %v5055_v57 = vpop.f32.mrb[37].mxu0  ;;  %v5061_v58 = vpop.f32.mrb[37].mxu1 }
 0x130   : > { %v1272_v59 = vpop.f32.mrb[38].mxu0  ;;  %v1318_v60 = vpop.f32.mrb[38].mxu1 }
 0x131   : > { %4615 = vst.msk [vmem:[%s6099_s24 + $0x4] sm:$0xf] %vm711_vm3, %v1213_v55  ;;  %v5056_v61 = vpop.f32.mrb[39].mxu0  ;;  %v5062_v62 = vpop.f32.mrb[39].mxu1 }
 0x136   : > { %v1374_v63 = vpop.f32.mrb[40].mxu0  ;;  %v1432_v0 = vpop.f32.mrb[40].mxu1 }
 0x137   : > { %v1380_v1 = vadd.f32 %v1374_v63, %v1316_v56  ;;  %v5067_v3 = vpop.f32.mrb[41].mxu0  ;;  %v5073_v4 = vpop.f32.mrb[41].mxu1 }
 0x138   : > { %v1377_v5 = vpop.f32.mrb[42].mxu0  ;;  %v1435_v6 = vpop.f32.mrb[42].mxu1 }
 0x139   : > { %v1438_v7 = vadd.f32 %v1432_v0, %v1380_v1  ;;  %v5068_v8 = vpop.f32.mrb[43].mxu0  ;;  %v5074_v9 = vpop.f32.mrb[43].mxu1 }
 0x13e   : > { %v1480_v10 = vpop.f32.mrb[44].mxu0  ;;  %v1540_v11 = vpop.f32.mrb[44].mxu1 }
 0x13f   : > { %v1486_v12 = vadd.f32 %v1480_v10, %v1438_v7  ;;  %v5079_v13 = vpop.f32.mrb[45].mxu0  ;;  %v5085_v14 = vpop.f32.mrb[45].mxu1 }
 0x140   : > { %v1483_v15 = vpop.f32.mrb[46].mxu0  ;;  %v1543_v16 = vpop.f32.mrb[46].mxu1 }
 0x141   : > { %v1546_v17 = vadd.f32 %v1540_v11, %v1486_v12  ;;  %v5080_v18 = vpop.f32.mrb[47].mxu0  ;;  %v5086_v19 = vpop.f32.mrb[47].mxu1 }
 0x146   : > { %v1598_v20 = vpop.f32.mrb[48].mxu0  ;;  %v1646_v21 = vpop.f32.mrb[48].mxu1 }
 0x147   : > { %v1604_v22 = vadd.f32 %v1598_v20, %v1546_v17  ;;  %v5091_v24 = vpop.f32.mrb[49].mxu0  ;;  %v5097_v25 = vpop.f32.mrb[49].mxu1 }
 0x148   : > { %v1601_v26 = vpop.f32.mrb[50].mxu0  ;;  %v1649_v27 = vpop.f32.mrb[50].mxu1 }
 0x149   : > { %v1652_v28 = vadd.f32 %v1646_v21, %v1604_v22  ;;  %v5092_v29 = vpop.f32.mrb[51].mxu0  ;;  %v5098_v30 = vpop.f32.mrb[51].mxu1 }
 0x14e   : > { %v1706_v31 = vpop.f32.mrb[52].mxu0  ;;  %v1771_v32 = vpop.f32.mrb[52].mxu1 }
 0x14f   : > { %v1712_v33 = vadd.f32 %v1706_v31, %v1652_v28  ;;  %v5103_v34 = vpop.f32.mrb[53].mxu0  ;;  %v5109_v35 = vpop.f32.mrb[53].mxu1 }
 0x150   : > { %v1709_v36 = vpop.f32.mrb[54].mxu0  ;;  %v1774_v37 = vpop.f32.mrb[54].mxu1 }
 0x151   : > { %v1713_v38 = vadd.f32 %v6075_v23, %v1712_v33  ;;  %v5104_v39 = vpop.f32.mrb[55].mxu0  ;;  %v5110_v40 = vpop.f32.mrb[55].mxu1 }
 0x153   : > { %v1714_v41 = vmax.f32 %v1713_v38, 0.0 }
 0x155   : > { %v1715_v42 = vpack.c.bf16 %v1714_v41, %v1714_v41 }
 0x156   : > { %v1817_v43 = vpop.f32.mrb[56].mxu0  ;;  %v1876_v44 = vpop.f32.mrb[56].mxu1 }
 0x157   : > { %4645 = vst.msk [vmem:[%s6099_s24 + $0x8] sm:$0xf] %vm711_vm3, %v1715_v42  ;;  %v1818_v45 = vadd.f32 %v1817_v43, %v1771_v32  ;;  %v5115_v46 = vpop.f32.mrb[57].mxu0  ;;  %v5121_v47 = vpop.f32.mrb[57].mxu1 }
 0x158   : > { %v1820_v48 = vpop.f32.mrb[58].mxu0  ;;  %v1879_v49 = vpop.f32.mrb[58].mxu1 }
 0x159   : > { %v1882_v50 = vadd.f32 %v1876_v44, %v1818_v45  ;;  %v5116_v51 = vpop.f32.mrb[59].mxu0  ;;  %v5122_v52 = vpop.f32.mrb[59].mxu1 }
 0x15e   : > { %v1934_v2 = vpop.f32.mrb[60].mxu0  ;;  %v1982_v53 = vpop.f32.mrb[60].mxu1 }
 0x15f   : > { %v1940_v54 = vadd.f32 %v1934_v2, %v1882_v50  ;;  %v5127_v55 = vpop.f32.mrb[61].mxu0  ;;  %v5133_v56 = vpop.f32.mrb[61].mxu1 }
 0x160   : > { %v1937_v57 = vpop.f32.mrb[62].mxu0  ;;  %v1985_v58 = vpop.f32.mrb[62].mxu1 }
 0x161   : > { %v1988_v59 = vadd.f32 %v1982_v53, %v1940_v54  ;;  %v5128_v60 = vpop.f32.mrb[63].mxu0  ;;  %v5134_v61 = vpop.f32.mrb[63].mxu1 }
 0x166   : > { %v2042_v62 = vpop.f32.mrb[64].mxu0  ;;  %v2100_v63 = vpop.f32.mrb[64].mxu1 }
 0x167   : > { %v2048_v0 = vadd.f32 %v2042_v62, %v1988_v59  ;;  %v5139_v1 = vpop.f32.mrb[65].mxu0  ;;  %v5145_v3 = vpop.f32.mrb[65].mxu1 }
 0x168   : > { %v2045_v4 = vpop.f32.mrb[66].mxu0  ;;  %v2103_v5 = vpop.f32.mrb[66].mxu1 }
 0x169   : > { %v2106_v6 = vadd.f32 %v2100_v63, %v2048_v0  ;;  %v5140_v7 = vpop.f32.mrb[67].mxu0  ;;  %v5146_v8 = vpop.f32.mrb[67].mxu1 }
 0x16e   : > { %v2148_v9 = vpop.f32.mrb[68].mxu0  ;;  %v2208_v10 = vpop.f32.mrb[68].mxu1 }
 0x16f   : > { %v2154_v11 = vadd.f32 %v2148_v9, %v2106_v6  ;;  %v5151_v12 = vpop.f32.mrb[69].mxu0  ;;  %v5157_v13 = vpop.f32.mrb[69].mxu1 }
 0x170   : > { %v2151_v14 = vpop.f32.mrb[70].mxu0  ;;  %v2211_v15 = vpop.f32.mrb[70].mxu1 }
 0x171   : > { %v2214_v16 = vadd.f32 %v2208_v10, %v2154_v11  ;;  %v5152_v17 = vpop.f32.mrb[71].mxu0  ;;  %v5158_v18 = vpop.f32.mrb[71].mxu1 }
 0x173   : > { %v2215_v19 = vadd.f32 %v6075_v23, %v2214_v16 }
 0x175   : > { %v2216_v20 = vmax.f32 %v2215_v19, 0.0 }
 0x176   : > { %v2273_v21 = vpop.f32.mrb[72].mxu0  ;;  %v2319_v22 = vpop.f32.mrb[72].mxu1 }
 0x177   : > { %v2217_v24 = vpack.c.bf16 %v2216_v20, %v2216_v20  ;;  %v2320_v25 = vadd.f32 %v2319_v22, %v2273_v21  ;;  %v5163_v26 = vpop.f32.mrb[73].mxu0  ;;  %v5169_v27 = vpop.f32.mrb[73].mxu1 }
 0x178   : > { %v2276_v28 = vpop.f32.mrb[74].mxu0  ;;  %v2322_v29 = vpop.f32.mrb[74].mxu1 }
 0x179   : > { %4675 = vst.msk [vmem:[%s6099_s24 + $0xc] sm:$0xf] %vm711_vm3, %v2217_v24  ;;  %v5164_v30 = vpop.f32.mrb[75].mxu0  ;;  %v5170_v31 = vpop.f32.mrb[75].mxu1 }
 0x17e   : > { %v2378_v32 = vpop.f32.mrb[76].mxu0  ;;  %v2436_v33 = vpop.f32.mrb[76].mxu1 }
 0x17f   : > { %v2384_v34 = vadd.f32 %v2378_v32, %v2320_v25  ;;  %v5175_v35 = vpop.f32.mrb[77].mxu0  ;;  %v5181_v36 = vpop.f32.mrb[77].mxu1 }
 0x180   : > { %v2381_v37 = vpop.f32.mrb[78].mxu0  ;;  %v2439_v38 = vpop.f32.mrb[78].mxu1 }
 0x181   : > { %v2442_v39 = vadd.f32 %v2436_v33, %v2384_v34  ;;  %v5176_v40 = vpop.f32.mrb[79].mxu0  ;;  %v5182_v41 = vpop.f32.mrb[79].mxu1 }
 0x186   : > { %v2484_v42 = vpop.f32.mrb[80].mxu0  ;;  %v2544_v43 = vpop.f32.mrb[80].mxu1 }
 0x187   : > { %v2490_v44 = vadd.f32 %v2484_v42, %v2442_v39  ;;  %v5187_v45 = vpop.f32.mrb[81].mxu0  ;;  %v5193_v46 = vpop.f32.mrb[81].mxu1 }
 0x188   : > { %v2487_v47 = vpop.f32.mrb[82].mxu0  ;;  %v2547_v48 = vpop.f32.mrb[82].mxu1 }
 0x189   : > { %v2550_v49 = vadd.f32 %v2544_v43, %v2490_v44  ;;  %v5188_v50 = vpop.f32.mrb[83].mxu0  ;;  %v5194_v51 = vpop.f32.mrb[83].mxu1 }
 0x18e   : > { %v2602_v52 = vpop.f32.mrb[84].mxu0  ;;  %v2650_v2 = vpop.f32.mrb[84].mxu1 }
 0x18f   : > { %v2608_v53 = vadd.f32 %v2602_v52, %v2550_v49  ;;  %v5199_v54 = vpop.f32.mrb[85].mxu0  ;;  %v5205_v55 = vpop.f32.mrb[85].mxu1 }
 0x190   : > { %v2605_v56 = vpop.f32.mrb[86].mxu0  ;;  %v2653_v57 = vpop.f32.mrb[86].mxu1 }
 0x191   : > { %v2656_v58 = vadd.f32 %v2650_v2, %v2608_v53  ;;  %v5200_v59 = vpop.f32.mrb[87].mxu0  ;;  %v5206_v60 = vpop.f32.mrb[87].mxu1 }
 0x196   : > { %v2710_v61 = vpop.f32.mrb[88].mxu0  ;;  %v2775_v62 = vpop.f32.mrb[88].mxu1 }
 0x197   : > { %v2716_v63 = vadd.f32 %v2710_v61, %v2656_v58  ;;  %v5211_v0 = vpop.f32.mrb[89].mxu0  ;;  %v5217_v1 = vpop.f32.mrb[89].mxu1 }
 0x198   : > { %v2713_v3 = vpop.f32.mrb[90].mxu0  ;;  %v2778_v4 = vpop.f32.mrb[90].mxu1 }
 0x199   : > { %v2717_v5 = vadd.f32 %v6075_v23, %v2716_v63  ;;  %v5212_v6 = vpop.f32.mrb[91].mxu0  ;;  %v5218_v7 = vpop.f32.mrb[91].mxu1 }
 0x19b   : > { %v2718_v8 = vmax.f32 %v2717_v5, 0.0 }
 0x19d   : > { %v2719_v9 = vpack.c.bf16 %v2718_v8, %v2718_v8 }
 0x19e   : > { %v2821_v10 = vpop.f32.mrb[92].mxu0  ;;  %v2880_v11 = vpop.f32.mrb[92].mxu1 }
 0x19f   : > { %4705 = vst.msk [vmem:[%s6099_s24 + $0x10] sm:$0xf] %vm711_vm3, %v2719_v9  ;;  %v2822_v12 = vadd.f32 %v2821_v10, %v2775_v62  ;;  %v5223_v13 = vpop.f32.mrb[93].mxu0  ;;  %v5229_v14 = vpop.f32.mrb[93].mxu1 }
 0x1a0   : > { %v2824_v15 = vpop.f32.mrb[94].mxu0  ;;  %v2883_v16 = vpop.f32.mrb[94].mxu1 }
 0x1a1   : > { %v2886_v17 = vadd.f32 %v2880_v11, %v2822_v12  ;;  %v5224_v18 = vpop.f32.mrb[95].mxu0  ;;  %v5230_v19 = vpop.f32.mrb[95].mxu1 }
 0x1a6   : > { %v2938_v20 = vpop.f32.mrb[96].mxu0  ;;  %v2986_v21 = vpop.f32.mrb[96].mxu1 }
 0x1a7   : > { %v2944_v22 = vadd.f32 %v2938_v20, %v2886_v17  ;;  %v5235_v24 = vpop.f32.mrb[97].mxu0  ;;  %v5241_v25 = vpop.f32.mrb[97].mxu1 }
 0x1a8   : > { %v2941_v26 = vpop.f32.mrb[98].mxu0  ;;  %v2989_v27 = vpop.f32.mrb[98].mxu1 }
 0x1a9   : > { %v2992_v28 = vadd.f32 %v2986_v21, %v2944_v22  ;;  %v5236_v29 = vpop.f32.mrb[99].mxu0  ;;  %v5242_v30 = vpop.f32.mrb[99].mxu1 }
 0x1ae   : > { %v3046_v31 = vpop.f32.mrb[100].mxu0  ;;  %v3104_v32 = vpop.f32.mrb[100].mxu1 }
 0x1af   : > { %v3052_v33 = vadd.f32 %v3046_v31, %v2992_v28  ;;  %v5247_v34 = vpop.f32.mrb[101].mxu0  ;;  %v5253_v35 = vpop.f32.mrb[101].mxu1 }
 0x1b0   : > { %v3049_v36 = vpop.f32.mrb[102].mxu0  ;;  %v3107_v37 = vpop.f32.mrb[102].mxu1 }
 0x1b1   : > { %v3110_v38 = vadd.f32 %v3104_v32, %v3052_v33  ;;  %v5248_v39 = vpop.f32.mrb[103].mxu0  ;;  %v5254_v40 = vpop.f32.mrb[103].mxu1 }
 0x1b6   : > { %v3152_v41 = vpop.f32.mrb[104].mxu0  ;;  %v3212_v42 = vpop.f32.mrb[104].mxu1 }
 0x1b7   : > { %v3158_v43 = vadd.f32 %v3152_v41, %v3110_v38  ;;  %v5259_v44 = vpop.f32.mrb[105].mxu0  ;;  %v5265_v45 = vpop.f32.mrb[105].mxu1 }
 0x1b8   : > { %v3155_v46 = vpop.f32.mrb[106].mxu0  ;;  %v3215_v47 = vpop.f32.mrb[106].mxu1 }
 0x1b9   : > { %v3218_v48 = vadd.f32 %v3212_v42, %v3158_v43  ;;  %v5260_v49 = vpop.f32.mrb[107].mxu0  ;;  %v5266_v50 = vpop.f32.mrb[107].mxu1 }
 0x1bb   : > { %v3219_v51 = vadd.f32 %v6075_v23, %v3218_v48 }
 0x1bd   : > { %v3220_v52 = vmax.f32 %v3219_v51, 0.0 }
 0x1be   : > { %v3277_v2 = vpop.f32.mrb[108].mxu0  ;;  %v3323_v53 = vpop.f32.mrb[108].mxu1 }
 0x1bf   : > { %v3221_v54 = vpack.c.bf16 %v3220_v52, %v3220_v52  ;;  %v3324_v55 = vadd.f32 %v3323_v53, %v3277_v2  ;;  %v5271_v56 = vpop.f32.mrb[109].mxu0  ;;  %v5277_v57 = vpop.f32.mrb[109].mxu1 }
 0x1c0   : > { %v3280_v58 = vpop.f32.mrb[110].mxu0  ;;  %v3326_v59 = vpop.f32.mrb[110].mxu1 }
 0x1c1   : > { %4735 = vst.msk [vmem:[%s6099_s24 + $0x14] sm:$0xf] %vm711_vm3, %v3221_v54  ;;  %v5272_v60 = vpop.f32.mrb[111].mxu0  ;;  %v5278_v61 = vpop.f32.mrb[111].mxu1 }
 0x1c6   : > { %v3382_v62 = vpop.f32.mrb[112].mxu0  ;;  %v3440_v63 = vpop.f32.mrb[112].mxu1 }
 0x1c7   : > { %v3388_v0 = vadd.f32 %v3382_v62, %v3324_v55  ;;  %v5283_v1 = vpop.f32.mrb[113].mxu0  ;;  %v5289_v3 = vpop.f32.mrb[113].mxu1 }
 0x1c8   : > { %v3385_v4 = vpop.f32.mrb[114].mxu0  ;;  %v3443_v5 = vpop.f32.mrb[114].mxu1 }
 0x1c9   : > { %v3446_v6 = vadd.f32 %v3440_v63, %v3388_v0  ;;  %v5284_v7 = vpop.f32.mrb[115].mxu0  ;;  %v5290_v8 = vpop.f32.mrb[115].mxu1 }
 0x1ce   : > { %v3488_v9 = vpop.f32.mrb[116].mxu0  ;;  %v3548_v10 = vpop.f32.mrb[116].mxu1 }
 0x1cf   : > { %v3494_v11 = vadd.f32 %v3488_v9, %v3446_v6  ;;  %v5295_v12 = vpop.f32.mrb[117].mxu0  ;;  %v5301_v13 = vpop.f32.mrb[117].mxu1 }
 0x1d0   : > { %v3491_v14 = vpop.f32.mrb[118].mxu0  ;;  %v3551_v15 = vpop.f32.mrb[118].mxu1 }
 0x1d1   : > { %v3554_v16 = vadd.f32 %v3548_v10, %v3494_v11  ;;  %v5296_v17 = vpop.f32.mrb[119].mxu0  ;;  %v5302_v18 = vpop.f32.mrb[119].mxu1 }
 0x1d6   : > { %v3606_v19 = vpop.f32.mrb[120].mxu0  ;;  %v3654_v20 = vpop.f32.mrb[120].mxu1 }
 0x1d7   : > { %v3612_v21 = vadd.f32 %v3606_v19, %v3554_v16  ;;  %v5307_v22 = vpop.f32.mrb[121].mxu0  ;;  %v5313_v24 = vpop.f32.mrb[121].mxu1 }
 0x1d8   : > { %v3609_v25 = vpop.f32.mrb[122].mxu0  ;;  %v3657_v26 = vpop.f32.mrb[122].mxu1 }
 0x1d9   : > { %v3660_v27 = vadd.f32 %v3654_v20, %v3612_v21  ;;  %v5308_v28 = vpop.f32.mrb[123].mxu0  ;;  %v5314_v29 = vpop.f32.mrb[123].mxu1 }
 0x1de   : > { %v3714_v30 = vpop.f32.mrb[124].mxu0  ;;  %v3779_v31 = vpop.f32.mrb[124].mxu1 }
 0x1df   : > { %v3720_v32 = vadd.f32 %v3714_v30, %v3660_v27  ;;  %v5319_v33 = vpop.f32.mrb[125].mxu0  ;;  %v5325_v34 = vpop.f32.mrb[125].mxu1 }
 0x1e0   : > { %v3717_v35 = vpop.f32.mrb[126].mxu0  ;;  %v3782_v36 = vpop.f32.mrb[126].mxu1 }
 0x1e1   : > { %v3721_v37 = vadd.f32 %v6075_v23, %v3720_v32  ;;  %v5320_v38 = vpop.f32.mrb[127].mxu0  ;;  %v5326_v39 = vpop.f32.mrb[127].mxu1 }
 0x1e3   : > { %v3722_v40 = vmax.f32 %v3721_v37, 0.0 }
 0x1e5   : > { %v3723_v41 = vpack.c.bf16 %v3722_v40, %v3722_v40 }
 0x1e6   : > { %v3825_v42 = vpop.f32.mrb[128].mxu0  ;;  %v3884_v43 = vpop.f32.mrb[128].mxu1 }
 0x1e7   : > { %4765 = vst.msk [vmem:[%s6099_s24 + $0x18] sm:$0xf] %vm711_vm3, %v3723_v41  ;;  %v3826_v44 = vadd.f32 %v3825_v42, %v3779_v31  ;;  %v5331_v45 = vpop.f32.mrb[129].mxu0  ;;  %v5337_v46 = vpop.f32.mrb[129].mxu1 }
 0x1e8   : > { %v3828_v47 = vpop.f32.mrb[130].mxu0  ;;  %v3887_v48 = vpop.f32.mrb[130].mxu1 }
 0x1e9   : > { %v3890_v49 = vadd.f32 %v3884_v43, %v3826_v44  ;;  %v5332_v50 = vpop.f32.mrb[131].mxu0  ;;  %v5338_v51 = vpop.f32.mrb[131].mxu1 }
 0x1ee   : > { %v3942_v52 = vpop.f32.mrb[132].mxu0  ;;  %v3990_v2 = vpop.f32.mrb[132].mxu1 }
 0x1ef   : > { %v3948_v53 = vadd.f32 %v3942_v52, %v3890_v49  ;;  %v5343_v54 = vpop.f32.mrb[133].mxu0  ;;  %v5349_v55 = vpop.f32.mrb[133].mxu1 }
 0x1f0   : > { %v3945_v56 = vpop.f32.mrb[134].mxu0  ;;  %v3993_v57 = vpop.f32.mrb[134].mxu1 }
 0x1f1   : > { %v3996_v58 = vadd.f32 %v3990_v2, %v3948_v53  ;;  %v5344_v59 = vpop.f32.mrb[135].mxu0  ;;  %v5350_v60 = vpop.f32.mrb[135].mxu1 }
 0x1f6   : > { %v4050_v61 = vpop.f32.mrb[136].mxu0  ;;  %v4108_v62 = vpop.f32.mrb[136].mxu1 }
 0x1f7   : > { %v4056_v63 = vadd.f32 %v4050_v61, %v3996_v58  ;;  %v5355_v0 = vpop.f32.mrb[137].mxu0  ;;  %v5361_v1 = vpop.f32.mrb[137].mxu1 }
 0x1f8   : > { %v4053_v3 = vpop.f32.mrb[138].mxu0  ;;  %v4111_v4 = vpop.f32.mrb[138].mxu1 }
 0x1f9   : > { %v4114_v5 = vadd.f32 %v4108_v62, %v4056_v63  ;;  %v5356_v6 = vpop.f32.mrb[139].mxu0  ;;  %v5362_v7 = vpop.f32.mrb[139].mxu1 }
 0x1fe   : > { %v4156_v8 = vpop.f32.mrb[140].mxu0  ;;  %v4216_v9 = vpop.f32.mrb[140].mxu1 }
 0x1ff   : > { %v4162_v10 = vadd.f32 %v4156_v8, %v4114_v5  ;;  %v5367_v11 = vpop.f32.mrb[141].mxu0  ;;  %v5373_v12 = vpop.f32.mrb[141].mxu1 }
 0x200   : > { %v4159_v13 = vpop.f32.mrb[142].mxu0  ;;  %v4219_v14 = vpop.f32.mrb[142].mxu1 }
 0x201   : > { %v4222_v15 = vadd.f32 %v4216_v9, %v4162_v10  ;;  %v5368_v16 = vpop.f32.mrb[143].mxu0  ;;  %v5374_v17 = vpop.f32.mrb[143].mxu1 }
 0x203   : > { %v4223_v18 = vadd.f32 %v6075_v23, %v4222_v15 }
 0x205   : > { %v4224_v19 = vmax.f32 %v4223_v18, 0.0 }
 0x207   : > { %v4225_v20 = vpack.c.bf16 %v4224_v19, %v4224_v19 }
 0x209   : > { %4795 = vst.msk [vmem:[%s6099_s24 + $0x1c] sm:$0xf] %vm711_vm3, %v4225_v20 }
 0x20a PF: > { %s13_s14 = sadd.s32 1, %s5448_s14   ;;  %s6198_s12 = smov %s5444_s13 }
 0x20b   : > { %p10_p5 = scmp.ge.s32.totalorder %s13_s14, 4   ;;  %s6199_s13 = smov %s6201_s15 }
 0x20d   :  { %12 = sbr.rel (!%p10_p5) target bundleno = 2 (0x2), region = 125 }

</bundles_post_ra>
